<compile_context>
chip_gen: v7x
topology: tpu7x:2x2x1
jax: 0.10.0
libtpu: 0.0.40
codegen_flags: <defaults>
</compile_context>

<pallas_src>
import functools

import numpy as np
import jax
import jax.numpy as jnp
from jax import lax
from jax.experimental import pallas as pl
from jax.experimental.pallas import tpu as pltpu

LANE = 128
SUBLANE = 8


def _round_up(x, m):
    return (x + m - 1) // m * m


def conv_block_kernel(x_ref, w1_ref, b1_ref, w2_ref, b2_ref, o_ref, *,
                      wp, n1, n2, th, img_h, img_w, slope, im2col1):
    """One row-band of one image per grid step.

    x_ref  : (1, 1, N1, 128)        im2col'd conv1 input (small Cin), or
             (1, 1, P,  Cin_p)      spatially-padded flat slab (large Cin)
    w1_ref : (1, 128, Cmid_p) or (9, Cin_p, Cmid_p)
    b1_ref : (1, Cmid_p)  f32
    w2_ref : (9, Cmid_p, Cout_p)
    b2_ref : (1, Cout_p)  f32
    o_ref  : (1, 1, N2, Cout_p)     conv2 output, flat with row stride wp
    """
    c_mid = w2_ref.shape[1]
    c_out = w2_ref.shape[2]

    # ---- conv1 (3x3, pad=1): single aligned matmul (im2col) or 9 shifted dots
    if im2col1:
        acc1 = jnp.dot(x_ref[0, 0], w1_ref[0], preferred_element_type=jnp.float32)
    else:
        acc1 = jnp.zeros((n1, c_mid), jnp.float32)
        for ky in range(3):
            for kx in range(3):
                d = ky * wp + kx                               # static offset
                acc1 = acc1 + jnp.dot(x_ref[0, 0, pl.ds(d, n1), :],
                                      w1_ref[3 * ky + kx],
                                      preferred_element_type=jnp.float32)

    y = acc1 + b1_ref[...]
    y = jnp.where(y >= 0, y, y * slope)                        # LeakyReLU(0.2)

    # ---- in-kernel interior mask (this IS conv2's zero padding ring) ---------
    # a = row // wp, b = row % wp computed with exact f32 floor math (no int div).
    rows = lax.broadcasted_iota(jnp.int32, (n1, c_mid), 0).astype(jnp.float32)
    a_loc = jnp.floor((rows + 0.5) * (1.0 / wp))
    col = rows - a_loc * wp
    row_off = (pl.program_id(1) * th).astype(jnp.float32)      # band's global row
    a_glob = a_loc + row_off
    keep = ((a_glob >= 1.0) & (a_glob <= float(img_h)) &
            (col >= 1.0) & (col <= float(img_w)))
    y = jnp.where(keep, y, 0.0)                                # select, not multiply

    # ---- conv2 (3x3, pad=1) + LeakyReLU ---------------------------------------
    yc = y.astype(w2_ref.dtype)                                # single cast
    acc2 = jnp.zeros((n2, c_out), jnp.float32)
    for ky in range(3):
        for kx in range(3):
            d = ky * wp + kx
            acc2 = acc2 + jnp.dot(yc[d:d + n2, :], w2_ref[3 * ky + kx],
                                  preferred_element_type=jnp.float32)

    z = acc2 + b2_ref[...]
    z = jnp.where(z >= 0, z, z * slope)
    o_ref[0, 0] = z.astype(o_ref.dtype)                        # lane-dense store


def conv_block_pallas(x, w1, b1, w2, b2, *, compute_dtype=jnp.bfloat16,
                      row_tile_rows=None, single_buffer_invariants=False):
    """x: (B, Cin, H, W) NCHW. w: (Cout, Cin, 3, 3) PyTorch layout. b: (Cout,).

    compute_dtype: MXU operand dtype (bf16 default on all chips, f32 accumulate).
    row_tile_rows: output image rows per band (None -> auto, VMEM-bounded).
    single_buffer_invariants: pl.Buffered(1) on weight/bias specs (for C>=256).
    """
    B, c_in, H, W = x.shape
    c_mid, c_out = w1.shape[0], w2.shape[0]
    cp_mid = _round_up(c_mid, LANE)
    cp_out = _round_up(c_out, LANE)

    Wp = _round_up(W + 4, SUBLANE)            # 8-aligned flat row stride
    im2col1 = (9 * c_in) <= LANE              # small-Cin conv1 fast path
    if im2col1:
        k1 = LANE
        x_lanes = LANE
    else:
        cp_in = _round_up(c_in, LANE)
        k1 = None
        x_lanes = cp_in

    in_itemsize = jax.dtypes.canonicalize_dtype(compute_dtype).itemsize
    out_itemsize = x.dtype.itemsize

    def band_geom(th):
        n2 = th * Wp                          # conv2 output rows (flat)
        n1 = (th + 2) * Wp + SUBLANE          # conv1/intermediate rows (flat)
        p = (th + 4) * Wp + 2 * SUBLANE       # padded x rows per band (flat)
        return n1, n2, p

    def band_bytes(th):
        n1, n2, p = band_geom(th)
        x_rows = n1 if im2col1 else p
        xb = x_rows * x_lanes * in_itemsize
        ob = n2 * cp_out * out_itemsize
        wb = ((k1 if im2col1 else 9 * cp_in) * cp_mid + 9 * cp_mid * cp_out) * in_itemsize
        inter = 2 * (n1 * cp_mid + n2 * cp_out) * 4             # f32 temporaries
        return 2 * (xb + ob + wb) + inter                       # double-buffered blocks

    if row_tile_rows is None:
        th = H
        while th > 4 and band_bytes(th) > 24 * (1 << 20):       # bound the working set
            th = (th + 1) // 2
    else:
        th = max(1, min(int(row_tile_rows), H))
    nt = -(-H // th)
    H_pad = nt * th
    n1, n2, p_band = band_geom(th)

    # --- host layout: NCHW -> NHWC, spatial pad, halo'd row bands, flatten -----
    x_nhwc = jnp.transpose(x, (0, 2, 3, 1))
    x_sp = jnp.pad(x_nhwc, ((0, 0), (2, 2 + H_pad - H), (2, Wp - W - 2), (0, 0)))
    bands = jnp.stack([x_sp[:, t * th: t * th + th + 4] for t in range(nt)], axis=1)
    x_flat = bands.reshape(B, nt, (th + 4) * Wp, c_in)
    x_flat = jnp.pad(x_flat, ((0, 0), (0, 0), (0, p_band - (th + 4) * Wp), (0, 0)))

    if im2col1:
        taps = [x_flat[:, :, ky * Wp + kx: ky * Wp + kx + n1, :]
                for ky in range(3) for kx in range(3)]
        x_k = jnp.concatenate(taps, axis=-1)                    # (B,nt,N1,9*Cin)
        x_k = jnp.pad(x_k, ((0, 0), (0, 0), (0, 0), (0, k1 - 9 * c_in)))
        w1m = jnp.transpose(w1, (2, 3, 1, 0)).reshape(9 * c_in, c_mid)
        w1p = jnp.pad(w1m, ((0, k1 - 9 * c_in), (0, cp_mid - c_mid)))[None]
    else:
        x_k = jnp.pad(x_flat, ((0, 0), (0, 0), (0, 0), (0, cp_in - c_in)))
        w1m = jnp.transpose(w1, (2, 3, 1, 0)).reshape(9, c_in, c_mid)
        w1p = jnp.pad(w1m, ((0, 0), (0, cp_in - c_in), (0, cp_mid - c_mid)))

    w2m = jnp.transpose(w2, (2, 3, 1, 0)).reshape(9, c_mid, c_out)
    w2p = jnp.pad(w2m, ((0, 0), (0, cp_mid - c_mid), (0, cp_out - c_out)))

    # Host pre-cast of MXU operands (no in-kernel casts, half the DMA for bf16).
    x_k = x_k.astype(compute_dtype)
    w1p = w1p.astype(compute_dtype)
    w2p = w2p.astype(compute_dtype)
    b1p = jnp.pad(b1, (0, cp_mid - c_mid)).reshape(1, cp_mid).astype(jnp.float32)
    b2p = jnp.pad(b2, (0, cp_out - c_out)).reshape(1, cp_out).astype(jnp.float32)

    kernel = functools.partial(conv_block_kernel, wp=Wp, n1=n1, n2=n2, th=th,
                               img_h=H, img_w=W, slope=0.2, im2col1=im2col1)

    x_rows = n1 if im2col1 else p_band
    inv_kw = {"pipeline_mode": pl.Buffered(1)} if single_buffer_invariants else {}
    in_specs = [
        pl.BlockSpec((1, 1, x_rows, x_lanes), lambda b, t: (b, t, 0, 0)),
        pl.BlockSpec(w1p.shape, lambda b, t: (0, 0, 0), **inv_kw),
        pl.BlockSpec(b1p.shape, lambda b, t: (0, 0), **inv_kw),
        pl.BlockSpec(w2p.shape, lambda b, t: (0, 0, 0), **inv_kw),
        pl.BlockSpec(b2p.shape, lambda b, t: (0, 0), **inv_kw),
    ]
    out_specs = pl.BlockSpec((1, 1, n2, cp_out), lambda b, t: (b, t, 0, 0))

    flops = 2 * B * nt * (n1 * (k1 if im2col1 else 9 * cp_in) * cp_mid
                          + 9 * n2 * cp_mid * cp_out)
    bytes_accessed = int(x_k.size * in_itemsize + w1p.size * in_itemsize
                         + w2p.size * in_itemsize + (b1p.size + b2p.size) * 4
                         + B * nt * n2 * cp_out * out_itemsize)
    vmem_limit = int(min(56 * (1 << 20), max(24 * (1 << 20), int(1.5 * band_bytes(th)))))

    out_flat = pl.pallas_call(
        kernel,
        out_shape=jax.ShapeDtypeStruct((B, nt, n2, cp_out), x.dtype),
        grid_spec=pltpu.PrefetchScalarGridSpec(
            num_scalar_prefetch=0,
            grid=(B, nt),
            in_specs=in_specs,
            out_specs=out_specs,
        ),
        compiler_params=pltpu.CompilerParams(
            dimension_semantics=("parallel", "parallel"),
            vmem_limit_bytes=vmem_limit),
        cost_estimate=pl.CostEstimate(flops=int(flops), transcendentals=0,
                                      bytes_accessed=bytes_accessed),
    )(x_k, w1p, b1p, w2p, b2p)

    # --- host un-flatten: (B,nt,TH*Wp,Cp) -> (B,H_pad,Wp,Cp) -> crop -> NCHW ---
    out = out_flat.reshape(B, H_pad, Wp, cp_out)[:, :H, :W, :c_out]
    return jnp.transpose(out, (0, 3, 1, 2))


def conv_block_ref(x, w1, b1, w2, b2, slope=0.2):
    """Pure-JAX reference mirroring the PyTorch ConvBlock forward."""
    dn = ("NCHW", "OIHW", "NCHW")
    y = lax.conv_general_dilated(x, w1, (1, 1), [(1, 1), (1, 1)],
                                 dimension_numbers=dn)
    y = y + b1[None, :, None, None]
    y = jnp.where(y >= 0, y, slope * y)
    z = lax.conv_general_dilated(y, w2, (1, 1), [(1, 1), (1, 1)],
                                 dimension_numbers=dn)
    z = z + b2[None, :, None, None]
    z = jnp.where(z >= 0, z, slope * z)
    return z


if __name__ == "__main__":
    batch, in_channels, out_channels, H, W = 2, 4, 8, 16, 16

    key = jax.random.PRNGKey(0)
    kx, kk1, kk2, kk3, kk4 = jax.random.split(key, 5)
    x = jax.random.normal(kx, (batch, in_channels, H, W), jnp.float32)

    s1 = 1.0 / np.sqrt(in_channels * 9)
    w1 = jax.random.uniform(kk1, (out_channels, in_channels, 3, 3),
                            jnp.float32, -s1, s1)
    b1 = jax.random.uniform(kk2, (out_channels,), jnp.float32, -s1, s1)
    s2 = 1.0 / np.sqrt(out_channels * 9)
    w2 = jax.random.uniform(kk3, (out_channels, out_channels, 3, 3),
                            jnp.float32, -s2, s2)
    b2 = jax.random.uniform(kk4, (out_channels,), jnp.float32, -s2, s2)

    ref = conv_block_ref(x, w1, b1, w2, b2)

    # f32 MXU path, single band: exact vs reference.
    out_f32 = jax.block_until_ready(
        conv_block_pallas(x, w1, b1, w2, b2, compute_dtype=jnp.float32))
    assert out_f32.shape == (batch, out_channels, H, W)
    assert jnp.allclose(out_f32, ref, atol=1e-4, rtol=1e-4)

    # f32, forced 2 row-bands: validates the halo'd row-tiling path exactly.
    out_band = jax.block_until_ready(
        conv_block_pallas(x, w1, b1, w2, b2, compute_dtype=jnp.float32,
                          row_tile_rows=8))
    assert jnp.allclose(out_band, ref, atol=1e-4, rtol=1e-4)

    # Default production path: bf16 MXU operands (host pre-cast), f32 accumulate.
    out_bf16 = jax.block_until_ready(conv_block_pallas(x, w1, b1, w2, b2))
    assert out_bf16.shape == (batch, out_channels, H, W)
    assert jnp.allclose(out_bf16, ref, atol=5e-2, rtol=5e-2)

    print("KERNEL_OK")
</pallas_src>

<mosaic_0001>
module attributes {stable_mosaic.version = 11 : i64} {
  func.func @conv_block_kernel(%arg0: i32, %arg1: i32, %arg2: memref<1x1x440x128xf32, #tpu.memory_space<vmem>>, %arg3: memref<1x128x128xf32, #tpu.memory_space<vmem>>, %arg4: memref<1x128xf32, #tpu.memory_space<vmem>>, %arg5: memref<9x128x128xf32, #tpu.memory_space<vmem>>, %arg6: memref<1x128xf32, #tpu.memory_space<vmem>>, %arg7: memref<1x1x384x128xf32, #tpu.memory_space<vmem>>) attributes {dimension_semantics = [#tpu.dimension_semantics<parallel>, #tpu.dimension_semantics<parallel>], iteration_bounds = array<i64: 2, 1>, scalar_prefetch = 0 : i64, scratch_operands = 0 : i64, tpu.core_type = #tpu.core_type<tc>, window_params = [{transform_indices = @transform_0, window_bounds = array<i64: 1, 1, 440, 128>}, {pipeline_mode = #tpu.pipeline_mode<synchronous>, transform_indices = @transform_1, window_bounds = array<i64: 1, 128, 128>}, {pipeline_mode = #tpu.pipeline_mode<synchronous>, transform_indices = @transform_2, window_bounds = array<i64: 1, 128>}, {pipeline_mode = #tpu.pipeline_mode<synchronous>, transform_indices = @transform_3, window_bounds = array<i64: 9, 128, 128>}, {pipeline_mode = #tpu.pipeline_mode<synchronous>, transform_indices = @transform_4, window_bounds = array<i64: 1, 128>}, {transform_indices = @transform_5, window_bounds = array<i64: 1, 1, 384, 128>}]} {
    %c0 = arith.constant 0 : index
    %c0_0 = arith.constant 0 : index
    %c0_1 = arith.constant 0 : index
    %c0_2 = arith.constant 0 : index
    %0 = vector.load %arg2[%c0, %c0_0, %c0_1, %c0_2] : memref<1x1x440x128xf32, #tpu.memory_space<vmem>>, vector<1x1x440x128xf32>
    %1 = vector.shape_cast %0 : vector<1x1x440x128xf32> to vector<440x128xf32>
    %c0_3 = arith.constant 0 : index
    %c0_4 = arith.constant 0 : index
    %c0_5 = arith.constant 0 : index
    %2 = vector.load %arg3[%c0_3, %c0_4, %c0_5] : memref<1x128x128xf32, #tpu.memory_space<vmem>>, vector<1x128x128xf32>
    %3 = vector.shape_cast %2 : vector<1x128x128xf32> to vector<128x128xf32>
    %cst = arith.constant dense<0.000000e+00> : vector<440x128xf32>
    %4 = tpu.matmul %1, %3, %cst {dimension_numbers = #tpu.dot_dimension_numbers<[1], [0], [0], [1], [0, 0, 1, 1], [], []>} : vector<440x128xf32>, vector<128x128xf32>, vector<440x128xf32> -> vector<440x128xf32>
    %c0_6 = arith.constant 0 : index
    %c0_7 = arith.constant 0 : index
    %5 = vector.load %arg4[%c0_6, %c0_7] : memref<1x128xf32, #tpu.memory_space<vmem>>, vector<1x128xf32>
    %6 = vector.broadcast %5 : vector<1x128xf32> to vector<440x128xf32>
    %7 = arith.addf %4, %6 : vector<440x128xf32>
    %cst_8 = arith.constant 0.000000e+00 : f32
    %8 = vector.broadcast %cst_8 : f32 to vector<440x128xf32>
    %9 = arith.cmpf oge, %7, %8 : vector<440x128xf32>
    %cst_9 = arith.constant 2.000000e-01 : f32
    %10 = vector.broadcast %cst_9 : f32 to vector<440x128xf32>
    %11 = arith.mulf %7, %10 : vector<440x128xf32>
    %12 = arith.select %9, %7, %11 : vector<440x128xi1>, vector<440x128xf32>
    %13 = tpu.iota {dimensions = array<i32: 0>} : vector<440x128xi32>
    %14 = arith.sitofp %13 : vector<440x128xi32> to vector<440x128xf32>
    %cst_10 = arith.constant 5.000000e-01 : f32
    %15 = vector.broadcast %cst_10 : f32 to vector<440x128xf32>
    %16 = arith.addf %14, %15 : vector<440x128xf32>
    %cst_11 = arith.constant 0.0416666679 : f32
    %17 = vector.broadcast %cst_11 : f32 to vector<440x128xf32>
    %18 = arith.mulf %16, %17 : vector<440x128xf32>
    %19 = math.floor %18 : vector<440x128xf32>
    %cst_12 = arith.constant 2.400000e+01 : f32
    %20 = vector.broadcast %cst_12 : f32 to vector<440x128xf32>
    %21 = arith.mulf %19, %20 : vector<440x128xf32>
    %22 = arith.subf %14, %21 : vector<440x128xf32>
    %c16_i32 = arith.constant 16 : i32
    %23 = arith.muli %arg1, %c16_i32 : i32
    %24 = arith.sitofp %23 : i32 to f32
    %25 = vector.broadcast %24 : f32 to vector<440x128xf32>
    %26 = arith.addf %19, %25 : vector<440x128xf32>
    %cst_13 = arith.constant 1.000000e+00 : f32
    %27 = vector.broadcast %cst_13 : f32 to vector<440x128xf32>
    %28 = arith.cmpf oge, %26, %27 : vector<440x128xf32>
    %cst_14 = arith.constant 1.600000e+01 : f32
    %29 = vector.broadcast %cst_14 : f32 to vector<440x128xf32>
    %30 = arith.cmpf ole, %26, %29 : vector<440x128xf32>
    %31 = arith.andi %28, %30 : vector<440x128xi1>
    %cst_15 = arith.constant 1.000000e+00 : f32
    %32 = vector.broadcast %cst_15 : f32 to vector<440x128xf32>
    %33 = arith.cmpf oge, %22, %32 : vector<440x128xf32>
    %34 = arith.andi %31, %33 : vector<440x128xi1>
    %cst_16 = arith.constant 1.600000e+01 : f32
    %35 = vector.broadcast %cst_16 : f32 to vector<440x128xf32>
    %36 = arith.cmpf ole, %22, %35 : vector<440x128xf32>
    %37 = arith.andi %34, %36 : vector<440x128xi1>
    %cst_17 = arith.constant 0.000000e+00 : f32
    %38 = vector.broadcast %cst_17 : f32 to vector<440x128xf32>
    %39 = arith.select %37, %12, %38 : vector<440x128xi1>, vector<440x128xf32>
    %cst_18 = arith.constant 0.000000e+00 : f32
    %40 = vector.broadcast %cst_18 : f32 to vector<384x128xf32>
    %41 = vector.extract_strided_slice %39 {offsets = [0, 0], sizes = [384, 128], strides = [1, 1]} : vector<440x128xf32> to vector<384x128xf32>
    %c0_19 = arith.constant 0 : index
    %c0_20 = arith.constant 0 : index
    %c0_21 = arith.constant 0 : index
    %42 = vector.load %arg5[%c0_19, %c0_20, %c0_21] : memref<9x128x128xf32, #tpu.memory_space<vmem>>, vector<1x128x128xf32>
    %43 = vector.shape_cast %42 : vector<1x128x128xf32> to vector<128x128xf32>
    %cst_22 = arith.constant dense<0.000000e+00> : vector<384x128xf32>
    %44 = tpu.matmul %41, %43, %cst_22 {dimension_numbers = #tpu.dot_dimension_numbers<[1], [0], [0], [1], [0, 0, 1, 1], [], []>} : vector<384x128xf32>, vector<128x128xf32>, vector<384x128xf32> -> vector<384x128xf32>
    %45 = arith.addf %40, %44 : vector<384x128xf32>
    %46 = vector.extract_strided_slice %39 {offsets = [1, 0], sizes = [384, 128], strides = [1, 1]} : vector<440x128xf32> to vector<384x128xf32>
    %c1 = arith.constant 1 : index
    %c0_23 = arith.constant 0 : index
    %c0_24 = arith.constant 0 : index
    %47 = vector.load %arg5[%c1, %c0_23, %c0_24] : memref<9x128x128xf32, #tpu.memory_space<vmem>>, vector<1x128x128xf32>
    %48 = vector.shape_cast %47 : vector<1x128x128xf32> to vector<128x128xf32>
    %cst_25 = arith.constant dense<0.000000e+00> : vector<384x128xf32>
    %49 = tpu.matmul %46, %48, %cst_25 {dimension_numbers = #tpu.dot_dimension_numbers<[1], [0], [0], [1], [0, 0, 1, 1], [], []>} : vector<384x128xf32>, vector<128x128xf32>, vector<384x128xf32> -> vector<384x128xf32>
    %50 = arith.addf %45, %49 : vector<384x128xf32>
    %51 = vector.extract_strided_slice %39 {offsets = [2, 0], sizes = [384, 128], strides = [1, 1]} : vector<440x128xf32> to vector<384x128xf32>
    %c2 = arith.constant 2 : index
    %c0_26 = arith.constant 0 : index
    %c0_27 = arith.constant 0 : index
    %52 = vector.load %arg5[%c2, %c0_26, %c0_27] : memref<9x128x128xf32, #tpu.memory_space<vmem>>, vector<1x128x128xf32>
    %53 = vector.shape_cast %52 : vector<1x128x128xf32> to vector<128x128xf32>
    %cst_28 = arith.constant dense<0.000000e+00> : vector<384x128xf32>
    %54 = tpu.matmul %51, %53, %cst_28 {dimension_numbers = #tpu.dot_dimension_numbers<[1], [0], [0], [1], [0, 0, 1, 1], [], []>} : vector<384x128xf32>, vector<128x128xf32>, vector<384x128xf32> -> vector<384x128xf32>
    %55 = arith.addf %50, %54 : vector<384x128xf32>
    %56 = vector.extract_strided_slice %39 {offsets = [24, 0], sizes = [384, 128], strides = [1, 1]} : vector<440x128xf32> to vector<384x128xf32>
    %c3 = arith.constant 3 : index
    %c0_29 = arith.constant 0 : index
    %c0_30 = arith.constant 0 : index
    %57 = vector.load %arg5[%c3, %c0_29, %c0_30] : memref<9x128x128xf32, #tpu.memory_space<vmem>>, vector<1x128x128xf32>
    %58 = vector.shape_cast %57 : vector<1x128x128xf32> to vector<128x128xf32>
    %cst_31 = arith.constant dense<0.000000e+00> : vector<384x128xf32>
    %59 = tpu.matmul %56, %58, %cst_31 {dimension_numbers = #tpu.dot_dimension_numbers<[1], [0], [0], [1], [0, 0, 1, 1], [], []>} : vector<384x128xf32>, vector<128x128xf32>, vector<384x128xf32> -> vector<384x128xf32>
    %60 = arith.addf %55, %59 : vector<384x128xf32>
    %61 = vector.extract_strided_slice %39 {offsets = [25, 0], sizes = [384, 128], strides = [1, 1]} : vector<440x128xf32> to vector<384x128xf32>
    %c4 = arith.constant 4 : index
    %c0_32 = arith.constant 0 : index
    %c0_33 = arith.constant 0 : index
    %62 = vector.load %arg5[%c4, %c0_32, %c0_33] : memref<9x128x128xf32, #tpu.memory_space<vmem>>, vector<1x128x128xf32>
    %63 = vector.shape_cast %62 : vector<1x128x128xf32> to vector<128x128xf32>
    %cst_34 = arith.constant dense<0.000000e+00> : vector<384x128xf32>
    %64 = tpu.matmul %61, %63, %cst_34 {dimension_numbers = #tpu.dot_dimension_numbers<[1], [0], [0], [1], [0, 0, 1, 1], [], []>} : vector<384x128xf32>, vector<128x128xf32>, vector<384x128xf32> -> vector<384x128xf32>
    %65 = arith.addf %60, %64 : vector<384x128xf32>
    %66 = vector.extract_strided_slice %39 {offsets = [26, 0], sizes = [384, 128], strides = [1, 1]} : vector<440x128xf32> to vector<384x128xf32>
    %c5 = arith.constant 5 : index
    %c0_35 = arith.constant 0 : index
    %c0_36 = arith.constant 0 : index
    %67 = vector.load %arg5[%c5, %c0_35, %c0_36] : memref<9x128x128xf32, #tpu.memory_space<vmem>>, vector<1x128x128xf32>
    %68 = vector.shape_cast %67 : vector<1x128x128xf32> to vector<128x128xf32>
    %cst_37 = arith.constant dense<0.000000e+00> : vector<384x128xf32>
    %69 = tpu.matmul %66, %68, %cst_37 {dimension_numbers = #tpu.dot_dimension_numbers<[1], [0], [0], [1], [0, 0, 1, 1], [], []>} : vector<384x128xf32>, vector<128x128xf32>, vector<384x128xf32> -> vector<384x128xf32>
    %70 = arith.addf %65, %69 : vector<384x128xf32>
    %71 = vector.extract_strided_slice %39 {offsets = [48, 0], sizes = [384, 128], strides = [1, 1]} : vector<440x128xf32> to vector<384x128xf32>
    %c6 = arith.constant 6 : index
    %c0_38 = arith.constant 0 : index
    %c0_39 = arith.constant 0 : index
    %72 = vector.load %arg5[%c6, %c0_38, %c0_39] : memref<9x128x128xf32, #tpu.memory_space<vmem>>, vector<1x128x128xf32>
    %73 = vector.shape_cast %72 : vector<1x128x128xf32> to vector<128x128xf32>
    %cst_40 = arith.constant dense<0.000000e+00> : vector<384x128xf32>
    %74 = tpu.matmul %71, %73, %cst_40 {dimension_numbers = #tpu.dot_dimension_numbers<[1], [0], [0], [1], [0, 0, 1, 1], [], []>} : vector<384x128xf32>, vector<128x128xf32>, vector<384x128xf32> -> vector<384x128xf32>
    %75 = arith.addf %70, %74 : vector<384x128xf32>
    %76 = vector.extract_strided_slice %39 {offsets = [49, 0], sizes = [384, 128], strides = [1, 1]} : vector<440x128xf32> to vector<384x128xf32>
    %c7 = arith.constant 7 : index
    %c0_41 = arith.constant 0 : index
    %c0_42 = arith.constant 0 : index
    %77 = vector.load %arg5[%c7, %c0_41, %c0_42] : memref<9x128x128xf32, #tpu.memory_space<vmem>>, vector<1x128x128xf32>
    %78 = vector.shape_cast %77 : vector<1x128x128xf32> to vector<128x128xf32>
    %cst_43 = arith.constant dense<0.000000e+00> : vector<384x128xf32>
    %79 = tpu.matmul %76, %78, %cst_43 {dimension_numbers = #tpu.dot_dimension_numbers<[1], [0], [0], [1], [0, 0, 1, 1], [], []>} : vector<384x128xf32>, vector<128x128xf32>, vector<384x128xf32> -> vector<384x128xf32>
    %80 = arith.addf %75, %79 : vector<384x128xf32>
    %81 = vector.extract_strided_slice %39 {offsets = [50, 0], sizes = [384, 128], strides = [1, 1]} : vector<440x128xf32> to vector<384x128xf32>
    %c8 = arith.constant 8 : index
    %c0_44 = arith.constant 0 : index
    %c0_45 = arith.constant 0 : index
    %82 = vector.load %arg5[%c8, %c0_44, %c0_45] : memref<9x128x128xf32, #tpu.memory_space<vmem>>, vector<1x128x128xf32>
    %83 = vector.shape_cast %82 : vector<1x128x128xf32> to vector<128x128xf32>
    %cst_46 = arith.constant dense<0.000000e+00> : vector<384x128xf32>
    %84 = tpu.matmul %81, %83, %cst_46 {dimension_numbers = #tpu.dot_dimension_numbers<[1], [0], [0], [1], [0, 0, 1, 1], [], []>} : vector<384x128xf32>, vector<128x128xf32>, vector<384x128xf32> -> vector<384x128xf32>
    %85 = arith.addf %80, %84 : vector<384x128xf32>
    %c0_47 = arith.constant 0 : index
    %c0_48 = arith.constant 0 : index
    %86 = vector.load %arg6[%c0_47, %c0_48] : memref<1x128xf32, #tpu.memory_space<vmem>>, vector<1x128xf32>
    %87 = vector.broadcast %86 : vector<1x128xf32> to vector<384x128xf32>
    %88 = arith.addf %85, %87 : vector<384x128xf32>
    %cst_49 = arith.constant 0.000000e+00 : f32
    %89 = vector.broadcast %cst_49 : f32 to vector<384x128xf32>
    %90 = arith.cmpf oge, %88, %89 : vector<384x128xf32>
    %cst_50 = arith.constant 2.000000e-01 : f32
    %91 = vector.broadcast %cst_50 : f32 to vector<384x128xf32>
    %92 = arith.mulf %88, %91 : vector<384x128xf32>
    %93 = arith.select %90, %88, %92 : vector<384x128xi1>, vector<384x128xf32>
    %c0_51 = arith.constant 0 : index
    %c0_52 = arith.constant 0 : index
    %c0_53 = arith.constant 0 : index
    %c0_54 = arith.constant 0 : index
    %94 = vector.load %arg7[%c0_51, %c0_52, %c0_53, %c0_54] : memref<1x1x384x128xf32, #tpu.memory_space<vmem>>, vector<1x1x384x128xf32>
    %95 = vector.shape_cast %94 : vector<1x1x384x128xf32> to vector<384x128xf32>
    %96 = vector.shape_cast %93 : vector<384x128xf32> to vector<1x1x384x128xf32>
    tpu.vector_store %arg7[%c0_51, %c0_52, %c0_53, %c0_54], %96 {strides = array<i32>} : memref<1x1x384x128xf32, #tpu.memory_space<vmem>>, vector<1x1x384x128xf32>,
    return
  }
  func.func @transform_0(%arg0: i32, %arg1: i32) -> (i32, i32, i32, i32) {
    %c0_i32 = arith.constant 0 : i32
    %c0_i32_0 = arith.constant 0 : i32
    %c0_i32_1 = arith.constant 0 : i32
    return %arg0, %arg1, %c0_i32, %c0_i32_0 : i32, i32, i32, i32
  }
  func.func @transform_1(%arg0: i32, %arg1: i32) -> (i32, i32, i32) {
    %c0_i32 = arith.constant 0 : i32
    %c0_i32_0 = arith.constant 0 : i32
    %c0_i32_1 = arith.constant 0 : i32
    %c0_i32_2 = arith.constant 0 : i32
    return %c0_i32, %c0_i32_0, %c0_i32_1 : i32, i32, i32
  }
  func.func @transform_2(%arg0: i32, %arg1: i32) -> (i32, i32) {
    %c0_i32 = arith.constant 0 : i32
    %c0_i32_0 = arith.constant 0 : i32
    %c0_i32_1 = arith.constant 0 : i32
    return %c0_i32, %c0_i32_0 : i32, i32
  }
  func.func @transform_3(%arg0: i32, %arg1: i32) -> (i32, i32, i32) {
    %c0_i32 = arith.constant 0 : i32
    %c0_i32_0 = arith.constant 0 : i32
    %c0_i32_1 = arith.constant 0 : i32
    %c0_i32_2 = arith.constant 0 : i32
    return %c0_i32, %c0_i32_0, %c0_i32_1 : i32, i32, i32
  }
  func.func @transform_4(%arg0: i32, %arg1: i32) -> (i32, i32) {
    %c0_i32 = arith.constant 0 : i32
    %c0_i32_0 = arith.constant 0 : i32
    %c0_i32_1 = arith.constant 0 : i32
    return %c0_i32, %c0_i32_0 : i32, i32
  }
  func.func @transform_5(%arg0: i32, %arg1: i32) -> (i32, i32, i32, i32) {
    %c0_i32 = arith.constant 0 : i32
    %c0_i32_0 = arith.constant 0 : i32
    %c0_i32_1 = arith.constant 0 : i32
    return %arg0, %arg1, %c0_i32, %c0_i32_0 : i32, i32, i32, i32
  }
}

</mosaic_0001>

<bundles_post_ra>
// kernel: tpu_custom_call.1
= control target key start
LH: loop header
LB: loop body
LE: loop exit
PB: predicated region body
PF: predicated region fallthrough
CT: control target
= control target key end

     0   :  { %10 = vsyncpa [#allocation3], 0  ;;  %s13001_s0 = inlined_call_operand.hbm [shape: f32[2,1,440,128], index: 0, kind: input, shape index: {}]   ;;  %s13002_s1 = inlined_call_operand.hbm [shape: f32[1,128,128], index: 1, kind: input, shape index: {}]   ;;  %s13003_s2 = inlined_call_operand.vmem [shape: f32[1,128], index: 2, kind: input, shape index: {}]   ;;  %s13004_s3 = inlined_call_operand.hbm [shape: f32[9,128,128], index: 3, kind: input, shape index: {}]   ;;  %s13005_s4 = inlined_call_operand.vmem [shape: f32[1,128], index: 4, kind: input, shape index: {}]   ;;  %s13006_s5 = inlined_call_operand.hbm [shape: f32[2,1,384,128], index: 5, kind: output, shape index: {}]  }
   0x1   :  { %12 = vsyncpa [#allocation3 + $0x1], 0 }
   0x2   :  { %13 = vsyncpa [#allocation6], 0 }
   0x3   :  { %14 = vsyncpa [#allocation4], 0 }
   0x4   :  { %16 = vsyncpa [#allocation4 + $0x1], 0  ;;  %s8706_s18 = smov 0   ;;  %s8708_s19 = smov 0  }
   0x5   :  { %s8710_s20 = smov 0   ;;  %s8712_s21 = smov 0  }
   0x6   :  { %s8714_s22 = smov 0   ;;  %s8716_s23 = smov 0  }
   0x7 LB: > { %s5742_s24 = sadd.s32 4294967295, %s8663_s23   ;;  %s5743_s25 = sadd.s32 4294967294, %s8663_s23   ;;  %s8663_s23 = sphi %s8716_s23, %s22_s23   ;;  %s8659_s22 = sphi %s8714_s22, %s14732_s22   ;;  %s8655_s21 = sphi %s8712_s21, %s14731_s21   ;;  %s8651_s20 = sphi %s8710_s20, %s14730_s20   ;;  %s8647_s19 = sphi %s8708_s19, %s14729_s19   ;;  %s8643_s18 = sphi %s8706_s18, %s14728_s18  }
   0x8   : > { %p56_p0 = scmp.ne.s32.totalorder %s8647_s19, %s8643_s18  ;;  %p8740_p1 = scmp.eq.s32.totalorder %s5742_s24, 0 }
   0x9   : > { %p8744_p2 = scmp.eq.s32.totalorder %s5742_s24, 1  ;;  %p172_p3 = scmp.eq.s32.totalorder %s5743_s25, 1 }
   0xa   : > { %s13464_s26 = scalar_select %p8740_p1, 1, 0 }
   0xb   : > { %p8750_p4 = por %p8740_p1, %p56_p0  ;;  %p5744_p5 = scmp.ge.s32.totalorder %s8663_s23, 1 }
   0xc   : > { %p8755_p6 = por %p172_p3, %p56_p0  ;;  %p179_p7 = scmp.lt.s32.totalorder %s8663_s23, 3 }
   0xd   : > { %s13466_s28 = scalar_select %p8750_p4, 1, 0 }
   0xe   : > { %s13467_s29 = scalar_select %p8755_p6, 1, 0 }
   0xf   : > { %p8760_p8 = pnand %p5744_p5, %p179_p7  ;;  %s8665_s6 = smov [#allocation5]  }
  0x10   : > { %s191_s7 = sshll.u32 %s8665_s6, 4  ;;  %s8666_s9 = smov [#allocation7]   ;;  %s8764_s7 = int_to_ptr.vmem [resolvable:$true] %s191_s7 }
  0x11   : > { %p8410_p9 = pneg %p8760_p8  ;;  %s207_s10 = sshll.u32 %s8666_s9, 4  ;;  %s8775_s10 = int_to_ptr.vmem [resolvable:$true] %s207_s10 }
  0x12   : > { %s8491_s13 = scalar_lea.hbm %s13002_s1, 2048 }
  0x13   : > { %p8771_p11 = pnand %p8410_p9, %p8740_p1  ;;  %p8492_p12 = scmp.ne.s32.totalorder %s13002_s1, %s8491_s13 }
  0x14   : > { %p8498_p5 = scmp.lt.u32.totalorder %s8491_s13, %s13002_s1 }
  0x15   : > { %p8493_p13 = pneg %p8771_p11 }
  0x17   : > { %p8494_p0 = pnand %p8493_p13, %p8492_p12 }
  0x19   : > { %p8495_p3 = pneg %p8494_p0 }
  0x1b   : > { %p8500_p7 = pnand %p8498_p5, %p8495_p3 }
  0x1d   : > { %8503 = shalt.err (!%p8500_p7)
}
  0x1e   : > { %s8504_s24 = scalar_lea.vmem %s8764_s7, 2048  ;;  %p8512_p1 = scmp.lt.s32.totalorder %s8764_s7, %s8764_s7 }
  0x1f   : > { %p8505_p9 = scmp.ne.s32.totalorder %s8764_s7, %s8504_s24  ;;  %p8513_p12 = scmp.lt.s32.totalorder %s8504_s24, %s8504_s24 }
  0x21   : > { %p8507_p10 = pnand %p8505_p9, %p8493_p13  ;;  %p8514_p0 = por %p8513_p12, %p8512_p1 }
  0x23   : > { %p8508_p6 = pneg %p8507_p10 }
  0x25   : > { %p8515_p4 = pnand %p8514_p0, %p8508_p6 }
  0x27   : > { %8518 = shalt.err (!%p8515_p4)
}
  0x28   : > { %s13010_s25 = smov 128   ;;  %s13011_s6 = smov 8  }
  0x29   : > { %8413 = dma.hbm_to_vmem [thread:$0]  (!%p8771_p11), %s13002_s1, 2048, %s8764_s7, [#allocation6], %s13010_s25, %s13010_s25, %s13011_s6  }
  0x2a   : > { %s8519_s14 = scalar_lea.hbm %s13004_s3, 18432 }
  0x2b   : > { %p8520_p1 = scmp.ne.s32.totalorder %s13004_s3, %s8519_s14  ;;  %p8526_p10 = scmp.lt.u32.totalorder %s8519_s14, %s13004_s3 }
  0x2d   : > { %p8522_p4 = pnand %p8520_p1, %p8493_p13 }
  0x2f   : > { %p8523_p6 = pneg %p8522_p4 }
  0x31   : > { %p8528_p3 = pnand %p8526_p10, %p8523_p6 }
  0x33   : > { %8531 = shalt.err (!%p8528_p3)
}
  0x34   : > { %s8532_s7 = scalar_lea.vmem %s8775_s10, 18432  ;;  %p8540_p12 = scmp.lt.s32.totalorder %s8775_s10, %s8775_s10 }
  0x35   : > { %p8533_p5 = scmp.ne.s32.totalorder %s8775_s10, %s8532_s7  ;;  %p8541_p0 = scmp.lt.s32.totalorder %s8532_s7, %s8532_s7 }
  0x37   : > { %p8535_p7 = pnand %p8533_p5, %p8493_p13  ;;  %p8542_p1 = por %p8541_p0, %p8540_p12 }
  0x39   : > { %p8536_p9 = pneg %p8535_p7 }
  0x3b   : > { %p8543_p4 = pnand %p8542_p1, %p8536_p9 }
  0x3d   : > { %8546 = shalt.err (!%p8543_p4)
}
  0x3e   : > { %8416 = dma.hbm_to_vmem [thread:$0]  (!%p8771_p11), %s13004_s3, 18432, %s8775_s10, [#allocation6], %s13010_s25, %s13010_s25, %s13011_s6  }
  0x3f   : > { %s34_s8 = sadd.s32 1, %s8659_s22  ;;  %s43_s12 = sadd.s32 1, %s8651_s20 }
  0x40   : > { %p36_p13 = scmp.ge.s32.totalorder %s34_s8, 2  ;;  %p50_p6 = scmp.ne.s32.totalorder %s8651_s20, %s8647_s19 }
  0x41   : > { %p51_p10 = scmp.eq.s32.totalorder %s8663_s23, 0  ;;  %p8427_p3 = scmp.lt.s32.totalorder %s8663_s23, 2 }
  0x42   : > { %s14734_s8 = smov (%p36_p13, %s34_s8), 0  ;;  %p8845_p7 = por %p8744_p2, %p50_p6 }
  0x43   : > { %p52_p5 = por %p51_p10, %p50_p6  ;;  %s38_s14 = ssub.s32 %s8659_s22, %s14734_s8 }
  0x44   : > { %s13470_s13 = scalar_select %p8845_p7, 1, 0 }
  0x45   : > { %s224_s15 = sand.u32 1, %s8651_s20   ;;  %p41_p9 = scmp.eq.s32.totalorder %s38_s14, 0 }
  0x46   : > { %s8393_s10 = smul.u32 440, %s224_s15  ;;  %p8852_p11 = pnand %p8427_p3, %p52_p5 }
  0x47   : > { %s8857_s17 = scalar_select %p41_p9, %s8651_s20, %s43_s12  }
  0x48   : > { %s8394_s24 = smul.u32 7040, %s8659_s22  ;;  %s228_s7 = scalar_lea.vmem [#allocation2], %s8393_s10 }
  0x49   : > { %s237_s9 = sshll.u32 %s228_s7, 4  ;;  %s8867_s14 = scalar_lea.sflag [#allocation3], %s224_s15  ;;  %s8865_s9 = int_to_ptr.vmem [resolvable:$true] %s237_s9 }
  0x4a   : > { %s8863_s25 = scalar_lea.hbm %s13001_s0, %s8394_s24  ;;  %p8549_p12 = pneg %p8852_p11 }
  0x4b   : > { %s8547_s6 = scalar_lea.hbm %s8863_s25, 7040  ;;  %s8552_s24 = scalar_lea.hbm %s13001_s0, 14080 }
  0x4c   : > { %p8548_p2 = scmp.ne.s32.totalorder %s8863_s25, %s8547_s6  ;;  %p8553_p4 = scmp.lt.u32.totalorder %s8863_s25, %s13001_s0 }
  0x4d   : > { %p8554_p13 = scmp.lt.u32.totalorder %s8552_s24, %s8547_s6  ;;  %p8556_p10 = scmp.lt.u32.totalorder %s8547_s6, %s8863_s25 }
  0x4e   : > { %p8550_p0 = pnand %p8549_p12, %p8548_p2 }
  0x4f   : > { %p8555_p6 = por %p8554_p13, %p8553_p4 }
  0x50   : > { %p8551_p1 = pneg %p8550_p0 }
  0x51   : > { %p8557_p3 = por %p8556_p10, %p8555_p6 }
  0x53   : > { %p8558_p5 = pnand %p8557_p3, %p8551_p1 }
  0x55   : > { %8561 = shalt.err (!%p8558_p5)
}
  0x56   : > { %s8562_s15 = scalar_lea.vmem %s8865_s9, 7040  ;;  %s8669_s11 = smov [#allocation2]  }
  0x57   : > { %p8563_p9 = scmp.ne.s32.totalorder %s8865_s9, %s8562_s15  ;;  %s8567_s12 = sshll.u32 %s8669_s11, 4  ;;  %s8568_s12 = int_to_ptr.vmem [resolvable:$false] %s8567_s12 }
  0x58   : > { %s8569_s10 = scalar_lea.vmem %s8568_s12, 14080  ;;  %p8570_p7 = scmp.lt.s32.totalorder %s8865_s9, %s8568_s12 }
  0x59   : > { %p8565_p2 = pnand %p8563_p9, %p8549_p12  ;;  %p8571_p4 = scmp.lt.s32.totalorder %s8569_s10, %s8562_s15 }
  0x5b   : > { %p8566_p0 = pneg %p8565_p2  ;;  %p8572_p13 = por %p8571_p4, %p8570_p7 }
  0x5d   : > { %p8573_p6 = pnand %p8572_p13, %p8566_p0 }
  0x5f   : > { %8576 = shalt.err (!%p8573_p6)
}
  0x60   : > { %s13472_s6 = smov 8   ;;  %s13473_s24 = smov 128  }
  0x61   : > { %8420 = dma.hbm_to_vmem [thread:$0]  (!%p8852_p11), %s8863_s25, 7040, %s8865_s9, %s8867_s14, %s13473_s24, %s13473_s24, %s13472_s6  }
  0x62   : > { %249 = sbr.rel (%p8760_p8) target bundleno = 1361 (0x551), region = 40 }
  0x69   : > { %s8901_s7 = sand.u32 1, %s8647_s19   ;;  %p13474_p7 = scmp.ne.s32.totalorder %s13466_s28, 0 }
  0x6a   : > { %s8395_s27 = smul.u32 440, %s8901_s7  ;;  %s252_s15 = scalar_lea.sflag [#allocation3], %s8901_s7 }
  0x6c   : > { %s8905_s11 = scalar_lea.vmem [#allocation2], %s8395_s27 }
  0x6d   : > { %8630 = dma.done.wait (%p13474_p7), %s252_s15, 7040  }
  0x6e   : > { %8632 = vsyncadd (%p13474_p7), %s252_s15, 4294960256  ;;  %p13475_p11 = scmp.ne.s32.totalorder %s13464_s26, 0 }
  0x70   : > { %8634 = dma.done.wait (%p13475_p11), [#allocation6], 20480  }
  0x71   : > { %8636 = vsyncadd (%p13475_p11), [#allocation6], 4294946816  ;;  %v8670_v0 = vmov 0.0|0.0   ;;  %vm8671_vm0 = vmmov 0   ;;  %v8672_v1 = vmov 0.0   ;;  %v345_v2 = vld [vmem:[#allocation5] sm:$0xff] }
  0x72   : > { %7681 = vmatprep.subr.bf16.mxu0 %v8670_v0  ;;  %6580 = vmatprep.mubr.msk.f32.mxu0 %vm8671_vm0, %v8672_v1  ;;  %v346_v3 = vld [vmem:[#allocation5 + $0x8] sm:$0xff]  ;;  %v347_v4 = vld [vmem:[#allocation5 + $0x10] sm:$0xff]  ;;  %v348_v6 = vld [vmem:[#allocation5 + $0x18] sm:$0xff]  ;;  %s8396_s24 = smul.u32 384, %s8901_s7  ;;  %s5621_s30 = scalar_lea.sflag [#allocation4], %s8901_s7 }
  0x73   : > { %v7682_v5 = vpack.c.bf16 %v346_v3, %v345_v2  ;;  %v7685_v7 = vpack.c.bf16 %v348_v6, %v347_v4  ;;  %v349_v8 = vld [vmem:[#allocation5 + $0x20] sm:$0xff]  ;;  %v350_v9 = vld [vmem:[#allocation5 + $0x28] sm:$0xff]  ;;  %v351_v11 = vld [vmem:[#allocation5 + $0x30] sm:$0xff]  ;;  %s8397_s15 = smul.u32 6144, %s8655_s21  ;;  %p14725_p12 = scmp.ne.s32.totalorder %s13470_s13, 0 }
  0x74   : > { %v7688_v10 = vpack.c.bf16 %v350_v9, %v349_v8  ;;  %v352_v12 = vld [vmem:[#allocation5 + $0x38] sm:$0xff]  ;;  %v353_v14 = vld [vmem:[#allocation5 + $0x40] sm:$0xff]  ;;  %v354_v15 = vld [vmem:[#allocation5 + $0x48] sm:$0xff]  ;;  %s12806_s27 = scalar_lea.vmem [#allocation8], %s8396_s24  ;;  %s8673_s16 = smov [#allocation8]  }
  0x75   : > { %7683 = vmatpush3.bf16.msra.mxu0 %v7682_v5  ;;  %v7691_v13 = vpack.c.bf16 %v352_v12, %v351_v11  ;;  %v7694_v16 = vpack.c.bf16 %v354_v15, %v353_v14  ;;  %v355_v17 = vld [vmem:[#allocation5 + $0x50] sm:$0xff]  ;;  %v356_v18 = vld [vmem:[#allocation5 + $0x58] sm:$0xff]  ;;  %v357_v20 = vld [vmem:[#allocation5 + $0x60] sm:$0xff]  ;;  %s12948_s21 = scalar_lea.hbm %s13006_s5, %s8397_s15  ;;  %s8581_s9 = sshll.u32 %s8673_s16, 4  ;;  %s8582_s9 = int_to_ptr.vmem [resolvable:$false] %s8581_s9 }
  0x76   : > { %7684 = vmatprep.subr.bf16.mxu0 %v8670_v0  ;;  %v7697_v19 = vpack.c.bf16 %v356_v18, %v355_v17  ;;  %v358_v21 = vld [vmem:[#allocation5 + $0x68] sm:$0xff]  ;;  %v359_v23 = vld [vmem:[#allocation5 + $0x70] sm:$0xff]  ;;  %v360_v24 = vld [vmem:[#allocation5 + $0x78] sm:$0xff]  ;;  %s8583_s14 = scalar_lea.vmem %s8582_s9, 12288 }
  0x77   : > { %v7700_v22 = vpack.c.bf16 %v358_v21, %v357_v20  ;;  %v7703_v25 = vpack.c.bf16 %v360_v24, %v359_v23  ;;  %v290_v26 = vld [vmem:[%s8905_s11] sm:$0xff]  ;;  %v291_v27 = vld [vmem:[%s8905_s11 + $0x8] sm:$0xff]  ;;  %v292_v28 = vld [vmem:[%s8905_s11 + $0x10] sm:$0xff] }
  0x78   : > { %v293_v29 = vld [vmem:[%s8905_s11 + $0x18] sm:$0xff]  ;;  %v294_v30 = vld [vmem:[%s8905_s11 + $0x20] sm:$0xff]  ;;  %v295_v31 = vld [vmem:[%s8905_s11 + $0x28] sm:$0xff] }
  0x79   : > { %7686 = vmatpush3.bf16.msra.mxu0 %v7685_v7  ;;  %v296_v32 = vld [vmem:[%s8905_s11 + $0x30] sm:$0xff]  ;;  %v297_v33 = vld [vmem:[%s8905_s11 + $0x38] sm:$0xff]  ;;  %v298_v34 = vld [vmem:[%s8905_s11 + $0x40] sm:$0xff] }
  0x7a   : > { %7687 = vmatprep.subr.bf16.mxu0 %v8670_v0  ;;  %v299_v35 = vld [vmem:[%s8905_s11 + $0x48] sm:$0xff]  ;;  %v300_v36 = vld [vmem:[%s8905_s11 + $0x50] sm:$0xff]  ;;  %v301_v37 = vld [vmem:[%s8905_s11 + $0x58] sm:$0xff] }
  0x7b   : > { %v302_v38 = vld [vmem:[%s8905_s11 + $0x60] sm:$0xff]  ;;  %v303_v39 = vld [vmem:[%s8905_s11 + $0x68] sm:$0xff]  ;;  %v304_v40 = vld [vmem:[%s8905_s11 + $0x70] sm:$0xff] }
  0x7c   : > { %v305_v41 = vld [vmem:[%s8905_s11 + $0x78] sm:$0xff]  ;;  %v306_v42 = vld [vmem:[%s8905_s11 + $0x80] sm:$0xff]  ;;  %v307_v43 = vld [vmem:[%s8905_s11 + $0x88] sm:$0xff] }
  0x7d   : > { %7689 = vmatpush3.bf16.msra.mxu0 %v7688_v10  ;;  %v1774_v44 = vld [vmem:[#allocation7 + $0x80] sm:$0xff]  ;;  %v1775_v45 = vld [vmem:[#allocation7 + $0x88] sm:$0xff]  ;;  %v1776_v48 = vld [vmem:[#allocation7 + $0x90] sm:$0xff] }
  0x7e   : > { %7690 = vmatprep.subr.bf16.mxu0 %v8670_v0  ;;  %v7705_v46 = vpack.c.bf16 %v1775_v45, %v1774_v44  ;;  %v308_v47 = vld [vmem:[%s8905_s11 + $0x90] sm:$0xff]  ;;  %v309_v51 = vld [vmem:[%s8905_s11 + $0x98] sm:$0xff]  ;;  %v1780_v55 = vld [vmem:[#allocation7 + $0xb0] sm:$0xff] }
  0x7f   : > { %v1777_v49 = vld [vmem:[#allocation7 + $0x98] sm:$0xff]  ;;  %v1778_v52 = vld [vmem:[#allocation7 + $0xa0] sm:$0xff]  ;;  %v1779_v53 = vld [vmem:[#allocation7 + $0xa8] sm:$0xff] }
  0x80   : > { %v7709_v50 = vpack.c.bf16 %v1777_v49, %v1776_v48  ;;  %v7713_v54 = vpack.c.bf16 %v1779_v53, %v1778_v52  ;;  %v1781_v56 = vld [vmem:[#allocation7 + $0xb8] sm:$0xff]  ;;  %v310_v57 = vld [vmem:[%s8905_s11 + $0xa0] sm:$0xff]  ;;  %v1782_v60 = vld [vmem:[#allocation7 + $0xc0] sm:$0xff] }
  0x81   : > { %7692 = vmatpush3.bf16.msra.mxu0 %v7691_v13  ;;  %v7717_v58 = vpack.c.bf16 %v1781_v56, %v1780_v55  ;;  %v311_v59 = vld [vmem:[%s8905_s11 + $0xa8] sm:$0xff]  ;;  %v1783_v61 = vld [vmem:[#allocation7 + $0xc8] sm:$0xff]  ;;  %v312_v63 = vld [vmem:[%s8905_s11 + $0xb0] sm:$0xff]  ;;  %v873_v56 = vlaneseq }
  0x82   : > { %7693 = vmatprep.subr.bf16.mxu0 %v8670_v0  ;;  %v7721_v62 = vpack.c.bf16 %v1783_v61, %v1782_v60  ;;  %v1785_v2 = vld [vmem:[#allocation7 + $0xd8] sm:$0xff]  ;;  %v313_v4 = vld [vmem:[%s8905_s11 + $0xb8] sm:$0xff]  ;;  %v314_v8 = vld [vmem:[%s8905_s11 + $0xc0] sm:$0xff] }
  0x83   : > { %v1786_v5 = vld [vmem:[#allocation7 + $0xe0] sm:$0xff]  ;;  %v1787_v6 = vld [vmem:[#allocation7 + $0xe8] sm:$0xff]  ;;  %v1788_v9 = vld [vmem:[#allocation7 + $0xf0] sm:$0xff] }
  0x84   : > { %v7729_v7 = vpack.c.bf16 %v1787_v6, %v1786_v5  ;;  %v1789_v10 = vld [vmem:[#allocation7 + $0xf8] sm:$0xff]  ;;  %v317_v14 = vld [vmem:[%s8905_s11 + $0xd8] sm:$0xff]  ;;  %v318_v15 = vld [vmem:[%s8905_s11 + $0xe0] sm:$0xff] }
  0x85   : > { %7695 = vmatpush3.bf16.msra.mxu0 %v7694_v16  ;;  %v7733_v11 = vpack.c.bf16 %v1789_v10, %v1788_v9  ;;  %v315_v12 = vld [vmem:[%s8905_s11 + $0xc8] sm:$0xff]  ;;  %v316_v13 = vld [vmem:[%s8905_s11 + $0xd0] sm:$0xff]  ;;  %v321_v18 = vld [vmem:[%s8905_s11 + $0xf8] sm:$0xff] }
  0x86   : > { %7696 = vmatprep.subr.bf16.mxu0 %v8670_v0  ;;  %v319_v16 = vld [vmem:[%s8905_s11 + $0xe8] sm:$0xff]  ;;  %v320_v17 = vld [vmem:[%s8905_s11 + $0xf0] sm:$0xff]  ;;  %v3113_v23 = vld [vmem:[#allocation7 + $0x188] sm:$0xff] }
  0x87   : > { %v323_v20 = vld [vmem:[%s8905_s11 + $0x108] sm:$0xff]  ;;  %v324_v21 = vld [vmem:[%s8905_s11 + $0x110] sm:$0xff]  ;;  %v330_v45 = vld [vmem:[%s8905_s11 + $0x140] sm:$0xff] }
  0x88   : > { %v331_v49 = vld [vmem:[%s8905_s11 + $0x148] sm:$0xff]  ;;  %v332_v53 = vld [vmem:[%s8905_s11 + $0x150] sm:$0xff]  ;;  %v334_v55 = vld [vmem:[%s8905_s11 + $0x160] sm:$0xff] }
  0x89   : > { %7698 = vmatpush3.bf16.msra.mxu0 %v7697_v19  ;;  %v322_v19 = vld [vmem:[%s8905_s11 + $0x100] sm:$0xff] }
  0x8a   : > { %7699 = vmatprep.subr.bf16.mxu0 %v8670_v0  ;;  %v338_v5 = vld [vmem:[%s8905_s11 + $0x180] sm:$0xff] }
  0x8d   : > { %7701 = vmatpush3.bf16.msra.mxu0 %v7700_v22  ;;  %v3112_v22 = vld [vmem:[#allocation7 + $0x180] sm:$0xff] }
  0x8e   : > { %7702 = vmatprep.subr.bf16.mxu0 %v8670_v0  ;;  %v1784_v0 = vld [vmem:[#allocation7 + $0xd0] sm:$0xff]  ;;  %v9020_v24 = vpack.c.bf16 %v3113_v23, %v3112_v22 }
  0x8f   : > { %v7725_v3 = vpack.c.bf16 %v1785_v2, %v1784_v0 }
  0x90   : > { %13476 = vst [vmem:[#allocation12_spill] sm:$0xff] %v9020_v24  ;;  %7993 = vmatprep.subr.bf16.mxu1 %v9020_v24 }
  0x91   : > { %7704 = vmatpush3.bf16.msra.mxu0 %v7703_v25  ;;  %v325_v25 = vld [vmem:[%s8905_s11 + $0x118] sm:$0xff]  ;;  %8001 = vmatpush3.bf16.msra.mxu1 %v9020_v24 }
  0x92   : > { %7706 = vmatprep.subr.bf16.mxu0 %v7705_v46 }
  0x94   : > { %6581 = vmatmul.mubr.f32.vlgmr.msra.gmra.mrb[0].mxu0 %v290_v26  ;;  %v3114_v26 = vld [vmem:[#allocation7 + $0x190] sm:$0xff] }
  0x95   : > { %6583 = vmatprep.mubr.msk.f32.mxu0 %vm8671_vm0, %v8672_v1  ;;  %7708 = vmatpush3.bf16.msra.mxu0 %v7705_v46  ;;  %v3124_v46 = vld [vmem:[#allocation7 + $0x1e0] sm:$0xff] }
  0x96   : > { %7710 = vmatprep.subr.bf16.mxu0 %v7709_v50 }
  0x98   : > { %6584 = vmatmul.mubr.f32.gmra.mrb[2].mxu0 %v291_v27  ;;  %v3115_v27 = vld [vmem:[#allocation7 + $0x198] sm:$0xff] }
  0x99   : > { %6586 = vmatprep.mubr.msk.f32.mxu0 %vm8671_vm0, %v8672_v1  ;;  %7712 = vmatpush3.bf16.msra.mxu0 %v7709_v50  ;;  %v3126_v50 = vld [vmem:[#allocation7 + $0x1f0] sm:$0xff] }
  0x9a   : > { %7714 = vmatprep.subr.bf16.mxu0 %v7713_v54 }
  0x9c   : > { %6587 = vmatmul.mubr.f32.gmra.mrb[4].mxu0 %v292_v28  ;;  %v9027_v28 = vpack.c.bf16 %v3115_v27, %v3114_v26 }
  0x9d   : > { %6589 = vmatprep.mubr.msk.f32.mxu0 %vm8671_vm0, %v8672_v1  ;;  %7716 = vmatpush3.bf16.msra.mxu0 %v7713_v54  ;;  %v333_v54 = vld [vmem:[%s8905_s11 + $0x158] sm:$0xff] }
  0x9e   : > { %7718 = vmatprep.subr.bf16.mxu0 %v7717_v58  ;;  %13477 = vst [vmem:[#allocation13_spill] sm:$0xff] %v9027_v28  ;;  %7994 = vmatprep.subr.bf16.mxu1 %v9027_v28 }
  0x9f   : > { %8002 = vmatpush3.bf16.msra.mxu1 %v9027_v28 }
  0xa0   : > { %6590 = vmatmul.mubr.f32.gmra.mrb[6].mxu0 %v293_v29  ;;  %v326_v29 = vld [vmem:[%s8905_s11 + $0x120] sm:$0xff] }
  0xa1   : > { %6592 = vmatprep.mubr.msk.f32.mxu0 %vm8671_vm0, %v8672_v1  ;;  %7720 = vmatpush3.bf16.msra.mxu0 %v7717_v58  ;;  %v9085_v58 = vshrl.u32 %v873_v56, 7 }
  0xa2   : > { %7722 = vmatprep.subr.bf16.mxu0 %v7721_v62 }
  0xa3   : > { %v875_v60 = vadd.s32 8, %v9085_v58  ;;  %v929_v61 = vcvt.s32.f32 %v9085_v58  ;;  %v9097_v2 = vadd.s32 24, %v9085_v58 }
  0xa4   : > { %6593 = vmatmul.mubr.f32.gmra.mrb[8].mxu0 %v294_v30  ;;  %v3116_v30 = vld [vmem:[#allocation7 + $0x1a0] sm:$0xff] }
  0xa5   : > { %6595 = vmatprep.mubr.msk.f32.mxu0 %vm8671_vm0, %v8672_v1  ;;  %7724 = vmatpush3.bf16.msra.mxu0 %v7721_v62  ;;  %v876_v62 = vadd.s32 16, %v9085_v58  ;;  %v930_v0 = vcvt.s32.f32 %v875_v60  ;;  %v9169_v60 = vadd.s32 80, %v9085_v58 }
  0xa6   : > { %7726 = vmatprep.subr.bf16.mxu0 %v7725_v3 }
  0xa7   : > { %v985_v6 = vadd.f32 0.5, %v930_v0 }
  0xa8   : > { %6596 = vmatmul.mubr.f32.gmra.mrb[10].mxu0 %v295_v31  ;;  %v3117_v31 = vld [vmem:[#allocation7 + $0x1a8] sm:$0xff] }
  0xa9   : > { %6598 = vmatprep.mubr.msk.f32.mxu0 %vm8671_vm0, %v8672_v1  ;;  %7728 = vmatpush3.bf16.msra.mxu0 %v7725_v3  ;;  %v984_v3 = vadd.f32 0.5, %v929_v61 }
  0xaa   : > { %7730 = vmatprep.subr.bf16.mxu0 %v7729_v7 }
  0xab   : > { %v1039_v9 = vmul.f32 0.041666668, %v984_v3 }
  0xac   : > { %6599 = vmatmul.mubr.f32.gmra.mrb[12].mxu0 %v296_v32  ;;  %v9034_v32 = vpack.c.bf16 %v3117_v31, %v3116_v30  ;;  %v9130_v30 = vadd.s32 56, %v9085_v58  ;;  %v341_v31 = vld [vmem:[%s8905_s11 + $0x198] sm:$0xff] }
  0xad   : > { %6601 = vmatprep.mubr.msk.f32.mxu0 %vm8671_vm0, %v8672_v1  ;;  %7732 = vmatpush3.bf16.msra.mxu0 %v7729_v7  ;;  %v932_v7 = vcvt.s32.f32 %v9097_v2 }
  0xae   : > { %7734 = vmatprep.subr.bf16.mxu0 %v7733_v11  ;;  %13478 = vst [vmem:[#allocation14_spill] sm:$0xff] %v9034_v32  ;;  %7995 = vmatprep.subr.bf16.mxu1 %v9034_v32 }
  0xaf   : > { %8003 = vmatpush3.bf16.msra.mxu1 %v9034_v32 }
  0xb0   : > { %6602 = vmatmul.mubr.f32.gmra.mrb[14].mxu0 %v297_v33  ;;  %v327_v33 = vld [vmem:[%s8905_s11 + $0x128] sm:$0xff] }
  0xb1   : > { %6604 = vmatprep.mubr.msk.f32.mxu0 %vm8671_vm0, %v8672_v1  ;;  %7736 = vmatpush3.bf16.msra.mxu0 %v7733_v11  ;;  %v9107_v11 = vadd.s32 40, %v9085_v58 }
  0xb4   : > { %6605 = vmatmul.mubr.f32.gmra.mrb[16].mxu0 %v298_v34  ;;  %v3118_v34 = vld [vmem:[#allocation7 + $0x1b0] sm:$0xff] }
  0xb5   : > { %6607 = vmatprep.mubr.msk.f32.mxu0 %vm8671_vm0, %v8672_v1 }
  0xb8   : > { %6608 = vmatmul.mubr.f32.gmra.mrb[18].mxu0 %v299_v35  ;;  %v3119_v35 = vld [vmem:[#allocation7 + $0x1b8] sm:$0xff] }
  0xb9   : > { %6610 = vmatprep.mubr.msk.f32.mxu0 %vm8671_vm0, %v8672_v1 }
  0xbc   : > { %6611 = vmatmul.mubr.f32.gmra.mrb[20].mxu0 %v300_v36  ;;  %v9041_v36 = vpack.c.bf16 %v3119_v35, %v3118_v34 }
  0xbd   : > { %6613 = vmatprep.mubr.msk.f32.mxu0 %vm8671_vm0, %v8672_v1 }
  0xbe   : > { %13479 = vst [vmem:[#allocation15_spill] sm:$0xff] %v9041_v36  ;;  %7996 = vmatprep.subr.bf16.mxu1 %v9041_v36 }
  0xbf   : > { %8004 = vmatpush3.bf16.msra.mxu1 %v9041_v36 }
  0xc0   : > { %6614 = vmatmul.mubr.f32.gmra.mrb[22].mxu0 %v301_v37  ;;  %v328_v37 = vld [vmem:[%s8905_s11 + $0x130] sm:$0xff] }
  0xc1   : > { %6616 = vmatprep.mubr.msk.f32.mxu0 %vm8671_vm0, %v8672_v1 }
  0xc4   : > { %6617 = vmatmul.mubr.f32.gmra.mrb[24].mxu0 %v302_v38  ;;  %v3120_v38 = vld [vmem:[#allocation7 + $0x1c0] sm:$0xff] }
  0xc5   : > { %6619 = vmatprep.mubr.msk.f32.mxu0 %vm8671_vm0, %v8672_v1 }
  0xc8   : > { %6620 = vmatmul.mubr.f32.gmra.mrb[26].mxu0 %v303_v39  ;;  %v3121_v39 = vld [vmem:[#allocation7 + $0x1c8] sm:$0xff] }
  0xc9   : > { %6622 = vmatprep.mubr.msk.f32.mxu0 %vm8671_vm0, %v8672_v1 }
  0xcc   : > { %6623 = vmatmul.mubr.f32.gmra.mrb[28].mxu0 %v304_v40  ;;  %v9048_v40 = vpack.c.bf16 %v3121_v39, %v3120_v38 }
  0xcd   : > { %6625 = vmatprep.mubr.msk.f32.mxu0 %vm8671_vm0, %v8672_v1 }
  0xce   : > { %13480 = vst [vmem:[#allocation16_spill] sm:$0xff] %v9048_v40  ;;  %7997 = vmatprep.subr.bf16.mxu1 %v9048_v40 }
  0xcf   : > { %8005 = vmatpush3.bf16.msra.mxu1 %v9048_v40 }
  0xd0   : > { %6626 = vmatmul.mubr.f32.gmra.mrb[30].mxu0 %v305_v41  ;;  %v329_v41 = vld [vmem:[%s8905_s11 + $0x138] sm:$0xff] }
  0xd1   : > { %6628 = vmatprep.mubr.msk.f32.mxu0 %vm8671_vm0, %v8672_v1 }
  0xd4   : > { %6629 = vmatmul.mubr.f32.gmra.mrb[32].mxu0 %v306_v42  ;;  %v3122_v42 = vld [vmem:[#allocation7 + $0x1d0] sm:$0xff] }
  0xd5   : > { %6631 = vmatprep.mubr.msk.f32.mxu0 %vm8671_vm0, %v8672_v1 }
  0xd8   : > { %6632 = vmatmul.mubr.f32.gmra.mrb[34].mxu0 %v307_v43  ;;  %v3123_v43 = vld [vmem:[#allocation7 + $0x1d8] sm:$0xff] }
  0xd9   : > { %6634 = vmatprep.mubr.msk.f32.mxu0 %vm8671_vm0, %v8672_v1  ;;  %v9055_v44 = vpack.c.bf16 %v3123_v43, %v3122_v42  ;;  %v936_v42 = vcvt.s32.f32 %v9130_v30  ;;  %v9142_v43 = vadd.s32 64, %v9085_v58 }
  0xdb   : > { %13481 = vst [vmem:[#allocation17_spill] sm:$0xff] %v9055_v44  ;;  %7998 = vmatprep.subr.bf16.mxu1 %v9055_v44  ;;  %v937_v56 = vcvt.s32.f32 %v9142_v43 }
  0xdc   : > { %6635 = vmatmul.mubr.f32.gmra.mrb[36].mxu0 %v308_v47  ;;  %8006 = vmatpush3.bf16.msra.mxu1 %v9055_v44  ;;  %v3125_v47 = vld [vmem:[#allocation7 + $0x1e8] sm:$0xff] }
  0xdd   : > { %6637 = vmatprep.mubr.msk.f32.mxu0 %vm8671_vm0, %v8672_v1  ;;  %v9062_v48 = vpack.c.bf16 %v3125_v47, %v3124_v46  ;;  %v342_v47 = vld [vmem:[%s8905_s11 + $0x1a0] sm:$0xff] }
  0xdf   : > { %13482 = vst [vmem:[#allocation18_spill] sm:$0xff] %v9062_v48  ;;  %7999 = vmatprep.subr.bf16.mxu1 %v9062_v48 }
  0xe0   : > { %6638 = vmatmul.mubr.f32.gmra.mrb[38].mxu0 %v309_v51  ;;  %8007 = vmatpush3.bf16.msra.mxu1 %v9062_v48  ;;  %v3127_v51 = vld [vmem:[#allocation7 + $0x1f8] sm:$0xff] }
  0xe1   : > { %6640 = vmatprep.mubr.msk.f32.mxu0 %vm8671_vm0, %v8672_v1  ;;  %v9069_v52 = vpack.c.bf16 %v3127_v51, %v3126_v50 }
  0xe3   : > { %13483 = vst [vmem:[#allocation19_spill] sm:$0xff] %v9069_v52  ;;  %8000 = vmatprep.subr.bf16.mxu1 %v9069_v52 }
  0xe4   : > { %6641 = vmatmul.mubr.f32.gmra.mrb[40].mxu0 %v310_v57  ;;  %8008 = vmatpush3.bf16.msra.mxu1 %v9069_v52  ;;  %v335_v57 = vld [vmem:[%s8905_s11 + $0x168] sm:$0xff] }
  0xe5   : > { %6643 = vmatprep.mubr.msk.f32.mxu0 %vm8671_vm0, %v8672_v1 }
  0xe8   : > { %6644 = vmatmul.mubr.f32.gmra.mrb[42].mxu0 %v311_v59  ;;  %v336_v59 = vld [vmem:[%s8905_s11 + $0x170] sm:$0xff] }
  0xe9   : > { %6646 = vmatprep.mubr.msk.f32.mxu0 %vm8671_vm0, %v8672_v1 }
  0xec   : > { %6647 = vmatmul.mubr.f32.gmra.mrb[44].mxu0 %v312_v63  ;;  %v337_v63 = vld [vmem:[%s8905_s11 + $0x178] sm:$0xff] }
  0xed   : > { %6649 = vmatprep.mubr.msk.f32.mxu0 %vm8671_vm0, %v8672_v1 }
  0xf0   : > { %6650 = vmatmul.mubr.f32.gmra.mrb[46].mxu0 %v313_v4  ;;  %v931_v4 = vcvt.s32.f32 %v876_v62  ;;  %v343_v62 = vld [vmem:[%s8905_s11 + $0x1a8] sm:$0xff] }
  0xf1   : > { %6652 = vmatprep.mubr.msk.f32.mxu0 %vm8671_vm0, %v8672_v1 }
  0xf2   : > { %v986_v10 = vadd.f32 0.5, %v931_v4 }
  0xf4   : > { %6653 = vmatmul.mubr.f32.gmra.mrb[48].mxu0 %v314_v8  ;;  %v9104_v8 = vadd.s32 32, %v9085_v58 }
  0xf5   : > { %6655 = vmatprep.mubr.msk.f32.mxu0 %vm8671_vm0, %v8672_v1 }
  0xf8   : > { %6656 = vmatmul.mubr.f32.gmra.mrb[50].mxu0 %v315_v12  ;;  %v339_v12 = vld [vmem:[%s8905_s11 + $0x188] sm:$0xff] }
  0xf9   : > { %6658 = vmatprep.mubr.msk.f32.mxu0 %vm8671_vm0, %v8672_v1 }
  0xfc   : > { %6659 = vmatmul.mubr.f32.gmra.mrb[52].mxu0 %v316_v13  ;;  %v1040_v13 = vmul.f32 0.041666668, %v985_v6 }
  0xfd   : > { %6661 = vmatprep.mubr.msk.f32.mxu0 %vm8671_vm0, %v8672_v1 }
 0x100   : > { %6662 = vmatmul.mubr.f32.gmra.mrb[54].mxu0 %v317_v14  ;;  %v987_v14 = vadd.f32 0.5, %v932_v7 }
 0x101   : > { %6664 = vmatprep.mubr.msk.f32.mxu0 %vm8671_vm0, %v8672_v1 }
 0x102   : > { %v1042_v22 = vmul.f32 0.041666668, %v987_v14  ;;  %v939_v14 = vcvt.s32.f32 %v9169_v60 }
 0x104   : > { %6665 = vmatmul.mubr.f32.gmra.mrb[56].mxu0 %v318_v15  ;;  %v933_v15 = vcvt.s32.f32 %v9104_v8  ;;  %v9135_v34 = vfloor.f32 %v1042_v22 }
 0x105   : > { %6667 = vmatprep.mubr.msk.f32.mxu0 %vm8671_vm0, %v8672_v1 }
 0x106   : > { %v988_v23 = vadd.f32 0.5, %v933_v15 }
 0x108   : > { %6668 = vmatmul.mubr.f32.gmra.mrb[58].mxu0 %v319_v16  ;;  %v1094_v16 = vfloor.f32 %v1039_v9  ;;  %v1043_v35 = vmul.f32 0.041666668, %v988_v23 }
 0x109   : > { %6670 = vmatprep.mubr.msk.f32.mxu0 %vm8671_vm0, %v8672_v1 }
 0x10a   : > { %vm1317_vm1 = vcmp.ge.f32.partialorder %v1094_v16, 1.0  ;;  %vm1372_vm2 = vcmp.le.f32.partialorder %v1094_v16, 16.0  ;;  %v9153_v50 = vfloor.f32 %v1043_v35 }
 0x10b   : > { %vm9163_vm5 = vmand %vm1317_vm1, %vm1372_vm2  ;;  %vm1320_vm1 = vcmp.ge.f32.partialorder %v9135_v34, 1.0 }
 0x10c   : > { %6671 = vmatmul.mubr.f32.gmra.mrb[60].mxu0 %v320_v17  ;;  %v1041_v17 = vmul.f32 0.041666668, %v986_v10 }
 0x10d   : > { %6673 = vmatprep.mubr.msk.f32.mxu0 %vm8671_vm0, %v8672_v1 }
 0x10e   : > { %v9124_v26 = vfloor.f32 %v1041_v17 }
 0x110   : > { %6674 = vmatmul.mubr.f32.gmra.mrb[62].mxu0 %v321_v18  ;;  %v9116_v18 = vadd.s32 48, %v9085_v58  ;;  %v1151_v38 = vmul.f32 24.0, %v9124_v26  ;;  %vm1319_vm10 = vcmp.ge.f32.partialorder %v9124_v26, 1.0  ;;  %vm1374_vm11 = vcmp.le.f32.partialorder %v9124_v26, 16.0 }
 0x111   : > { %6676 = vmatprep.mubr.msk.f32.mxu0 %vm8671_vm0, %v8672_v1 }
 0x112   : > { %v935_v27 = vcvt.s32.f32 %v9116_v18  ;;  %v9155_v51 = vsub.f32 %v931_v4, %v1151_v38 }
 0x114   : > { %6677 = vmatmul.mubr.f32.gmra.mrb[64].mxu0 %v322_v19  ;;  %v934_v19 = vcvt.s32.f32 %v9107_v11  ;;  %v990_v39 = vadd.f32 0.5, %v935_v27  ;;  %vm1484_vm12 = vcmp.ge.f32.partialorder %v9155_v51, 1.0  ;;  %vm1594_vm14 = vcmp.le.f32.partialorder %v9155_v51, 16.0 }
 0x115   : > { %6679 = vmatprep.mubr.msk.f32.mxu0 %vm8671_vm0, %v8672_v1 }
 0x118   : > { %6680 = vmatmul.mubr.f32.gmra.mrb[66].mxu0 %v323_v20  ;;  %v340_v20 = vld [vmem:[%s8905_s11 + $0x190] sm:$0xff] }
 0x119   : > { %6682 = vmatprep.mubr.msk.f32.mxu0 %vm8671_vm0, %v8672_v1 }
 0x11c   : > { %6683 = vmatmul.mubr.f32.gmra.mrb[68].mxu0 %v324_v21  ;;  %v1095_v21 = vfloor.f32 %v1040_v13 }
 0x11d   : > { %6685 = vmatprep.mubr.msk.f32.mxu0 %vm8671_vm0, %v8672_v1 }
 0x11e   : > { %vm1318_vm6 = vcmp.ge.f32.partialorder %v1095_v21, 1.0  ;;  %vm1373_vm7 = vcmp.le.f32.partialorder %v1095_v21, 16.0 }
 0x11f   : > { %vm9205_vm15 = vmand %vm1318_vm6, %vm1373_vm7 }
 0x120   : > { %6686 = vmatmul.mubr.f32.gmra.mrb[70].mxu0 %v325_v25  ;;  %v1149_v25 = vmul.f32 24.0, %v1094_v16  ;;  %v344_v16 = vld [vmem:[%s8905_s11 + $0x1b0] sm:$0xff]  ;;  %s5636_s11 = sshll.u32 %s12806_s27, 4  ;;  %s12950_s11 = int_to_ptr.vmem [resolvable:$true] %s5636_s11 }
 0x121   : > { %6688 = vmatprep.mubr.msk.f32.mxu0 %vm8671_vm0, %v8672_v1  ;;  %s8577_s25 = scalar_lea.vmem %s12950_s11, 6144  ;;  %p8584_p3 = scmp.lt.s32.totalorder %s12950_s11, %s8582_s9 }
 0x122   : > { %p8578_p8 = scmp.ne.s32.totalorder %s12950_s11, %s8577_s25  ;;  %p8585_p5 = scmp.lt.s32.totalorder %s8583_s14, %s8577_s25 }
 0x124   : > { %6689 = vmatmul.mubr.f32.gmra.mrb[72].mxu0 %v326_v29  ;;  %v989_v29 = vadd.f32 0.5, %v934_v19  ;;  %p8579_p1 = pnand %p8578_p8, %p14725_p12  ;;  %p8586_p9 = por %p8585_p5, %p8584_p3 }
 0x125   : > { %6691 = vmatprep.mubr.msk.f32.mxu0 %vm8671_vm0, %v8672_v1 }
 0x126   : > { %p8580_p10 = pneg %p8579_p1 }
 0x128   : > { %6692 = vmatmul.mubr.f32.gmra.mrb[74].mxu0 %v327_v33  ;;  %v1150_v33 = vmul.f32 24.0, %v1095_v21  ;;  %p8587_p2 = pnand %p8586_p9, %p8580_p10 }
 0x129   : > { %6694 = vmatprep.mubr.msk.f32.mxu0 %vm8671_vm0, %v8672_v1 }
 0x12a   : > { %v9147_v46 = vsub.f32 %v930_v0, %v1150_v33  ;;  %v1153_v0 = vmul.f32 24.0, %v9153_v50 }
 0x12c   : > { %6695 = vmatmul.mubr.f32.gmra.mrb[76].mxu0 %v328_v37  ;;  %v1204_v37 = vsub.f32 %v929_v61, %v1149_v25  ;;  %v9174_v61 = vld [vmem:[%s13003_s2] ss:$0 sm:$0xff]  ;;  %vm1483_vm8 = vcmp.ge.f32.partialorder %v9147_v46, 1.0  ;;  %vm1593_vm9 = vcmp.le.f32.partialorder %v9147_v46, 16.0  ;;  %v9220_v17 = vsub.f32 %v933_v15, %v1153_v0 }
 0x12d   : > { %6697 = vmatprep.mubr.msk.f32.mxu0 %vm8671_vm0, %v8672_v1  ;;  %vm9238_vm2 = vmand %vm9205_vm15, %vm1483_vm8  ;;  %v13517_v46 = vmov 0 }
 0x12e   : > { %vm1482_vm3 = vcmp.ge.f32.partialorder %v1204_v37, 1.0  ;;  %vm1592_vm4 = vcmp.le.f32.partialorder %v1204_v37, 16.0  ;;  %vm9257_vm8 = vmand %vm1319_vm10, %vm1374_vm11 }
 0x12f   : > { %vm9194_vm13 = vmand %vm9163_vm5, %vm1482_vm3  ;;  %vm1375_vm3 = vcmp.le.f32.partialorder %v9135_v34, 16.0 }
 0x130   : > { %6698 = vmatmul.mubr.f32.gmra.mrb[78].mxu0 %v329_v41  ;;  %v1044_v41 = vmul.f32 0.041666668, %v989_v29  ;;  %vm9228_vm7 = vmand %vm9194_vm13, %vm1592_vm4  ;;  %vm1376_vm4 = vcmp.le.f32.partialorder %v9153_v50, 16.0  ;;  %vm1486_vm13 = vcmp.ge.f32.partialorder %v9220_v17, 1.0 }
 0x131   : > { %6700 = vmatprep.mubr.msk.f32.mxu0 %vm8671_vm0, %v8672_v1  ;;  %vm9273_vm10 = vmand %vm9238_vm2, %vm1593_vm9 }
 0x132   : > { %vm9291_vm9 = vmand %vm9257_vm8, %vm1484_vm12 }
 0x133   : > { %vm9309_vm12 = vmand %vm1320_vm1, %vm1375_vm3 }
 0x134   : > { %6701 = vmatmul.mubr.f32.gmra.mrb[80].mxu0 %v330_v45  ;;  %v9145_v45 = vadd.s32 72, %v9085_v58  ;;  %vm9332_vm3 = vmand %vm9291_vm9, %vm1594_vm14  ;;  %vm13515_vm9 = vcmask 1046528  }
 0x135   : > { %6703 = vmatprep.mubr.msk.f32.mxu0 %vm8671_vm0, %v8672_v1 }
 0x138   : > { %6704 = vmatmul.mubr.f32.gmra.mrb[82].mxu0 %v331_v49  ;;  %v1152_v49 = vmul.f32 24.0, %v9135_v34 }
 0x139   : > { %6706 = vmatprep.mubr.msk.f32.mxu0 %vm8671_vm0, %v8672_v1 }
 0x13c   : > { %6707 = vmatmul.mubr.f32.gmra.mrb[84].mxu0 %v332_v53  ;;  %v1045_v53 = vmul.f32 0.041666668, %v990_v39  ;;  %v9267_v39 = vadd.s32 96, %v9085_v58 }
 0x13d   : > { %6709 = vmatprep.mubr.msk.f32.mxu0 %vm8671_vm0, %v8672_v1 }
 0x13e   : > { %v9189_v3 = vfloor.f32 %v1045_v53  ;;  %v13015_v34 = vcvt.s32.f32 %v9267_v39 }
 0x140   : > { %6710 = vmatmul.mubr.f32.gmra.mrb[86].mxu0 %v333_v54  ;;  %v9157_v54 = vfloor.f32 %v1044_v41  ;;  %v1155_v22 = vmul.f32 24.0, %v9189_v3  ;;  %v13498_v41 = vmov 0  ;;  %vm1378_vm14 = vcmp.le.f32.partialorder %v9189_v3, 16.0 }
 0x141   : > { %6712 = vmatprep.mubr.msk.f32.mxu0 %vm8671_vm0, %v8672_v1  ;;  %v13499_v41 = vsel %vm9273_vm10, 4294967295, %v13498_v41 }
 0x142   : > { %v1154_v2 = vmul.f32 24.0, %v9157_v54  ;;  %vm1322_vm15 = vcmp.ge.f32.partialorder %v9157_v54, 1.0  ;;  %13500 = vst [vmem:[#allocation22_spill] sm:$0xff] %v13499_v41  ;;  %vm1377_vm11 = vcmp.le.f32.partialorder %v9157_v54, 16.0 }
 0x144   : > { %6713 = vmatmul.mubr.f32.gmra.mrb[88].mxu0 %v334_v55  ;;  %v991_v55 = vadd.f32 0.5, %v936_v42  ;;  %v9246_v15 = vsub.f32 %v934_v19, %v1154_v2  ;;  %v994_v19 = vadd.f32 0.5, %v939_v14 }
 0x145   : > { %6715 = vmatprep.mubr.msk.f32.mxu0 %vm8671_vm0, %v8672_v1 }
 0x146   : > { %v1046_v6 = vmul.f32 0.041666668, %v991_v55  ;;  %v9300_v55 = vadd.s32 104, %v9085_v58  ;;  %v1049_v2 = vmul.f32 0.041666668, %v994_v19  ;;  %v996_v19 = vadd.f32 0.5, %v13015_v34 }
 0x148   : > { %6716 = vmatmul.mubr.f32.gmra.mrb[90].mxu0 %v335_v57  ;;  %v9248_v25 = vfloor.f32 %v1046_v6  ;;  %v13014_v8 = vcvt.s32.f32 %v9300_v55  ;;  %v9363_v30 = vfloor.f32 %v1049_v2  ;;  %v1051_v54 = vmul.f32 0.041666668, %v996_v19  ;;  %v3483_v19 = vld [vmem:[#allocation7 + $0x208] sm:$0xff] }
 0x149   : > { %6718 = vmatprep.mubr.msk.f32.mxu0 %vm8671_vm0, %v8672_v1 }
 0x14a   : > { %v1156_v18 = vmul.f32 24.0, %v9248_v25  ;;  %vm1379_vm2 = vcmp.le.f32.partialorder %v9248_v25, 16.0  ;;  %v1159_v43 = vmul.f32 24.0, %v9363_v30 }
 0x14c   : > { %6719 = vmatmul.mubr.f32.gmra.mrb[92].mxu0 %v336_v59  ;;  %v938_v59 = vcvt.s32.f32 %v9145_v45  ;;  %v9350_v51 = vsub.f32 %v936_v42, %v1156_v18  ;;  %v9449_v45 = vadd.s32 128, %v9085_v58 }
 0x14d   : > { %6721 = vmatprep.mubr.msk.f32.mxu0 %vm8671_vm0, %v8672_v1 }
 0x14e   : > { %v993_v13 = vadd.f32 0.5, %v938_v59 }
 0x150   : > { %6722 = vmatmul.mubr.f32.gmra.mrb[94].mxu0 %v337_v63  ;;  %v9183_v63 = vsub.f32 %v932_v7, %v1152_v49  ;;  %v992_v7 = vadd.f32 0.5, %v937_v56  ;;  %v1048_v11 = vmul.f32 0.041666668, %v993_v13 }
 0x151   : > { %6724 = vmatprep.mubr.msk.f32.mxu0 %vm8671_vm0, %v8672_v1 }
 0x152   : > { %vm1595_vm5 = vcmp.le.f32.partialorder %v9183_v63, 16.0  ;;  %v1047_v29 = vmul.f32 0.041666668, %v992_v7 }
 0x154   : > { %6725 = vmatmul.mubr.f32.gmra.mrb[96].mxu0 %v338_v5  ;;  %v9314_v5 = vfloor.f32 %v1048_v11 }
 0x155   : > { %6727 = vmatprep.mubr.msk.f32.mxu0 %vm8671_vm0, %v8672_v1 }
 0x156   : > { %v1158_v18 = vmul.f32 24.0, %v9314_v5 }
 0x158   : > { %6728 = vmatmul.mubr.f32.gmra.mrb[98].mxu0 %v339_v12  ;;  %v13508_v12 = vmov 0 }
 0x159   : > { %6730 = vmatprep.mubr.msk.f32.mxu0 %vm8671_vm0, %v8672_v1  ;;  %v13509_v12 = vsel %vm9332_vm3, 4294967295, %v13508_v12 }
 0x15a   : > { %13510 = vst [vmem:[#allocation26_spill] sm:$0xff] %v13509_v12 }
 0x15c   : > { %6731 = vmatmul.mubr.f32.gmra.mrb[100].mxu0 %v340_v20  ;;  %v9223_v20 = vadd.s32 88, %v9085_v58 }
 0x15d   : > { %6733 = vmatprep.mubr.msk.f32.mxu0 %vm8671_vm0, %v8672_v1 }
 0x15e   : > { %v940_v38 = vcvt.s32.f32 %v9223_v20  ;;  %v13559_v20 = vcvt.s32.f32 %v9449_v45 }
 0x160   : > { %6734 = vmatmul.mubr.f32.gmra.mrb[102].mxu0 %v341_v31  ;;  %v995_v7 = vadd.f32 0.5, %v940_v38 }
 0x161   : > { %6736 = vmatprep.mubr.msk.f32.mxu0 %vm8671_vm0, %v8672_v1 }
 0x162   : > { %v1050_v11 = vmul.f32 0.041666668, %v995_v7 }
 0x164   : > { %6737 = vmatmul.mubr.f32.gmra.mrb[104].mxu0 %v342_v47  ;;  %v9280_v47 = vsub.f32 %v935_v27, %v1155_v22  ;;  %v9297_v27 = vfloor.f32 %v1047_v29 }
 0x165   : > { %6739 = vmatprep.mubr.msk.f32.mxu0 %vm8671_vm0, %v8672_v1 }
 0x167   : > { %v434_v4 = vpop.f32.mrb[0].mxu0 }
 0x168   : > { %v435_v9 = vadd.f32 %v9174_v61, %v434_v4  ;;  %v6582_v10 = vpop.f32.mrb[1].mxu0  ;;  %6740 = vmatmul.mubr.f32.gmra.mrb[106].mxu0 %v343_v62  ;;  %v997_v4 = vadd.f32 0.5, %v13014_v8 }
 0x169   : > { %6742 = vmatprep.mubr.msk.f32.mxu0 %vm8671_vm0, %v8672_v1  ;;  %v13490_v1 = vmov 0  ;;  %vm1321_vm0 = vcmp.ge.f32.partialorder %v9153_v50, 1.0 }
 0x16a   : > { %vm708_vm6 = vcmp.ge.f32.partialorder %v435_v9, 0.0  ;;  %v763_v21 = vmul.f32 0.2, %v435_v9  ;;  %v13491_v1 = vsel %vm9228_vm7, 4294967295, %v13490_v1 }
 0x16b   : > { %13492 = vst [vmem:[#allocation20_spill] sm:$0xff] %v13491_v1  ;;  %v439_v23 = vpop.f32.mrb[2].mxu0 }
 0x16c   : > { %v9250_v31 = vsel %vm708_vm6, %v435_v9, %v763_v21  ;;  %v440_v33 = vadd.f32 %v9174_v61, %v439_v23  ;;  %v6585_v35 = vpop.f32.mrb[3].mxu0  ;;  %6743 = vmatmul.mubr.f32.gmra.mrb[108].mxu0 %v344_v16  ;;  %v9326_v9 = vadd.s32 112, %v9085_v58  ;;  %v1157_v23 = vmul.f32 24.0, %v9297_v27 }
 0x16d   : > { %13495 = vst [vmem:[#allocation21_spill] sm:$0xff] %v9250_v31  ;;  %v9285_v49 = vsel %vm9228_vm7, %v9250_v31, 0.0 }
 0x16e   : > { %vm709_vm6 = vcmp.ge.f32.partialorder %v440_v33, 0.0  ;;  %v764_v26 = vmul.f32 0.2, %v440_v33  ;;  %13501 = vst [vmem:[#allocation23_spill] sm:$0xff] %v9285_v49  ;;  %v1840_v13 = vrot.slane %v9285_v49, 1 }
 0x16f   : > { %v444_v53 = vpop.f32.mrb[4].mxu0 }
 0x170   : > { %v9302_v57 = vsel %vm709_vm6, %v440_v33, %v764_v26  ;;  %v445_v62 = vadd.f32 %v9174_v61, %v444_v53  ;;  %v6588_v0 = vpop.f32.mrb[5].mxu0  ;;  %vm13511_vm6 = vcmp.ge.f32.partialorder %v9183_v63, 1.0  ;;  %v13013_v26 = vcvt.s32.f32 %v9326_v9 }
 0x171   : > { %13504 = vst [vmem:[#allocation24_spill] sm:$0xff] %v9302_v57  ;;  %v9319_v6 = vsel %vm9273_vm10, %v9302_v57, 0.0  ;;  %vm9342_vm8 = vmand %vm9309_vm12, %vm13511_vm6  ;;  %vm1324_vm6 = vcmp.ge.f32.partialorder %v9248_v25, 1.0  ;;  %v9394_v63 = vsub.f32 %v937_v56, %v1157_v23  ;;  %v9446_v0 = vadd.s32 120, %v9085_v58 }
 0x172   : > { %13507 = vst [vmem:[#allocation25_spill] sm:$0xff] %v9319_v6  ;;  %vm710_vm1 = vcmp.ge.f32.partialorder %v445_v62, 0.0  ;;  %v765_v10 = vmul.f32 0.2, %v445_v62  ;;  %v1841_v16 = vrot.slane %v9319_v6, 1  ;;  %vm1431_vm12 = vmand %vm1321_vm0, %vm1376_vm4  ;;  %v998_v22 = vadd.f32 0.5, %v13013_v26 }
 0x173   : > { %v449_v21 = vpop.f32.mrb[6].mxu0  ;;  %vm9378_vm0 = vmand %vm9342_vm8, %vm1595_vm5  ;;  %vm13523_vm5 = vcmask 1046528   ;;  %vm1600_vm8 = vcmp.le.f32.partialorder %v9394_v63, 16.0 }
 0x174   : > { %v9354_v29 = vsel %vm710_vm1, %v445_v62, %v765_v10  ;;  %v450_v33 = vadd.f32 %v9174_v61, %v449_v21  ;;  %v6591_v35 = vpop.f32.mrb[7].mxu0  ;;  %v1842_v37 = vsel %vm13515_vm9, %v1840_v13, %v1841_v16  ;;  %v13518_v46 = vsel %vm9378_vm0, 4294967295, %v13517_v46  ;;  %vm9385_vm4 = vmand %vm1431_vm12, %vm1486_vm13 }
 0x175   : > { %13514 = vst [vmem:[#allocation27_spill] sm:$0xff] %v9354_v29  ;;  %v9368_v42 = vsel %vm9332_vm3, %v9354_v29, 0.0  ;;  %6777 = vmatprep.mubr.f32.mxu0 %v1842_v37  ;;  %13519 = vst [vmem:[#allocation29_spill] sm:$0xff] %v13518_v46  ;;  %vm1598_vm9 = vcmp.le.f32.partialorder %v9280_v47, 16.0  ;;  %v13528_v35 = vmov 0  ;;  %v9434_v37 = vsub.f32 %v938_v59, %v1158_v18 }
 0x176   : > { %13516 = vst [vmem:[#allocation28_spill] sm:$0xff] %v9368_v42  ;;  %v1843_v53 = vrot.slane %v9368_v42, 1  ;;  %vm711_vm1 = vcmp.ge.f32.partialorder %v450_v33, 0.0  ;;  %v766_v50 = vmul.f32 0.2, %v450_v33  ;;  %vm9406_vm13 = vmand %vm1322_vm15, %vm1377_vm11  ;;  %vm13527_vm11 = vcmp.le.f32.partialorder %v9220_v17, 16.0 }
 0x177   : > { %v454_v62 = vpop.f32.mrb[8].mxu0  ;;  %vm13531_vm12 = vcmp.ge.f32.partialorder %v9246_v15, 1.0  ;;  %v1052_v17 = vmul.f32 0.041666668, %v997_v4 }
 0x178   : > { %v9398_v2 = vsel %vm711_vm1, %v450_v33, %v766_v50  ;;  %v455_v7 = vadd.f32 %v9174_v61, %v454_v62  ;;  %v6594_v10 = vpop.f32.mrb[9].mxu0  ;;  %v1844_v13 = vsel %vm13523_vm5, %v1841_v16, %v1843_v53  ;;  %v9419_v16 = vfloor.f32 %v1050_v11  ;;  %vm9428_vm5 = vmand %vm9385_vm4, %vm13527_vm11  ;;  %v3482_v11 = vld [vmem:[#allocation7 + $0x200] sm:$0xff] }
 0x179   : > { %13522 = vst [vmem:[#allocation30_spill] sm:$0xff] %v9398_v2  ;;  %6778 = vmatmul.mubr.f32.vlgmr.msra.gmra.mrb[110].mxu0 %v1844_v13  ;;  %v9415_v56 = vsel %vm9378_vm0, %v9398_v2, 0.0  ;;  %v13529_v35 = vsel %vm9428_vm5, 4294967295, %v13528_v35  ;;  %vm9440_vm1 = vmand %vm9406_vm13, %vm13531_vm12  ;;  %v9451_v59 = vpack.c.bf16 %v3483_v19, %v3482_v11  ;;  %vm13535_vm13 = vcmask 1046528  }
 0x17a   : > { %13526 = vst [vmem:[#allocation31_spill] sm:$0xff] %v9415_v56  ;;  %vm712_vm15 = vcmp.ge.f32.partialorder %v455_v7, 0.0  ;;  %v767_v23 = vmul.f32 0.2, %v455_v7  ;;  %v1845_v33 = vrot.slane %v9415_v56, 1  ;;  %13530 = vst [vmem:[#allocation32_spill] sm:$0xff] %v13529_v35  ;;  %v9468_v11 = vsub.f32 %v939_v14, %v1159_v43 }
 0x17b   : > { %v459_v50 = vpop.f32.mrb[10].mxu0  ;;  %vm13536_vm12 = vcmp.ge.f32.partialorder %v9189_v3, 1.0  ;;  %v1160_v3 = vmul.f32 24.0, %v9419_v16  ;;  %7834 = vmatprep.subr.bf16.mxu1 %v9451_v59  ;;  %v13541_v43 = vmov 0  ;;  %v9492_v19 = vadd.s32 144, %v9085_v58 }
 0x17c   : > { %v9453_v18 = vsel %vm712_vm15, %v455_v7, %v767_v23  ;;  %v460_v10 = vadd.f32 %v9174_v61, %v459_v50  ;;  %v6597_v13 = vpop.f32.mrb[11].mxu0  ;;  %v1846_v21 = vsel %vm13535_vm13, %v1843_v53, %v1845_v33  ;;  %vm9461_vm11 = vmand %vm13536_vm12, %vm1378_vm14  ;;  %v1053_v53 = vmul.f32 0.041666668, %v998_v22 }
 0x17d   : > { %13534 = vst [vmem:[#allocation33_spill] sm:$0xff] %v9453_v18  ;;  %6780 = vmatprep.mubr.f32.mxu0 %v1846_v21  ;;  %v9473_v7 = vsel %vm9428_vm5, %v9453_v18, 0.0  ;;  %v9479_v23 = vadd.s32 136, %v9085_v58  ;;  %vm13540_vm12 = vcmp.le.f32.partialorder %v9246_v15, 16.0  ;;  %vm13544_vm15 = vcmp.ge.f32.partialorder %v9280_v47, 1.0 }
 0x17e   : > { %13539 = vst [vmem:[#allocation34_spill] sm:$0xff] %v9473_v7  ;;  %vm713_vm14 = vcmp.ge.f32.partialorder %v460_v10, 0.0  ;;  %v768_v60 = vmul.f32 0.2, %v460_v10  ;;  %v1847_v14 = vrot.slane %v9473_v7, 1  ;;  %vm9487_vm4 = vmand %vm9440_vm1, %vm13540_vm12  ;;  %v9503_v15 = vfloor.f32 %v1051_v54 }
 0x17f   : > { %v13542_v43 = vsel %vm9487_vm4, 4294967295, %v13541_v43  ;;  %v464_v22 = vpop.f32.mrb[12].mxu0  ;;  %vm9498_vm13 = vmand %vm9461_vm11, %vm13544_vm15  ;;  %v9505_v62 = vfloor.f32 %v1052_v17  ;;  %v13024_v13 = vcvt.s32.f32 %v9446_v0  ;;  %vm13548_vm1 = vcmask 1046528  }
 0x180   : > { %13543 = vst [vmem:[#allocation35_spill] sm:$0xff] %v13542_v43  ;;  %v9509_v26 = vsel %vm713_vm14, %v460_v10, %v768_v60  ;;  %v465_v8 = vadd.f32 %v9174_v61, %v464_v22  ;;  %v6600_v34 = vpop.f32.mrb[13].mxu0  ;;  %v9513_v4 = vsel %vm13548_vm1, %v1845_v33, %v1847_v14  ;;  %vm9519_vm11 = vmand %vm1324_vm6, %vm1379_vm2  ;;  %v9525_v17 = vadd.s32 152, %v9085_v58 }
 0x181   : > { %13547 = vst [vmem:[#allocation36_spill] sm:$0xff] %v9509_v26  ;;  %13549 = vst [vmem:[#allocation37_spill] sm:$0xff] %v9513_v4  ;;  %6781 = vmatmul.mubr.f32.gmra.mrb[112].mxu0 %v9513_v4  ;;  %v9531_v34 = vsel %vm9487_vm4, %v9509_v26, 0.0  ;;  %v9537_v25 = vsub.f32 %v940_v38, %v1160_v3  ;;  %v9539_v33 = vfloor.f32 %v1053_v53  ;;  %v13553_v21 = vmov 0 }
 0x182   : > { %13552 = vst [vmem:[#allocation38_spill] sm:$0xff] %v9531_v34  ;;  %vm714_vm2 = vcmp.ge.f32.partialorder %v465_v8, 0.0  ;;  %v769_v60 = vmul.f32 0.2, %v465_v8  ;;  %v1849_v22 = vrot.slane %v9531_v34, 1  ;;  %vm9547_vm6 = vmand %vm9498_vm13, %vm1598_vm9  ;;  %vm13556_vm1 = vcmp.ge.f32.partialorder %v9350_v51, 1.0 }
 0x183   : > { %v13554_v21 = vsel %vm9547_vm6, 4294967295, %v13553_v21  ;;  %v469_v38 = vpop.f32.mrb[14].mxu0  ;;  %vm9556_vm14 = vmand %vm9519_vm11, %vm13556_vm1  ;;  %v1161_v47 = vmul.f32 24.0, %v9503_v15  ;;  %v1162_v53 = vmul.f32 24.0, %v9505_v62  ;;  %v999_v50 = vadd.f32 0.5, %v13024_v13 }
 0x184   : > { %13555 = vst [vmem:[#allocation39_spill] sm:$0xff] %v13554_v21  ;;  %v1000_v10 = vadd.f32 0.5, %v13559_v20  ;;  %v9567_v52 = vsel %vm714_vm2, %v465_v8, %v769_v60  ;;  %v470_v54 = vadd.f32 %v9174_v61, %v469_v38  ;;  %v6603_v48 = vpop.f32.mrb[15].mxu0  ;;  %vm13561_vm9 = vcmask 1046528  }
 0x185   : > { %13560 = vst [vmem:[#allocation40_spill] sm:$0xff] %v9567_v52  ;;  %v9571_v44 = vsel %vm13561_vm9, %v1847_v14, %v1849_v22  ;;  %vm13563_vm13 = vcmp.le.f32.partialorder %v9297_v27, 16.0  ;;  %vm13564_vm11 = vcmp.ge.f32.partialorder %v9297_v27, 1.0  ;;  %v9587_v48 = vsel %vm9547_vm6, %v9567_v52, 0.0 }
 0x186   : > { %13562 = vst [vmem:[#allocation41_spill] sm:$0xff] %v9571_v44  ;;  %vm9577_vm1 = vmand %vm13564_vm11, %vm13563_vm13  ;;  %6783 = vmatprep.mubr.f32.mxu0 %v9571_v44  ;;  %v1163_v27 = vmul.f32 24.0, %v9539_v33  ;;  %v13568_v8 = vcvt.s32.f32 %v9479_v23  ;;  %v9595_v60 = vadd.s32 160, %v9085_v58  ;;  %vm715_vm13 = vcmp.ge.f32.partialorder %v470_v54, 0.0 }
 0x187   : > { %13567 = vst [vmem:[#allocation42_spill] sm:$0xff] %v9587_v48  ;;  %v770_v38 = vmul.f32 0.2, %v470_v54  ;;  %v1851_v13 = vrot.slane %v9587_v48, 1  ;;  %vm13569_vm11 = vcmp.le.f32.partialorder %v9350_v51, 16.0  ;;  %v13570_v20 = vmov 0 }
 0x188   : > { %v1001_v14 = vadd.f32 0.5, %v13568_v8  ;;  %vm9602_vm12 = vmand %vm9556_vm14, %vm13569_vm11  ;;  %v13573_v36 = vcvt.s32.f32 %v9492_v19  ;;  %v474_v28 = vpop.f32.mrb[16].mxu0  ;;  %vm13574_vm2 = vcmp.ge.f32.partialorder %v9394_v63, 1.0  ;;  %v13577_v51 = vcvt.s32.f32 %v9267_v39 }
 0x189   : > { %v13571_v20 = vsel %vm9602_vm12, 4294967295, %v13570_v20  ;;  %vm9612_vm9 = vmand %vm9577_vm1, %vm13574_vm2  ;;  %v13578_v48 = vcvt.s32.f32 %v9300_v55  ;;  %v1055_v7 = vmul.f32 0.041666668, %v1000_v10  ;;  %v9625_v56 = vsel %vm715_vm13, %v470_v54, %v770_v38  ;;  %v6606_v42 = vpop.f32.mrb[17].mxu0 }
 0x18a   : > { %13572 = vst [vmem:[#allocation43_spill] sm:$0xff] %v13571_v20  ;;  %v1002_v32 = vadd.f32 0.5, %v13573_v36  ;;  %v9619_v3 = vsub.f32 %v13577_v51, %v1161_v47  ;;  %v1054_v36 = vmul.f32 0.041666668, %v999_v50  ;;  %13579 = vst [vmem:[#allocation44_spill] sm:$0xff] %v9625_v56  ;;  %v475_v40 = vadd.f32 %v9174_v61, %v474_v28 }
 0x18b   : > { %v9623_v34 = vsub.f32 %v13578_v48, %v1162_v53  ;;  %vm13580_vm14 = vcmask 1046528   ;;  %vm13582_vm1 = vcmp.le.f32.partialorder %v9314_v5, 16.0  ;;  %vm13583_vm2 = vcmp.ge.f32.partialorder %v9314_v5, 1.0  ;;  %v479_v38 = vpop.f32.mrb[18].mxu0 }
 0x18c   : > { %v9629_v49 = vsel %vm13580_vm14, %v1849_v22, %v1851_v13  ;;  %vm9635_vm11 = vmand %vm13583_vm2, %vm13582_vm1  ;;  %v13586_v55 = vcvt.s32.f32 %v9525_v17  ;;  %v9646_v28 = vsel %vm9602_vm12, %v9625_v56, 0.0  ;;  %v13588_v5 = vcvt.s32.f32 %v9326_v9  ;;  %v6609_v39 = vpop.f32.mrb[19].mxu0  ;;  %v1758_v56 = vld [vmem:[#allocation7 + $0x8] sm:$0xff] }
 0x18d   : > { %13581 = vst [vmem:[#allocation45_spill] sm:$0xff] %v9629_v49  ;;  %6784 = vmatmul.mubr.f32.gmra.mrb[114].mxu0 %v9629_v49  ;;  %13587 = vst [vmem:[#allocation46_spill] sm:$0xff] %v9646_v28  ;;  %v1056_v22 = vmul.f32 0.041666668, %v1001_v14  ;;  %v13037_v47 = vcvt.s32.f32 %v9595_v60  ;;  %vm716_vm1 = vcmp.ge.f32.partialorder %v475_v40, 0.0  ;;  %v1853_v50 = vrot.slane %v9646_v28, 1 }
 0x18e   : > { %v1003_v10 = vadd.f32 0.5, %v13586_v55  ;;  %v9652_v42 = vsub.f32 %v13588_v5, %v1163_v27  ;;  %v771_v53 = vmul.f32 0.2, %v475_v40  ;;  %vm9660_vm2 = vmand %vm9612_vm9, %vm1600_vm8  ;;  %v13589_v54 = vmov 0  ;;  %v1768_v49 = vld [vmem:[#allocation7 + $0x58] sm:$0xff] }
 0x18f   : > { %v13590_v54 = vsel %vm9660_vm2, 4294967295, %v13589_v54  ;;  %v1057_v48 = vmul.f32 0.041666668, %v1002_v32  ;;  %vm13592_vm13 = vcmp.ge.f32.partialorder %v9434_v37, 1.0  ;;  %v9673_v27 = vfloor.f32 %v1054_v36  ;;  %v484_v39 = vpop.f32.mrb[20].mxu0 }
 0x190   : > { %13591 = vst [vmem:[#allocation47_spill] sm:$0xff] %v13590_v54  ;;  %vm9668_vm14 = vmand %vm9635_vm11, %vm13592_vm13  ;;  %v9675_v63 = vfloor.f32 %v1055_v7  ;;  %v9678_v14 = vadd.s32 168, %v9085_v58  ;;  %v9681_v32 = vadd.s32 176, %v9085_v58  ;;  %v9683_v8 = vsel %vm716_vm1, %v475_v40, %v771_v53  ;;  %v6612_v24 = vpop.f32.mrb[21].mxu0  ;;  %v1757_v54 = vld [vmem:[#allocation7] sm:$0xff] }
 0x191   : > { %13595 = vst [vmem:[#allocation48_spill] sm:$0xff] %v9683_v8  ;;  %v480_v51 = vadd.f32 %v9174_v61, %v479_v38  ;;  %vm13596_vm8 = vcmask 1046528   ;;  %vm13598_vm9 = vcmp.le.f32.partialorder %v9363_v30, 16.0  ;;  %vm13599_vm11 = vcmp.ge.f32.partialorder %v9363_v30, 1.0 }
 0x192   : > { %v9687_v55 = vsel %vm13596_vm8, %v1851_v13, %v1853_v50  ;;  %vm9693_vm13 = vmand %vm13599_vm11, %vm13598_vm9  ;;  %v1058_v36 = vmul.f32 0.041666668, %v1003_v10  ;;  %v9702_v40 = vsel %vm9660_vm2, %v9683_v8, 0.0  ;;  %v9706_v13 = vfloor.f32 %v1056_v22 }
 0x193   : > { %13597 = vst [vmem:[#allocation49_spill] sm:$0xff] %v9687_v55  ;;  %6786 = vmatprep.mubr.f32.mxu0 %v9687_v55  ;;  %13602 = vst [vmem:[#allocation50_spill] sm:$0xff] %v9702_v40  ;;  %v1004_v30 = vadd.f32 0.5, %v13037_v47  ;;  %v9711_v5 = vadd.s32 184, %v9085_v58  ;;  %vm717_vm9 = vcmp.ge.f32.partialorder %v480_v51, 0.0  ;;  %v1855_v53 = vrot.slane %v9702_v40, 1 }
 0x194   : > { %v772_v10 = vmul.f32 0.2, %v480_v51  ;;  %vm13603_vm11 = vcmp.le.f32.partialorder %v9434_v37, 16.0  ;;  %v13604_v38 = vmov 0  ;;  %v9722_v22 = vfloor.f32 %v1057_v48 }
 0x195   : > { %vm9718_vm15 = vmand %vm9668_vm14, %vm13603_vm11  ;;  %vm13607_vm1 = vcmp.ge.f32.partialorder %v9468_v11, 1.0  ;;  %v1164_v37 = vmul.f32 24.0, %v9673_v27  ;;  %v1165_v9 = vmul.f32 24.0, %v9675_v63  ;;  %v485_v6 = vadd.f32 %v9174_v61, %v484_v39 }
 0x196   : > { %v13605_v38 = vsel %vm9718_vm15, 4294967295, %v13604_v38  ;;  %vm9728_vm8 = vmand %vm9693_vm13, %vm13607_vm1  ;;  %v9737_v28 = vsel %vm717_vm9, %v480_v51, %v772_v10  ;;  %vm13611_vm14 = vcmask 1046528   ;;  %vm13613_vm13 = vcmp.le.f32.partialorder %v9419_v16, 16.0 }
 0x197   : > { %13606 = vst [vmem:[#allocation51_spill] sm:$0xff] %v13605_v38  ;;  %13610 = vst [vmem:[#allocation52_spill] sm:$0xff] %v9737_v28  ;;  %v9741_v7 = vsel %vm13611_vm14, %v1853_v50, %v1855_v53  ;;  %vm13614_vm1 = vcmp.ge.f32.partialorder %v9419_v16, 1.0  ;;  %v9752_v40 = vfloor.f32 %v1058_v36  ;;  %v9758_v24 = vsel %vm9718_vm15, %v9737_v28, 0.0  ;;  %v489_v38 = vpop.f32.mrb[22].mxu0 }
 0x198   : > { %13612 = vst [vmem:[#allocation53_spill] sm:$0xff] %v9741_v7  ;;  %vm9747_vm11 = vmand %vm13614_vm1, %vm13613_vm13  ;;  %6787 = vmatmul.mubr.f32.gmra.mrb[116].mxu0 %v9741_v7  ;;  %v1166_v16 = vmul.f32 24.0, %v9706_v13  ;;  %v1059_v50 = vmul.f32 0.041666668, %v1004_v30  ;;  %vm718_vm13 = vcmp.ge.f32.partialorder %v485_v6, 0.0  ;;  %v1857_v36 = vrot.slane %v9758_v24, 1 }
 0x199   : > { %13617 = vst [vmem:[#allocation54_spill] sm:$0xff] %v9758_v24  ;;  %v773_v10 = vmul.f32 0.2, %v485_v6  ;;  %vm13618_vm1 = vcmp.le.f32.partialorder %v9468_v11, 16.0  ;;  %v13619_v39 = vmov 0  ;;  %v1167_v48 = vmul.f32 24.0, %v9722_v22 }
 0x19a   : > { %vm9769_vm2 = vmand %vm9728_vm8, %vm13618_vm1  ;;  %vm13622_vm9 = vcmp.ge.f32.partialorder %v9537_v25, 1.0  ;;  %v13625_v11 = vcvt.s32.f32 %v9446_v0  ;;  %v13626_v51 = vcvt.s32.f32 %v9678_v14  ;;  %v13627_v28 = vcvt.s32.f32 %v9681_v32  ;;  %v6615_v52 = vpop.f32.mrb[23].mxu0 }
 0x19b   : > { %v13620_v39 = vsel %vm9769_vm2, 4294967295, %v13619_v39  ;;  %vm9778_vm14 = vmand %vm9747_vm11, %vm13622_vm9  ;;  %v9792_v20 = vadd.s32 192, %v9085_v58  ;;  %v9794_v7 = vsel %vm718_vm13, %v485_v6, %v773_v10  ;;  %v490_v21 = vadd.f32 %v9174_v61, %v489_v38 }
 0x19c   : > { %13621 = vst [vmem:[#allocation55_spill] sm:$0xff] %v13620_v39  ;;  %v9785_v47 = vsub.f32 %v13625_v11, %v1164_v37  ;;  %v1005_v24 = vadd.f32 0.5, %v13626_v51  ;;  %v1006_v8 = vadd.f32 0.5, %v13627_v28  ;;  %13628 = vst [vmem:[#allocation56_spill] sm:$0xff] %v9794_v7  ;;  %vm13629_vm8 = vcmask 1046528  }
 0x19d   : > { %v9798_v0 = vsel %vm13629_vm8, %v1855_v53, %v1857_v36  ;;  %vm13631_vm11 = vcmp.le.f32.partialorder %v9503_v15, 16.0  ;;  %vm13632_vm9 = vcmp.ge.f32.partialorder %v9503_v15, 1.0  ;;  %v1168_v28 = vmul.f32 24.0, %v9752_v40 }
 0x19e   : > { %13630 = vst [vmem:[#allocation57_spill] sm:$0xff] %v9798_v0  ;;  %vm9804_vm1 = vmand %vm13632_vm9, %vm13631_vm11  ;;  %6789 = vmatprep.mubr.f32.mxu0 %v9798_v0  ;;  %v9814_v52 = vsel %vm9769_vm2, %v9794_v7, 0.0  ;;  %v9818_v6 = vfloor.f32 %v1059_v50  ;;  %v13636_v15 = vcvt.s32.f32 %v9711_v5  ;;  %v7737_v38 = vpack.c.bf16 %v1758_v56, %v1757_v54  ;;  %v1759_v7 = vld [vmem:[#allocation7 + $0x10] sm:$0xff]  ;;  %v1760_v0 = vld [vmem:[#allocation7 + $0x18] sm:$0xff] }
 0x19f   : > { %13635 = vst [vmem:[#allocation58_spill] sm:$0xff] %v9814_v52  ;;  %vm719_vm11 = vcmp.ge.f32.partialorder %v490_v21, 0.0  ;;  %v774_v51 = vmul.f32 0.2, %v490_v21  ;;  %v1859_v10 = vrot.slane %v9814_v52, 1  ;;  %vm13637_vm9 = vcmp.le.f32.partialorder %v9537_v25, 16.0 }
 0x1a0   : > { %v1007_v53 = vadd.f32 0.5, %v13636_v15  ;;  %vm9827_vm15 = vmand %vm9778_vm14, %vm13637_vm9  ;;  %v13638_v11 = vmov 0  ;;  %v13641_v39 = vcvt.s32.f32 %v9449_v45  ;;  %v494_v15 = vpop.f32.mrb[24].mxu0  ;;  %vm13642_vm13 = vcmp.ge.f32.partialorder %v9619_v3, 1.0  ;;  %7738 = vmatprep.subr.bf16.mxu0 %v7737_v38  ;;  %v1762_v56 = vld [vmem:[#allocation7 + $0x28] sm:$0xff] }
 0x1a1   : > { %v13639_v11 = vsel %vm9827_vm15, 4294967295, %v13638_v11  ;;  %vm9839_vm8 = vmand %vm9804_vm1, %vm13642_vm13  ;;  %v1060_v25 = vmul.f32 0.041666668, %v1005_v24  ;;  %v1061_v30 = vmul.f32 0.041666668, %v1006_v8  ;;  %v13080_v54 = vcvt.s32.f32 %v9792_v20  ;;  %v6618_v55 = vpop.f32.mrb[25].mxu0  ;;  %7740 = vmatpush3.bf16.msra.mxu0 %v7737_v38 }
 0x1a2   : > { %13640 = vst [vmem:[#allocation59_spill] sm:$0xff] %v13639_v11  ;;  %v9833_v50 = vsub.f32 %v13641_v39, %v1165_v9  ;;  %v7741_v45 = vpack.c.bf16 %v1760_v0, %v1759_v7  ;;  %v9845_v9 = vsel %vm719_vm11, %v490_v21, %v774_v51  ;;  %v495_v39 = vadd.f32 %v9174_v61, %v494_v15  ;;  %v1761_v15 = vld [vmem:[#allocation7 + $0x20] sm:$0xff] }
 0x1a3   : > { %13645 = vst [vmem:[#allocation60_spill] sm:$0xff] %v9845_v9  ;;  %vm13646_vm9 = vcmask 1046528   ;;  %vm13648_vm1 = vcmp.le.f32.partialorder %v9505_v62, 16.0  ;;  %vm13649_vm13 = vcmp.ge.f32.partialorder %v9505_v62, 1.0  ;;  %v13652_v8 = vcvt.s32.f32 %v9479_v23 }
 0x1a4   : > { %v9849_v43 = vsel %vm13646_vm9, %v1857_v36, %v1859_v10  ;;  %vm9855_vm2 = vmand %vm13649_vm13, %vm13648_vm1  ;;  %v9868_v55 = vsel %vm9827_vm15, %v9845_v9, 0.0  ;;  %v13653_v62 = vcvt.s32.f32 %v9492_v19  ;;  %v13654_v23 = vcvt.s32.f32 %v9525_v17  ;;  %7742 = vmatprep.subr.bf16.mxu0 %v7741_v45 }
 0x1a5   : > { %13647 = vst [vmem:[#allocation61_spill] sm:$0xff] %v9849_v43  ;;  %v9862_v21 = vsub.f32 %v13652_v8, %v1166_v16  ;;  %6790 = vmatmul.mubr.f32.gmra.mrb[118].mxu0 %v9849_v43  ;;  %v1169_v16 = vmul.f32 24.0, %v9818_v6  ;;  %vm720_vm1 = vcmp.ge.f32.partialorder %v495_v39, 0.0  ;;  %v775_v36 = vmul.f32 0.2, %v495_v39 }
 0x1a6   : > { %v9874_v7 = vsub.f32 %v13653_v62, %v1167_v48  ;;  %v9878_v24 = vsub.f32 %v13654_v23, %v1168_v28  ;;  %v1861_v0 = vrot.slane %v9868_v55, 1  ;;  %vm13655_vm13 = vcmp.le.f32.partialorder %v9619_v3, 16.0  ;;  %v499_v48 = vpop.f32.mrb[26].mxu0  ;;  %7744 = vmatpush3.bf16.msra.mxu0 %v7741_v45 }
 0x1a7   : > { %vm9886_vm11 = vmand %vm9839_vm8, %vm13655_vm13  ;;  %v13656_v38 = vmov 0  ;;  %v1062_v19 = vmul.f32 0.041666668, %v1007_v53  ;;  %vm13659_vm9 = vcmp.ge.f32.partialorder %v9623_v34, 1.0  ;;  %v9899_v28 = vfloor.f32 %v1060_v25  ;;  %v6621_v62 = vpop.f32.mrb[27].mxu0 }
 0x1a8   : > { %v13657_v38 = vsel %vm9886_vm11, 4294967295, %v13656_v38  ;;  %vm9894_vm14 = vmand %vm9855_vm2, %vm13659_vm9  ;;  %v9901_v3 = vfloor.f32 %v1061_v30  ;;  %v1008_v51 = vadd.f32 0.5, %v13080_v54  ;;  %v9906_v53 = vadd.s32 200, %v9085_v58  ;;  %v1763_v54 = vld [vmem:[#allocation7 + $0x30] sm:$0xff] }
 0x1a9   : > { %13658 = vst [vmem:[#allocation62_spill] sm:$0xff] %v13657_v38  ;;  %v9908_v8 = vsel %vm720_vm1, %v495_v39, %v775_v36  ;;  %v500_v37 = vadd.f32 %v9174_v61, %v499_v48  ;;  %vm13663_vm2 = vcmask 1046528   ;;  %vm13665_vm8 = vcmp.le.f32.partialorder %v9539_v33, 16.0  ;;  %v1764_v38 = vld [vmem:[#allocation7 + $0x38] sm:$0xff] }
 0x1aa   : > { %13662 = vst [vmem:[#allocation63_spill] sm:$0xff] %v9908_v8  ;;  %v9912_v23 = vsel %vm13663_vm2, %v1859_v10, %v1861_v0  ;;  %vm13666_vm9 = vcmp.ge.f32.partialorder %v9539_v33, 1.0  ;;  %v7745_v30 = vpack.c.bf16 %v1762_v56, %v1761_v15  ;;  %v9927_v39 = vsel %vm9886_vm11, %v9908_v8, 0.0  ;;  %v504_v8 = vpop.f32.mrb[28].mxu0 }
 0x1ab   : > { %13664 = vst [vmem:[#allocation64_spill] sm:$0xff] %v9912_v23  ;;  %vm9918_vm13 = vmand %vm13666_vm9, %vm13665_vm8  ;;  %6792 = vmatprep.mubr.f32.mxu0 %v9912_v23  ;;  %v9932_v33 = vadd.s32 208, %v9085_v58  ;;  %v9935_v10 = vadd.s32 216, %v9085_v58  ;;  %v9938_v45 = vadd.s32 224, %v9085_v58  ;;  %vm721_vm8 = vcmp.ge.f32.partialorder %v500_v37, 0.0  ;;  %v6624_v23 = vpop.f32.mrb[29].mxu0 }
 0x1ac   : > { %v776_v36 = vmul.f32 0.2, %v500_v37  ;;  %v1863_v48 = vrot.slane %v9927_v39, 1  ;;  %vm13669_vm9 = vcmp.le.f32.partialorder %v9623_v34, 16.0  ;;  %v13670_v15 = vmov 0  ;;  %7746 = vmatprep.subr.bf16.mxu0 %v7745_v30 }
 0x1ad   : > { %vm9945_vm1 = vmand %vm9894_vm14, %vm13669_vm9  ;;  %v13673_v56 = vcvt.s32.f32 %v9595_v60  ;;  %vm13674_vm2 = vcmp.ge.f32.partialorder %v9652_v42, 1.0  ;;  %v1170_v17 = vmul.f32 24.0, %v9899_v28  ;;  %v1063_v11 = vmul.f32 0.041666668, %v1008_v51  ;;  %7748 = vmatpush3.bf16.msra.mxu0 %v7745_v30  ;;  %v509_v30 = vpop.f32.mrb[30].mxu0 }
 0x1ae   : > { %v13671_v15 = vsel %vm9945_vm1, 4294967295, %v13670_v15  ;;  %vm9957_vm15 = vmand %vm9918_vm13, %vm13674_vm2  ;;  %v13103_v60 = vcvt.s32.f32 %v9906_v53  ;;  %v505_v9 = vadd.f32 %v9174_v61, %v504_v8  ;;  %vm13678_vm9 = vcmask 1046528  }
 0x1af   : > { %13672 = vst [vmem:[#allocation65_spill] sm:$0xff] %v13671_v15  ;;  %v9951_v62 = vsub.f32 %v13673_v56, %v1169_v16  ;;  %v7749_v16 = vpack.c.bf16 %v1764_v38, %v1763_v54  ;;  %v9964_v56 = vsel %vm721_vm8, %v500_v37, %v776_v36  ;;  %v9968_v43 = vsel %vm13678_vm9, %v1861_v0, %v1863_v48 }
 0x1b0   : > { %13677 = vst [vmem:[#allocation66_spill] sm:$0xff] %v9964_v56  ;;  %13679 = vst [vmem:[#allocation67_spill] sm:$0xff] %v9968_v43  ;;  %vm13680_vm13 = vcmp.le.f32.partialorder %v9673_v27, 16.0  ;;  %vm13681_vm2 = vcmp.ge.f32.partialorder %v9673_v27, 1.0  ;;  %v1171_v54 = vmul.f32 24.0, %v9901_v3  ;;  %6793 = vmatmul.mubr.f32.gmra.mrb[120].mxu0 %v9968_v43  ;;  %v9984_v0 = vsel %vm9945_vm1, %v9964_v56, 0.0 }
 0x1b1   : > { %vm9974_vm11 = vmand %vm13681_vm2, %vm13680_vm13  ;;  %v9988_v27 = vfloor.f32 %v1062_v19  ;;  %7750 = vmatprep.subr.bf16.mxu0 %v7749_v16  ;;  %vm722_vm13 = vcmp.ge.f32.partialorder %v505_v9, 0.0  ;;  %v777_v8 = vmul.f32 0.2, %v505_v9  ;;  %v1865_v37 = vrot.slane %v9984_v0, 1  ;;  %v6627_v56 = vpop.f32.mrb[31].mxu0 }
 0x1b2   : > { %vm13684_vm2 = vcmp.le.f32.partialorder %v9652_v42, 16.0  ;;  %v13685_v23 = vmov 0  ;;  %vm13688_vm8 = vcmp.ge.f32.partialorder %v9785_v47, 1.0  ;;  %v13691_v42 = vcvt.s32.f32 %v9678_v14  ;;  %7752 = vmatpush3.bf16.msra.mxu0 %v7749_v16  ;;  %v1766_v56 = vld [vmem:[#allocation7 + $0x48] sm:$0xff] }
 0x1b3   : > { %vm9997_vm14 = vmand %vm9957_vm15, %vm13684_vm2  ;;  %v10015_v51 = vfloor.f32 %v1063_v11  ;;  %v1009_v19 = vadd.f32 0.5, %v13103_v60  ;;  %v10020_v38 = vadd.s32 232, %v9085_v58  ;;  %v10022_v15 = vsel %vm722_vm13, %v505_v9, %v777_v8 }
 0x1b4   : > { %v13686_v23 = vsel %vm9997_vm14, 4294967295, %v13685_v23  ;;  %vm10006_vm9 = vmand %vm9974_vm11, %vm13688_vm8  ;;  %v10013_v34 = vsub.f32 %v13691_v42, %v1170_v17  ;;  %13692 = vst [vmem:[#allocation69_spill] sm:$0xff] %v10022_v15  ;;  %v510_v25 = vadd.f32 %v9174_v61, %v509_v30  ;;  %vm13693_vm15 = vcmask 1046528   ;;  %v1765_v17 = vld [vmem:[#allocation7 + $0x40] sm:$0xff] }
 0x1b5   : > { %13687 = vst [vmem:[#allocation68_spill] sm:$0xff] %v13686_v23  ;;  %v10026_v43 = vsel %vm13693_vm15, %v1863_v48, %v1865_v37  ;;  %vm13695_vm11 = vcmp.le.f32.partialorder %v9675_v63, 16.0  ;;  %vm13696_vm8 = vcmp.ge.f32.partialorder %v9675_v63, 1.0  ;;  %v13699_v11 = vcvt.s32.f32 %v9681_v32 }
 0x1b6   : > { %13694 = vst [vmem:[#allocation70_spill] sm:$0xff] %v10026_v43  ;;  %vm10032_vm2 = vmand %vm13696_vm8, %vm13695_vm11  ;;  %6795 = vmatprep.mubr.f32.mxu0 %v10026_v43  ;;  %v10045_v48 = vsel %vm9997_vm14, %v10022_v15, 0.0  ;;  %v1172_v63 = vmul.f32 24.0, %v9988_v27  ;;  %v13700_v32 = vcvt.s32.f32 %v9932_v33  ;;  %v13701_v16 = vcvt.s32.f32 %v9935_v10  ;;  %v1767_v15 = vld [vmem:[#allocation7 + $0x50] sm:$0xff] }
 0x1b7   : > { %v10039_v9 = vsub.f32 %v13699_v11, %v1171_v54  ;;  %vm723_vm11 = vcmp.ge.f32.partialorder %v510_v25, 0.0  ;;  %v778_v30 = vmul.f32 0.2, %v510_v25  ;;  %v1867_v42 = vrot.slane %v10045_v48, 1 }
 0x1b8   : > { %v1010_v54 = vadd.f32 0.5, %v13700_v32  ;;  %v1011_v8 = vadd.f32 0.5, %v13701_v16  ;;  %vm13702_vm8 = vcmp.le.f32.partialorder %v9785_v47, 16.0  ;;  %v13703_v11 = vmov 0  ;;  %v514_v32 = vpop.f32.mrb[32].mxu0 }
 0x1b9   : > { %vm10059_vm1 = vmand %vm10006_vm9, %vm13702_vm8  ;;  %v13706_v60 = vcvt.s32.f32 %v9938_v45  ;;  %vm13707_vm13 = vcmp.ge.f32.partialorder %v9833_v50, 1.0  ;;  %v1173_v47 = vmul.f32 24.0, %v10015_v51  ;;  %v1064_v36 = vmul.f32 0.041666668, %v1009_v19  ;;  %v6630_v18 = vpop.f32.mrb[33].mxu0 }
 0x1ba   : > { %v13704_v11 = vsel %vm10059_vm1, 4294967295, %v13703_v11  ;;  %vm10069_vm15 = vmand %vm10032_vm2, %vm13707_vm13  ;;  %v13122_v43 = vcvt.s32.f32 %v10020_v38  ;;  %v7753_v26 = vpack.c.bf16 %v1766_v56, %v1765_v17  ;;  %v515_v35 = vadd.f32 %v9174_v61, %v514_v32 }
 0x1bb   : > { %13705 = vst [vmem:[#allocation71_spill] sm:$0xff] %v13704_v11  ;;  %v1012_v23 = vadd.f32 0.5, %v13706_v60  ;;  %v10076_v60 = vsel %vm723_vm11, %v510_v25, %v778_v30  ;;  %vm13711_vm9 = vcmask 1046528   ;;  %vm13713_vm2 = vcmp.le.f32.partialorder %v9706_v13, 16.0 }
 0x1bc   : > { %13710 = vst [vmem:[#allocation72_spill] sm:$0xff] %v10076_v60  ;;  %v10080_v14 = vsel %vm13711_vm9, %v1865_v37, %v1867_v42  ;;  %vm13714_vm13 = vcmp.ge.f32.partialorder %v9706_v13, 1.0  ;;  %v7757_v19 = vpack.c.bf16 %v1768_v49, %v1767_v15  ;;  %v10095_v18 = vsel %vm10059_vm1, %v10076_v60, 0.0  ;;  %7754 = vmatprep.subr.bf16.mxu0 %v7753_v26 }
 0x1bd   : > { %13712 = vst [vmem:[#allocation73_spill] sm:$0xff] %v10080_v14  ;;  %vm10086_vm8 = vmand %vm13714_vm13, %vm13713_vm2  ;;  %6796 = vmatmul.mubr.f32.gmra.mrb[122].mxu0 %v10080_v14  ;;  %v13717_v13 = vcvt.s32.f32 %v9711_v5  ;;  %v1065_v25 = vmul.f32 0.041666668, %v1010_v54  ;;  %v1066_v17 = vmul.f32 0.041666668, %v1011_v8  ;;  %vm724_vm2 = vcmp.ge.f32.partialorder %v515_v35, 0.0 }
 0x1be   : > { %v779_v49 = vmul.f32 0.2, %v515_v35  ;;  %v1869_v15 = vrot.slane %v10095_v18, 1  ;;  %vm13718_vm13 = vcmp.le.f32.partialorder %v9833_v50, 16.0  ;;  %v13719_v56 = vmov 0  ;;  %7756 = vmatpush3.bf16.msra.mxu0 %v7753_v26  ;;  %v519_v5 = vpop.f32.mrb[34].mxu0 }
 0x1bf   : > { %v10101_v37 = vsub.f32 %v13717_v13, %v1172_v63  ;;  %vm10108_vm14 = vmand %vm10069_vm15, %vm13718_vm13  ;;  %v1067_v30 = vmul.f32 0.041666668, %v1012_v23  ;;  %vm13722_vm11 = vcmp.ge.f32.partialorder %v9862_v21, 1.0  ;;  %v13725_v50 = vcvt.s32.f32 %v9792_v20  ;;  %7758 = vmatprep.subr.bf16.mxu0 %v7757_v19  ;;  %v6633_v16 = vpop.f32.mrb[35].mxu0  ;;  %v10247_v20 = vld [vmem:[%s13003_s2] ss:$0 sm:$0xff] }
 0x1c0   : > { %v13720_v56 = vsel %vm10108_vm14, 4294967295, %v13719_v56  ;;  %vm10116_vm9 = vmand %vm10086_vm8, %vm13722_vm11  ;;  %v1013_v8 = vadd.f32 0.5, %v13122_v43  ;;  %v10128_v26 = vadd.s32 240, %v9085_v58  ;;  %v10131_v23 = vadd.s32 248, %v9085_v58 }
 0x1c1   : > { %13721 = vst [vmem:[#allocation74_spill] sm:$0xff] %v13720_v56  ;;  %v10123_v54 = vsub.f32 %v13725_v50, %v1173_v47  ;;  %v10133_v44 = vsel %vm724_vm2, %v515_v35, %v779_v49  ;;  %v520_v32 = vadd.f32 %v9174_v61, %v519_v5  ;;  %vm13727_vm15 = vcmask 1046528   ;;  %v1769_v35 = vld [vmem:[#allocation7 + $0x60] sm:$0xff]  ;;  %v1770_v49 = vld [vmem:[#allocation7 + $0x68] sm:$0xff] }
 0x1c2   : > { %13726 = vst [vmem:[#allocation75_spill] sm:$0xff] %v10133_v44  ;;  %v10137_v13 = vsel %vm13727_vm15, %v1867_v42, %v1869_v15  ;;  %vm13729_vm8 = vcmp.le.f32.partialorder %v9722_v22, 16.0  ;;  %vm13730_vm11 = vcmp.ge.f32.partialorder %v9722_v22, 1.0  ;;  %v10148_v47 = vfloor.f32 %v1064_v36  ;;  %7760 = vmatpush3.bf16.msra.mxu0 %v7757_v19 }
 0x1c3   : > { %13728 = vst [vmem:[#allocation76_spill] sm:$0xff] %v10137_v13  ;;  %vm10143_vm13 = vmand %vm13730_vm11, %vm13729_vm8  ;;  %6798 = vmatprep.mubr.f32.mxu0 %v10137_v13  ;;  %v10154_v42 = vsel %vm10108_vm14, %v10133_v44, 0.0  ;;  %v10158_v22 = vfloor.f32 %v1065_v25  ;;  %v10160_v5 = vfloor.f32 %v1066_v17  ;;  %v10163_v36 = vadd.s32 256, %v9085_v58  ;;  %v524_v25 = vpop.f32.mrb[36].mxu0 }
 0x1c4   : > { %vm725_vm8 = vcmp.ge.f32.partialorder %v520_v32, 0.0  ;;  %v780_v50 = vmul.f32 0.2, %v520_v32  ;;  %v1871_v16 = vrot.slane %v10154_v42, 1  ;;  %vm13733_vm11 = vcmp.le.f32.partialorder %v9862_v21, 16.0  ;;  %v6636_v60 = vpop.f32.mrb[37].mxu0 }
 0x1c5   : > { %vm10170_vm1 = vmand %vm10116_vm9, %vm13733_vm11  ;;  %v13734_v43 = vmov 0  ;;  %v10174_v56 = vfloor.f32 %v1067_v30  ;;  %vm13737_vm2 = vcmp.ge.f32.partialorder %v9874_v7, 1.0  ;;  %v1068_v21 = vmul.f32 0.041666668, %v1013_v8 }
 0x1c6   : > { %v13735_v43 = vsel %vm10170_vm1, 4294967295, %v13734_v43  ;;  %vm10180_vm15 = vmand %vm10143_vm13, %vm13737_vm2  ;;  %v13146_v63 = vcvt.s32.f32 %v10128_v26  ;;  %v13145_v44 = vcvt.s32.f32 %v10131_v23  ;;  %v7761_v11 = vpack.c.bf16 %v1770_v49, %v1769_v35 }
 0x1c7   : > { %13736 = vst [vmem:[#allocation77_spill] sm:$0xff] %v13735_v43  ;;  %v10187_v30 = vsel %vm725_vm8, %v520_v32, %v780_v50  ;;  %v525_v19 = vadd.f32 %v9174_v61, %v524_v25  ;;  %vm13741_vm9 = vcmask 1046528   ;;  %vm13743_vm13 = vcmp.le.f32.partialorder %v9752_v40, 16.0  ;;  %v529_v25 = vpop.f32.mrb[38].mxu0 }
 0x1c8   : > { %13740 = vst [vmem:[#allocation78_spill] sm:$0xff] %v10187_v30  ;;  %v10191_v13 = vsel %vm13741_vm9, %v1869_v15, %v1871_v16  ;;  %vm13744_vm2 = vcmp.ge.f32.partialorder %v9752_v40, 1.0  ;;  %v1174_v8 = vmul.f32 24.0, %v10148_v47  ;;  %v10207_v61 = vsel %vm10170_vm1, %v10187_v30, 0.0  ;;  %7762 = vmatprep.subr.bf16.mxu0 %v7761_v11 }
 0x1c9   : > { %13742 = vst [vmem:[#allocation79_spill] sm:$0xff] %v10191_v13  ;;  %vm10197_vm11 = vmand %vm13744_vm2, %vm13743_vm13  ;;  %6799 = vmatmul.mubr.f32.gmra.mrb[124].mxu0 %v10191_v13  ;;  %v1175_v40 = vmul.f32 24.0, %v10158_v22  ;;  %v1176_v60 = vmul.f32 24.0, %v10160_v5  ;;  %vm726_vm13 = vcmp.ge.f32.partialorder %v525_v19, 0.0  ;;  %v781_v32 = vmul.f32 0.2, %v525_v19 }
 0x1ca   : > { %v1873_v35 = vrot.slane %v10207_v61, 1  ;;  %vm13747_vm2 = vcmp.le.f32.partialorder %v9874_v7, 16.0  ;;  %v13748_v49 = vmov 0  ;;  %v1177_v50 = vmul.f32 24.0, %v10174_v56  ;;  %7764 = vmatpush3.bf16.msra.mxu0 %v7761_v11 }
 0x1cb   : > { %vm10219_vm14 = vmand %vm10180_vm15, %vm13747_vm2  ;;  %vm13751_vm8 = vcmp.ge.f32.partialorder %v9878_v24, 1.0  ;;  %v10233_v7 = vfloor.f32 %v1068_v21  ;;  %v1014_v17 = vadd.f32 0.5, %v13146_v63  ;;  %v1015_v43 = vadd.f32 0.5, %v13145_v44  ;;  %v6639_v21 = vpop.f32.mrb[39].mxu0 }
 0x1cc   : > { %v13749_v49 = vsel %vm10219_vm14, 4294967295, %v13748_v49  ;;  %vm10228_vm9 = vmand %vm10197_vm11, %vm13751_vm8  ;;  %v10240_v11 = vadd.s32 264, %v9085_v58  ;;  %v10242_v30 = vsel %vm726_vm13, %v525_v19, %v781_v32  ;;  %v530_v13 = vadd.f32 %v10247_v20, %v529_v25 }
 0x1cd   : > { %13750 = vst [vmem:[#allocation80_spill] sm:$0xff] %v13749_v49  ;;  %13754 = vst [vmem:[#allocation81_spill] sm:$0xff] %v10242_v30  ;;  %vm13755_vm15 = vcmask 1046528   ;;  %vm13757_vm11 = vcmp.le.f32.partialorder %v9818_v6, 16.0  ;;  %vm13758_vm8 = vcmp.ge.f32.partialorder %v9818_v6, 1.0  ;;  %v13761_v19 = vcvt.s32.f32 %v9906_v53 }
 0x1ce   : > { %v10251_v14 = vsel %vm13755_vm15, %v1871_v16, %v1873_v35  ;;  %vm10257_vm2 = vmand %vm13758_vm8, %vm13757_vm11  ;;  %v10270_v16 = vsel %vm10219_vm14, %v10242_v30, 0.0  ;;  %v13762_v6 = vcvt.s32.f32 %v9932_v33  ;;  %v13763_v21 = vcvt.s32.f32 %v9935_v10 }
 0x1cf   : > { %13756 = vst [vmem:[#allocation82_spill] sm:$0xff] %v10251_v14  ;;  %v10264_v32 = vsub.f32 %v13761_v19, %v1174_v8  ;;  %6801 = vmatprep.mubr.f32.mxu0 %v10251_v14  ;;  %v13764_v8 = vcvt.s32.f32 %v10163_v36  ;;  %vm727_vm8 = vcmp.ge.f32.partialorder %v530_v13, 0.0  ;;  %v782_v63 = vmul.f32 0.2, %v530_v13 }
 0x1d0   : > { %v10276_v25 = vsub.f32 %v13762_v6, %v1175_v40  ;;  %v10280_v53 = vsub.f32 %v13763_v21, %v1176_v60  ;;  %v1875_v49 = vrot.slane %v10270_v16, 1  ;;  %vm13765_vm13 = vcmp.le.f32.partialorder %v9878_v24, 16.0  ;;  %v1771_v40 = vld [vmem:[#allocation7 + $0x70] sm:$0xff]  ;;  %v1772_v60 = vld [vmem:[#allocation7 + $0x78] sm:$0xff]  ;;  %v534_v6 = vpop.f32.mrb[40].mxu0 }
 0x1d1   : > { %v1016_v19 = vadd.f32 0.5, %v13764_v8  ;;  %vm10289_vm15 = vmand %vm10228_vm9, %vm13765_vm13  ;;  %v13766_v30 = vmov 0  ;;  %v13769_v33 = vcvt.s32.f32 %v9938_v45  ;;  %vm13770_vm11 = vcmp.ge.f32.partialorder %v9951_v62, 1.0 }
 0x1d2   : > { %v13767_v30 = vsel %vm10289_vm15, 4294967295, %v13766_v30  ;;  %vm10301_vm1 = vmand %vm10257_vm2, %vm13770_vm11  ;;  %v1178_v24 = vmul.f32 24.0, %v10233_v7  ;;  %v1069_v15 = vmul.f32 0.041666668, %v1014_v17  ;;  %v1070_v8 = vmul.f32 0.041666668, %v1015_v43 }
 0x1d3   : > { %13768 = vst [vmem:[#allocation83_spill] sm:$0xff] %v13767_v30  ;;  %v10295_v10 = vsub.f32 %v13769_v33, %v1177_v50  ;;  %v535_v50 = vadd.f32 %v10247_v20, %v534_v6  ;;  %v6642_v33 = vpop.f32.mrb[41].mxu0  ;;  %vm13773_vm13 = vcmask 1046528   ;;  %v10313_v44 = vsel %vm727_vm8, %v530_v13, %v782_v63  ;;  %v3484_v17 = vld [vmem:[#allocation7 + $0x210] sm:$0xff]  ;;  %v3485_v6 = vld [vmem:[#allocation7 + $0x218] sm:$0xff] }
 0x1d4   : > { %v10310_v14 = vsel %vm13773_vm13, %v1873_v35, %v1875_v49  ;;  %13775 = vst [vmem:[#allocation85_spill] sm:$0xff] %v10313_v44  ;;  %vm13776_vm2 = vcmp.le.f32.partialorder %v9899_v28, 16.0  ;;  %vm13777_vm11 = vcmp.ge.f32.partialorder %v9899_v28, 1.0  ;;  %v10325_v43 = vadd.s32 272, %v9085_v58  ;;  %7113 = vmatprep.mubr.msk.f32.mxu1 %vm10289_vm15, %v10313_v44 }
 0x1d5   : > { %13774 = vst [vmem:[#allocation84_spill] sm:$0xff] %v10310_v14  ;;  %vm10319_vm9 = vmand %vm13777_vm11, %vm13776_vm2  ;;  %6802 = vmatmul.mubr.f32.gmra.mrb[126].mxu0 %v10310_v14  ;;  %v10334_v28 = vsel %vm10289_vm15, %v10313_v44, 0.0  ;;  %v10339_v13 = vadd.s32 280, %v9085_v58  ;;  %v10342_v63 = vadd.s32 288, %v9085_v58  ;;  %v7765_v35 = vpack.c.bf16 %v1772_v60, %v1771_v40  ;;  %v539_v14 = vpop.f32.mrb[42].mxu0 }
 0x1d6   : > { %v783_v33 = vmul.f32 0.2, %v535_v50  ;;  %v1877_v45 = vrot.slane %v10334_v28, 1  ;;  %vm13780_vm11 = vcmp.le.f32.partialorder %v9951_v62, 16.0  ;;  %v13781_v30 = vmov 0  ;;  %v6645_v46 = vpop.f32.mrb[43].mxu0 }
 0x1d7   : > { %vm10349_vm14 = vmand %vm10301_vm1, %vm13780_vm11  ;;  %v1071_v44 = vmul.f32 0.041666668, %v1016_v19  ;;  %vm13784_vm8 = vcmp.ge.f32.partialorder %v10013_v34, 1.0  ;;  %v13787_v62 = vcvt.s32.f32 %v10020_v38  ;;  %v10366_v21 = vfloor.f32 %v1069_v15  ;;  %7766 = vmatprep.subr.bf16.mxu0 %v7765_v35 }
 0x1d8   : > { %v13782_v30 = vsel %vm10349_vm14, 4294967295, %v13781_v30  ;;  %vm10357_vm13 = vmand %vm10319_vm9, %vm13784_vm8  ;;  %v13788_v2 = vcvt.s32.f32 %v10240_v11  ;;  %v7837_v4 = vpack.c.bf16 %v3485_v6, %v3484_v17  ;;  %v540_v12 = vadd.f32 %v10247_v20, %v539_v14  ;;  %v3486_v14 = vld [vmem:[#allocation7 + $0x220] sm:$0xff]  ;;  %7768 = vmatpush3.bf16.msra.mxu0 %v7765_v35 }
 0x1d9   : > { %13783 = vst [vmem:[#allocation86_spill] sm:$0xff] %v13782_v30  ;;  %v10364_v60 = vsub.f32 %v13787_v62, %v1178_v24  ;;  %vm13789_vm1 = vcmask 1046528   ;;  %vm13791_vm9 = vcmp.ge.f32.partialorder %v535_v50, 0.0  ;;  %vm13793_vm8 = vcmp.le.f32.partialorder %v9901_v3, 16.0  ;;  %v3487_v24 = vld [vmem:[#allocation7 + $0x228] sm:$0xff] }
 0x1da   : > { %v1017_v19 = vadd.f32 0.5, %v13788_v2  ;;  %v10372_v29 = vsel %vm13789_vm1, %v1875_v49, %v1877_v45  ;;  %v10375_v41 = vsel %vm13791_vm9, %v535_v50, %v783_v33  ;;  %vm13794_vm11 = vcmp.ge.f32.partialorder %v9901_v3, 1.0 }
 0x1db   : > { %13790 = vst [vmem:[#allocation87_spill] sm:$0xff] %v10372_v29  ;;  %13792 = vst [vmem:[#allocation88_spill] sm:$0xff] %v10375_v41  ;;  %v13173_v2 = vcvt.s32.f32 %v10325_v43  ;;  %6804 = vmatprep.mubr.f32.mxu0 %v10372_v29  ;;  %7114 = vmatmul.mubr.msk.f32.vlgmr.msra.gmra.mrb[0].mxu1 %vm10349_vm14, %v10375_v41  ;;  %v10394_v3 = vsel %vm10349_vm14, %v10375_v41, 0.0  ;;  %v10398_v49 = vfloor.f32 %v1070_v8  ;;  %v784_v17 = vmul.f32 0.2, %v540_v12  ;;  %v544_v8 = vpop.f32.mrb[44].mxu0 }
 0x1dc   : > { %vm10381_vm2 = vmand %vm13794_vm11, %vm13793_vm8  ;;  %v1879_v6 = vrot.slane %v10394_v3, 1  ;;  %vm13797_vm11 = vcmp.le.f32.partialorder %v10013_v34, 16.0  ;;  %v13798_v35 = vmov 0  ;;  %v10411_v33 = vfloor.f32 %v1071_v44  ;;  %7836 = vmatpush3.bf16.msra.mxu1 %v9451_v59  ;;  %v6648_v50 = vpop.f32.mrb[45].mxu0 }
 0x1dd   : > { %vm10407_vm15 = vmand %vm10357_vm13, %vm13797_vm11  ;;  %vm13801_vm1 = vcmp.ge.f32.partialorder %v10039_v9, 1.0  ;;  %v1179_v34 = vmul.f32 24.0, %v10366_v21  ;;  %v1072_v40 = vmul.f32 0.041666668, %v1017_v19  ;;  %7838 = vmatprep.subr.bf16.mxu1 %v7837_v4  ;;  %v10425_v44 = vadd.s32 296, %v9085_v58  ;;  %v3489_v50 = vld [vmem:[#allocation7 + $0x238] sm:$0xff] }
 0x1de   : > { %v13799_v35 = vsel %vm10407_vm15, 4294967295, %v13798_v35  ;;  %vm10418_vm9 = vmand %vm10381_vm2, %vm13801_vm1  ;;  %v7841_v46 = vpack.c.bf16 %v3487_v24, %v3486_v14  ;;  %v545_v59 = vadd.f32 %v10247_v20, %v544_v8  ;;  %vm13804_vm13 = vcmask 1046528   ;;  %v3488_v24 = vld [vmem:[#allocation7 + $0x230] sm:$0xff] }
 0x1df   : > { %13800 = vst [vmem:[#allocation89_spill] sm:$0xff] %v13799_v35  ;;  %v10429_v15 = vsel %vm13804_vm13, %v1877_v45, %v1879_v6  ;;  %vm13806_vm2 = vcmp.ge.f32.partialorder %v540_v12, 0.0  ;;  %vm13808_vm1 = vcmp.le.f32.partialorder %v9988_v27, 16.0  ;;  %vm13809_vm11 = vcmp.ge.f32.partialorder %v9988_v27, 1.0 }
 0x1e0   : > { %13805 = vst [vmem:[#allocation90_spill] sm:$0xff] %v10429_v15  ;;  %v10432_v38 = vsel %vm13806_vm2, %v540_v12, %v784_v17  ;;  %vm10438_vm8 = vmand %vm13809_vm11, %vm13808_vm1  ;;  %v1018_v14 = vadd.f32 0.5, %v13173_v2  ;;  %6805 = vmatmul.mubr.f32.gmra.mrb[128].mxu0 %v10429_v15  ;;  %v1180_v27 = vmul.f32 24.0, %v10398_v49  ;;  %v13812_v45 = vcvt.s32.f32 %v10339_v13  ;;  %7840 = vmatpush3.bf16.msra.mxu1 %v7837_v4  ;;  %v549_v15 = vpop.f32.mrb[46].mxu0 }
 0x1e1   : > { %13807 = vst [vmem:[#allocation91_spill] sm:$0xff] %v10432_v38  ;;  %7116 = vmatprep.mubr.msk.f32.mxu1 %vm10407_vm15, %v10432_v38  ;;  %v10452_v12 = vsel %vm10407_vm15, %v10432_v38, 0.0  ;;  %v13813_v8 = vcvt.s32.f32 %v10342_v63  ;;  %v785_v30 = vmul.f32 0.2, %v545_v59  ;;  %vm13814_vm11 = vcmp.le.f32.partialorder %v10039_v9, 16.0  ;;  %7842 = vmatprep.subr.bf16.mxu1 %v7841_v46  ;;  %v6651_v57 = vpop.f32.mrb[47].mxu0 }
 0x1e2   : > { %v1019_v17 = vadd.f32 0.5, %v13812_v45  ;;  %v1881_v41 = vrot.slane %v10452_v12, 1  ;;  %vm10466_vm14 = vmand %vm10418_vm9, %vm13814_vm11  ;;  %v13815_v35 = vmov 0  ;;  %v1181_v38 = vmul.f32 24.0, %v10411_v33 }
 0x1e3   : > { %v1020_v2 = vadd.f32 0.5, %v13813_v8  ;;  %v13816_v35 = vsel %vm10466_vm14, 4294967295, %v13815_v35  ;;  %vm13818_vm13 = vcmp.ge.f32.partialorder %v10101_v37, 1.0  ;;  %v10480_v9 = vfloor.f32 %v1072_v40 }
 0x1e4   : > { %13817 = vst [vmem:[#allocation92_spill] sm:$0xff] %v13816_v35  ;;  %vm10475_vm2 = vmand %vm10438_vm8, %vm13818_vm13  ;;  %v10484_v8 = vadd.s32 304, %v9085_v58  ;;  %v7845_v4 = vpack.c.bf16 %v3489_v50, %v3488_v24  ;;  %v550_v29 = vadd.f32 %v10247_v20, %v549_v15  ;;  %vm13822_vm9 = vcmask 1046528   ;;  %v3490_v50 = vld [vmem:[#allocation7 + $0x240] sm:$0xff]  ;;  %v3491_v15 = vld [vmem:[#allocation7 + $0x248] sm:$0xff]  ;;  %7844 = vmatpush3.bf16.msra.mxu1 %v7841_v46 }
 0x1e5   : > { %v10488_v19 = vsel %vm13822_vm9, %v1879_v6, %v1881_v41  ;;  %vm13824_vm8 = vcmp.ge.f32.partialorder %v545_v59, 0.0  ;;  %vm13826_vm13 = vcmp.le.f32.partialorder %v10015_v51, 16.0  ;;  %vm13827_vm11 = vcmp.ge.f32.partialorder %v10015_v51, 1.0 }
 0x1e6   : > { %13821 = vst [vmem:[#allocation93_spill] sm:$0xff] %v10484_v8  ;;  %13823 = vst [vmem:[#allocation94_spill] sm:$0xff] %v10488_v19  ;;  %v10491_v1 = vsel %vm13824_vm8, %v545_v59, %v785_v30  ;;  %v1073_v24 = vmul.f32 0.041666668, %v1018_v14  ;;  %6807 = vmatprep.mubr.f32.mxu0 %v10488_v19  ;;  %v13830_v51 = vcvt.s32.f32 %v10128_v26  ;;  %v1074_v6 = vmul.f32 0.041666668, %v1019_v17  ;;  %7846 = vmatprep.subr.bf16.mxu1 %v7845_v4 }
 0x1e7   : > { %13825 = vst [vmem:[#allocation95_spill] sm:$0xff] %v10491_v1  ;;  %vm10497_vm1 = vmand %vm13827_vm11, %vm13826_vm13  ;;  %7117 = vmatmul.mubr.msk.f32.gmra.mrb[2].mxu1 %vm10466_vm14, %v10491_v1  ;;  %v10509_v57 = vsel %vm10466_vm14, %v10491_v1, 0.0  ;;  %v1075_v59 = vmul.f32 0.041666668, %v1020_v2  ;;  %v786_v14 = vmul.f32 0.2, %v550_v29  ;;  %v13835_v1 = vcvt.s32.f32 %v10131_v23 }
 0x1e8   : > { %v10515_v30 = vsub.f32 %v13830_v51, %v1179_v34  ;;  %v1883_v62 = vrot.slane %v10509_v57, 1  ;;  %vm13831_vm11 = vcmp.le.f32.partialorder %v10101_v37, 16.0  ;;  %v13832_v35 = vmov 0  ;;  %v554_v26 = vpop.f32.mrb[48].mxu0  ;;  %7848 = vmatpush3.bf16.msra.mxu1 %v7845_v4 }
 0x1e9   : > { %vm10522_vm15 = vmand %vm10475_vm2, %vm13831_vm11  ;;  %v10528_v19 = vsub.f32 %v13835_v1, %v1180_v27  ;;  %vm13836_vm9 = vcmp.ge.f32.partialorder %v10123_v54, 1.0  ;;  %v13839_v37 = vcvt.s32.f32 %v10163_v36  ;;  %v13840_v23 = vcvt.s32.f32 %v10425_v44  ;;  %v6654_v45 = vpop.f32.mrb[49].mxu0 }
 0x1ea   : > { %v13833_v35 = vsel %vm10522_vm15, 4294967295, %v13832_v35  ;;  %vm10534_vm8 = vmand %vm10497_vm1, %vm13836_vm9  ;;  %v13206_v46 = vcvt.s32.f32 %v10484_v8  ;;  %v7849_v27 = vpack.c.bf16 %v3491_v15, %v3490_v50  ;;  %v555_v17 = vadd.f32 %v10247_v20, %v554_v26  ;;  %v3492_v50 = vld [vmem:[#allocation7 + $0x250] sm:$0xff]  ;;  %v3493_v15 = vld [vmem:[#allocation7 + $0x258] sm:$0xff] }
 0x1eb   : > { %13834 = vst [vmem:[#allocation96_spill] sm:$0xff] %v13833_v35  ;;  %v10541_v34 = vsub.f32 %v13839_v37, %v1181_v38  ;;  %v1021_v1 = vadd.f32 0.5, %v13840_v23  ;;  %vm13841_vm2 = vcmask 1046528   ;;  %vm13843_vm1 = vcmp.ge.f32.partialorder %v550_v29, 0.0 }
 0x1ec   : > { %v10548_v40 = vsel %vm13841_vm2, %v1881_v41, %v1883_v62  ;;  %v10551_v51 = vsel %vm13843_vm1, %v550_v29, %v786_v14  ;;  %vm13845_vm9 = vcmp.le.f32.partialorder %v10148_v47, 16.0  ;;  %vm13846_vm11 = vcmp.ge.f32.partialorder %v10148_v47, 1.0  ;;  %7850 = vmatprep.subr.bf16.mxu1 %v7849_v27 }
 0x1ed   : > { %13842 = vst [vmem:[#allocation97_spill] sm:$0xff] %v10548_v40  ;;  %13844 = vst [vmem:[#allocation98_spill] sm:$0xff] %v10551_v51  ;;  %v1182_v38 = vmul.f32 24.0, %v10480_v9  ;;  %6808 = vmatmul.mubr.f32.gmra.mrb[130].mxu0 %v10548_v40  ;;  %7119 = vmatprep.mubr.msk.f32.mxu1 %vm10522_vm15, %v10551_v51  ;;  %v10570_v41 = vsel %vm10522_vm15, %v10551_v51, 0.0  ;;  %v10574_v29 = vfloor.f32 %v1073_v24  ;;  %v10576_v47 = vfloor.f32 %v1074_v6  ;;  %v559_v24 = vpop.f32.mrb[50].mxu0 }
 0x1ee   : > { %vm10557_vm13 = vmand %vm13846_vm11, %vm13845_vm9  ;;  %v10578_v14 = vfloor.f32 %v1075_v59  ;;  %v787_v26 = vmul.f32 0.2, %v555_v17  ;;  %v1885_v37 = vrot.slane %v10570_v41, 1  ;;  %vm13849_vm11 = vcmp.le.f32.partialorder %v10123_v54, 16.0  ;;  %v6657_v51 = vpop.f32.mrb[51].mxu0  ;;  %7852 = vmatpush3.bf16.msra.mxu1 %v7849_v27 }
 0x1ef   : > { %vm10585_vm14 = vmand %vm10534_vm8, %vm13849_vm11  ;;  %v13850_v23 = vmov 0  ;;  %v10590_v45 = vadd.s32 312, %v9085_v58  ;;  %vm13853_vm2 = vcmp.ge.f32.partialorder %v10264_v32, 1.0  ;;  %v1076_v54 = vmul.f32 0.041666668, %v1021_v1  ;;  %v3494_v51 = vld [vmem:[#allocation7 + $0x260] sm:$0xff] }
 0x1f0   : > { %v13851_v23 = vsel %vm10585_vm14, 4294967295, %v13850_v23  ;;  %vm10596_vm1 = vmand %vm10557_vm13, %vm13853_vm2  ;;  %v1022_v59 = vadd.f32 0.5, %v13206_v46  ;;  %v10604_v2 = vadd.s32 320, %v9085_v58  ;;  %v7853_v4 = vpack.c.bf16 %v3493_v15, %v3492_v50 }
 0x1f1   : > { %13852 = vst [vmem:[#allocation99_spill] sm:$0xff] %v13851_v23  ;;  %v560_v35 = vadd.f32 %v10247_v20, %v559_v24  ;;  %vm13856_vm8 = vcmask 1046528   ;;  %vm13858_vm13 = vcmp.ge.f32.partialorder %v555_v17, 0.0  ;;  %vm13860_vm2 = vcmp.le.f32.partialorder %v10158_v22, 16.0  ;;  %v564_v23 = vpop.f32.mrb[52].mxu0 }
 0x1f2   : > { %v10608_v36 = vsel %vm13856_vm8, %v1883_v62, %v1885_v37  ;;  %v10611_v40 = vsel %vm13858_vm13, %v555_v17, %v787_v26  ;;  %vm13861_vm11 = vcmp.ge.f32.partialorder %v10158_v22, 1.0  ;;  %v13864_v50 = vcvt.s32.f32 %v10240_v11  ;;  %v3495_v62 = vld [vmem:[#allocation7 + $0x268] sm:$0xff]  ;;  %7854 = vmatprep.subr.bf16.mxu1 %v7853_v4  ;;  %v6660_v31 = vpop.f32.mrb[53].mxu0 }
 0x1f3   : > { %13857 = vst [vmem:[#allocation100_spill] sm:$0xff] %v10608_v36  ;;  %13859 = vst [vmem:[#allocation101_spill] sm:$0xff] %v10611_v40  ;;  %6810 = vmatprep.mubr.f32.mxu0 %v10608_v36  ;;  %7120 = vmatmul.mubr.msk.f32.gmra.mrb[4].mxu1 %vm10585_vm14, %v10611_v40  ;;  %v10633_v22 = vsel %vm10585_vm14, %v10611_v40, 0.0  ;;  %v1183_v11 = vmul.f32 24.0, %v10574_v29  ;;  %v1184_v17 = vmul.f32 24.0, %v10576_v47  ;;  %vm13869_vm13 = vcmp.ge.f32.partialorder %v10276_v25, 1.0 }
 0x1f4   : > { %vm10617_vm9 = vmand %vm13861_vm11, %vm13860_vm2  ;;  %v10624_v15 = vsub.f32 %v13864_v50, %v1182_v38  ;;  %v1185_v38 = vmul.f32 24.0, %v10578_v14  ;;  %v788_v26 = vmul.f32 0.2, %v560_v35  ;;  %v1887_v24 = vrot.slane %v10633_v22, 1  ;;  %v3496_v31 = vld [vmem:[#allocation7 + $0x270] sm:$0xff]  ;;  %7856 = vmatpush3.bf16.msra.mxu1 %v7853_v4 }
 0x1f5   : > { %vm13865_vm11 = vcmp.le.f32.partialorder %v10264_v32, 16.0  ;;  %v13866_v50 = vmov 0  ;;  %vm10654_vm2 = vmand %vm10617_vm9, %vm13869_vm13  ;;  %v10659_v32 = vfloor.f32 %v1076_v54  ;;  %v1077_v6 = vmul.f32 0.041666668, %v1022_v59 }
 0x1f6   : > { %vm10645_vm15 = vmand %vm10596_vm1, %vm13865_vm11  ;;  %v7857_v46 = vpack.c.bf16 %v3495_v62, %v3494_v51  ;;  %v565_v27 = vadd.f32 %v10247_v20, %v564_v23  ;;  %vm13874_vm11 = vcmp.ge.f32.partialorder %v560_v35, 0.0  ;;  %vm13876_vm9 = vcmp.le.f32.partialorder %v10160_v5, 16.0  ;;  %v3497_v23 = vld [vmem:[#allocation7 + $0x278] sm:$0xff] }
 0x1f7   : > { %v13867_v50 = vsel %vm10645_vm15, 4294967295, %v13866_v50  ;;  %vm13872_vm1 = vmmov %vm13856_vm8  ;;  %v10667_v1 = vsel %vm13874_vm11, %v560_v35, %v788_v26  ;;  %vm13877_vm13 = vcmp.ge.f32.partialorder %v10160_v5, 1.0  ;;  %v10679_v59 = vadd.s32 328, %v9085_v58 }
 0x1f8   : > { %13868 = vst [vmem:[#allocation102_spill] sm:$0xff] %v13867_v50  ;;  %v10664_v8 = vsel %vm13872_vm1, %v1885_v37, %v1887_v24  ;;  %13875 = vst [vmem:[#allocation104_spill] sm:$0xff] %v10667_v1  ;;  %7122 = vmatprep.mubr.msk.f32.mxu1 %vm10645_vm15, %v10667_v1  ;;  %v10688_v5 = vsel %vm10645_vm15, %v10667_v1, 0.0  ;;  %v13880_v35 = vcvt.s32.f32 %v10325_v43  ;;  %v13881_v51 = vcvt.s32.f32 %v10339_v13  ;;  %7858 = vmatprep.subr.bf16.mxu1 %v7857_v46 }
 0x1f9   : > { %13873 = vst [vmem:[#allocation103_spill] sm:$0xff] %v10664_v8  ;;  %vm10673_vm14 = vmand %vm13877_vm13, %vm13876_vm9  ;;  %6811 = vmatmul.mubr.f32.gmra.mrb[132].mxu0 %v10664_v8  ;;  %v13882_v26 = vcvt.s32.f32 %v10342_v63  ;;  %v789_v50 = vmul.f32 0.2, %v565_v27  ;;  %v1889_v1 = vrot.slane %v10688_v5, 1  ;;  %vm13883_vm13 = vcmp.le.f32.partialorder %v10276_v25, 16.0  ;;  %7860 = vmatpush3.bf16.msra.mxu1 %v7857_v46 }
 0x1fa   : > { %v10694_v37 = vsub.f32 %v13880_v35, %v1183_v11  ;;  %v10698_v62 = vsub.f32 %v13881_v51, %v1184_v17  ;;  %vm10709_vm1 = vmand %vm10654_vm2, %vm13883_vm13  ;;  %v13884_v43 = vmov 0  ;;  %v13887_v13 = vcvt.s32.f32 %v10590_v45  ;;  %v569_v17 = vpop.f32.mrb[54].mxu0 }
 0x1fb   : > { %v10702_v36 = vsub.f32 %v13882_v26, %v1185_v38  ;;  %v13885_v43 = vsel %vm10709_vm1, 4294967295, %v13884_v43  ;;  %vm13888_vm11 = vcmp.ge.f32.partialorder %v10280_v53, 1.0  ;;  %v10725_v25 = vmul.f32 24.0, %v10659_v32  ;;  %v6663_v54 = vpop.f32.mrb[55].mxu0 }
 0x1fc   : > { %13886 = vst [vmem:[#allocation105_spill] sm:$0xff] %v13885_v43  ;;  %v1023_v11 = vadd.f32 0.5, %v13887_v13  ;;  %vm10719_vm8 = vmand %vm10673_vm14, %vm13888_vm11  ;;  %v10727_v40 = vfloor.f32 %v1077_v6  ;;  %v13891_v38 = vcvt.s32.f32 %v10604_v2  ;;  %v7861_v4 = vpack.c.bf16 %v3497_v23, %v3496_v31  ;;  %v3864_v23 = vld [vmem:[#allocation7 + $0x280] sm:$0xff] }
 0x1fd   : > { %v570_v51 = vadd.f32 %v10247_v20, %v569_v17  ;;  %vm13892_vm14 = vcmask 1046528   ;;  %vm13894_vm2 = vcmp.ge.f32.partialorder %v565_v27, 0.0  ;;  %vm13896_vm11 = vcmp.le.f32.partialorder %v10174_v56, 16.0  ;;  %v3865_v17 = vld [vmem:[#allocation7 + $0x288] sm:$0xff] }
 0x1fe   : > { %v10731_v35 = vadd.f32 0.5, %v13891_v38  ;;  %v10735_v26 = vsel %vm13892_vm14, %v1887_v24, %v1889_v1  ;;  %v10738_v13 = vsel %vm13894_vm2, %v565_v27, %v789_v50  ;;  %vm13897_vm13 = vcmp.ge.f32.partialorder %v10174_v56, 1.0  ;;  %v574_v24 = vpop.f32.mrb[56].mxu0  ;;  %7862 = vmatprep.subr.bf16.mxu1 %v7861_v4 }
 0x1ff   : > { %13893 = vst [vmem:[#allocation106_spill] sm:$0xff] %v10735_v26  ;;  %13895 = vst [vmem:[#allocation107_spill] sm:$0xff] %v10738_v13  ;;  %6813 = vmatprep.mubr.f32.mxu0 %v10735_v26  ;;  %7123 = vmatmul.mubr.msk.f32.gmra.mrb[6].mxu1 %vm10709_vm1, %v10738_v13  ;;  %v10757_v56 = vsel %vm10709_vm1, %v10738_v13, 0.0  ;;  %v2634_v50 = vrot.slane %v9868_v55, 2  ;;  %v2636_v27 = vrot.slane %v9927_v39, 2  ;;  %v13901_v31 = vmov 0 }
 0x200   : > { %vm10744_vm9 = vmand %vm13897_vm13, %vm13896_vm11  ;;  %v790_v38 = vmul.f32 0.2, %v570_v51  ;;  %v1891_v54 = vrot.slane %v10757_v56, 1  ;;  %vm13900_vm13 = vcmp.le.f32.partialorder %v10280_v53, 16.0  ;;  %v10773_v43 = vmul.f32 0.041666668, %v1023_v11  ;;  %7864 = vmatpush3.bf16.msra.mxu1 %v7861_v4 }
 0x201   : > { %vm10769_vm15 = vmand %vm10719_vm8, %vm13900_vm13  ;;  %vm13903_vm14 = vcmp.ge.f32.partialorder %v10295_v10, 1.0  ;;  %v10784_v39 = vpack.c.bf16 %v3865_v17, %v3864_v23  ;;  %v13906_v53 = vrot.slane %v9814_v52, 2  ;;  %vm13907_vm8 = vcmask 1045504   ;;  %v6666_v13 = vpop.f32.mrb[57].mxu0 }
 0x202   : > { %v13902_v31 = vsel %vm10769_vm15, 4294967295, %v13901_v31  ;;  %vm10779_vm2 = vmand %vm10744_vm9, %vm13903_vm14  ;;  %v2638_v63 = vrot.slane %v9984_v0, 2  ;;  %v575_v6 = vadd.f32 %v10247_v20, %v574_v24  ;;  %vm13911_vm9 = vcmask 1046528  }
 0x203   : > { %v10789_v11 = vsel %vm13907_vm8, %v13906_v53, %v2634_v50  ;;  %vm13909_vm13 = vmmov %vm13907_vm8  ;;  %v10797_v26 = vsel %vm13911_vm9, %v1889_v1, %v1891_v54  ;;  %vm13913_vm14 = vcmp.ge.f32.partialorder %v570_v51, 0.0  ;;  %vm13914_vm11 = vcmp.le.f32.partialorder %v10233_v7, 16.0  ;;  %7866 = vmatprep.subr.bf16.mxu1 %v10784_v39 }
 0x204   : > { %13908 = vst [vmem:[#allocation108_spill] sm:$0xff] %v10789_v11  ;;  %v10792_v46 = vsel %vm13909_vm13, %v2634_v50, %v2636_v27  ;;  %13912 = vst [vmem:[#allocation110_spill] sm:$0xff] %v10797_v26  ;;  %v10800_v8 = vsel %vm13913_vm14, %v570_v51, %v790_v38  ;;  %vm13915_vm1 = vcmp.ge.f32.partialorder %v10233_v7, 1.0  ;;  %v2640_v0 = vrot.slane %v10045_v48, 2  ;;  %6814 = vmatmul.mubr.f32.gmra.mrb[134].mxu0 %v10797_v26 }
 0x205   : > { %13910 = vst [vmem:[#allocation109_spill] sm:$0xff] %v10792_v46  ;;  %vm10806_vm8 = vmand %vm13915_vm1, %vm13914_vm11  ;;  %7125 = vmatprep.mubr.msk.f32.mxu1 %vm10769_vm15, %v10800_v8  ;;  %v10819_v1 = vsel %vm10769_vm15, %v10800_v8, 0.0  ;;  %v2642_v48 = vrot.slane %v10095_v18, 2  ;;  %v2644_v51 = vrot.slane %v10154_v42, 2  ;;  %v791_v13 = vmul.f32 0.2, %v575_v6 }
 0x206   : > { %vm13918_vm9 = vmmov %vm13909_vm13  ;;  %v1893_v17 = vrot.slane %v10819_v1, 1  ;;  %vm13920_vm13 = vcmp.le.f32.partialorder %v10295_v10, 16.0  ;;  %v13921_v24 = vmov 0  ;;  %v10850_v42 = vadd.s32 336, %v9085_v58 }
 0x207   : > { %v10824_v7 = vsel %vm13918_vm9, %v2636_v27, %v2638_v63  ;;  %vm10833_vm15 = vmand %vm10779_vm2, %vm13920_vm13  ;;  %v579_v27 = vpop.f32.mrb[58].mxu0  ;;  %v2646_v38 = vrot.slane %v10207_v61, 2  ;;  %vm13936_vm14 = vcmp.ge.f32.partialorder %v10366_v21, 1.0  ;;  %v2648_v61 = vrot.slane %v10270_v16, 2 }
 0x208   : > { %13919 = vst [vmem:[#allocation111_spill] sm:$0xff] %v10824_v7  ;;  %v13922_v24 = vsel %vm10833_vm15, 4294967295, %v13921_v24  ;;  %vm13923_vm1 = vmmov %vm13918_vm9  ;;  %vm13925_vm9 = vcmp.ge.f32.partialorder %v10364_v60, 1.0  ;;  %v580_v55 = vadd.f32 %v10247_v20, %v579_v27  ;;  %v6669_v53 = vpop.f32.mrb[59].mxu0  ;;  %v2650_v16 = vrot.slane %v10334_v28, 2 }
 0x209   : > { %v10838_v50 = vsel %vm13923_vm1, %v2638_v63, %v2640_v0  ;;  %vm10844_vm11 = vmand %vm10806_vm8, %vm13925_vm9  ;;  %vm13932_vm8 = vcmask 1046528   ;;  %vm13935_vm9 = vcmp.le.f32.partialorder %v10366_v21, 16.0  ;;  %v13942_v27 = vmov 0 }
 0x20a   : > { %13924 = vst [vmem:[#allocation112_spill] sm:$0xff] %v10838_v50  ;;  %vm13928_vm2 = vmmov %vm13923_vm1  ;;  %v10862_v63 = vsel %vm13932_vm8, %v1891_v54, %v1893_v17  ;;  %v2654_v18 = vrot.slane %v10452_v12, 2  ;;  %v2658_v12 = vrot.slane %v10570_v41, 2  ;;  %v2660_v41 = vrot.slane %v10633_v22, 2 }
 0x20b   : > { %v10854_v10 = vsel %vm13928_vm2, %v2640_v0, %v2642_v48  ;;  %vm13930_vm13 = vmmov %vm13923_vm1  ;;  %13933 = vst [vmem:[#allocation115_spill] sm:$0xff] %v10862_v63  ;;  %vm13934_vm1 = vcmp.ge.f32.partialorder %v575_v6, 0.0  ;;  %6816 = vmatprep.mubr.f32.mxu0 %v10862_v63  ;;  %v2664_v28 = vrot.slane %v10757_v56, 2  ;;  %v1079_v22 = vmul.f32 0.041666668, %v10731_v35 }
 0x20c   : > { %13929 = vst [vmem:[#allocation113_spill] sm:$0xff] %v10854_v10  ;;  %v10857_v4 = vsel %vm13930_vm13, %v2642_v48, %v2644_v51  ;;  %v10865_v23 = vsel %vm13934_vm1, %v575_v6, %v791_v13  ;;  %vm10871_vm2 = vmand %vm13936_vm14, %vm13935_vm9  ;;  %v2652_v6 = vrot.slane %v10394_v3, 2  ;;  %vm737_vm9 = vcmp.ge.f32.partialorder %v580_v55, 0.0 }
 0x20d   : > { %13931 = vst [vmem:[#allocation114_spill] sm:$0xff] %v10857_v4  ;;  %7126 = vmatmul.mubr.msk.f32.gmra.mrb[8].mxu1 %vm10833_vm15, %v10865_v23  ;;  %v10884_v54 = vsel %vm10833_vm15, %v10865_v23, 0.0  ;;  %vm13939_vm1 = vmmov %vm13930_vm13  ;;  %v792_v48 = vmul.f32 0.2, %v580_v55  ;;  %vm13941_vm13 = vcmp.le.f32.partialorder %v10364_v60, 16.0  ;;  %vm14278_vm4 = vcmask 1046528  }
 0x20e   : > { %v10889_v21 = vsel %vm13939_vm1, %v2644_v51, %v2646_v38  ;;  %v1895_v13 = vrot.slane %v10884_v54, 1  ;;  %vm10898_vm15 = vmand %vm10844_vm11, %vm13941_vm13  ;;  %v584_v51 = vpop.f32.mrb[60].mxu0  ;;  %vm13953_vm13 = vcmask 1046528  }
 0x20f   : > { %13940 = vst [vmem:[#allocation116_spill] sm:$0xff] %v10889_v21  ;;  %v13943_v27 = vsel %vm10898_vm15, 4294967295, %v13942_v27  ;;  %vm13944_vm14 = vmmov %vm13939_vm1  ;;  %vm13946_vm1 = vcmp.ge.f32.partialorder %v10515_v30, 1.0  ;;  %v6672_v21 = vpop.f32.mrb[61].mxu0  ;;  %v10926_v4 = vsel %vm737_vm9, %v580_v55, %v792_v48 }
 0x210   : > { %v10903_v53 = vsel %vm13944_vm14, %v2646_v38, %v2648_v61  ;;  %vm10909_vm8 = vmand %vm10871_vm2, %vm13946_vm1  ;;  %v2656_v38 = vrot.slane %v10509_v57, 2  ;;  %v10924_v0 = vsel %vm13953_vm13, %v1893_v17, %v1895_v13  ;;  %vm13955_vm2 = vcmp.le.f32.partialorder %v10398_v49, 16.0  ;;  %7128 = vmatprep.mubr.msk.f32.mxu1 %vm10898_vm15, %v10926_v4 }
 0x211   : > { %13945 = vst [vmem:[#allocation117_spill] sm:$0xff] %v10903_v53  ;;  %vm13949_vm6 = vmmov %vm13944_vm14  ;;  %v585_v53 = vadd.f32 %v10247_v20, %v584_v51  ;;  %6817 = vmatmul.mubr.f32.gmra.mrb[136].mxu0 %v10924_v0  ;;  %v1731_v57 = vsel %vm10898_vm15, %v10926_v4, 0.0  ;;  %vm13963_vm1 = vcmp.le.f32.partialorder %v10515_v30, 16.0  ;;  %v2662_v51 = vrot.slane %v10688_v5, 2 }
 0x212   : > { %v10915_v60 = vsel %vm13949_vm6, %v2648_v61, %v2650_v16  ;;  %vm13951_vm11 = vmmov %vm13949_vm6  ;;  %13954 = vst [vmem:[#allocation120_spill] sm:$0xff] %v10924_v0  ;;  %vm13956_vm6 = vcmp.ge.f32.partialorder %v10398_v49, 1.0  ;;  %v1897_v21 = vrot.slane %v1731_v57, 1  ;;  %v2668_v5 = vrot.slane %v10884_v54, 2 }
 0x213   : > { %13950 = vst [vmem:[#allocation118_spill] sm:$0xff] %v10915_v60  ;;  %v10918_v3 = vsel %vm13951_vm11, %v2650_v16, %v2652_v6  ;;  %vm10932_vm14 = vmand %vm13956_vm6, %vm13955_vm2  ;;  %vm738_vm6 = vcmp.ge.f32.partialorder %v585_v53, 0.0  ;;  %v793_v55 = vmul.f32 0.2, %v585_v53  ;;  %v13964_v16 = vmov 0 }
 0x214   : > { %13952 = vst [vmem:[#allocation119_spill] sm:$0xff] %v10918_v3  ;;  %vm13959_vm13 = vmmov %vm13951_vm11 }
 0x215   : > { %v10948_v49 = vsel %vm13959_vm13, %v2652_v6, %v2654_v18  ;;  %vm13961_vm2 = vmmov %vm13951_vm11  ;;  %v589_v6 = vpop.f32.mrb[62].mxu0  ;;  %vm13968_vm13 = vcmp.ge.f32.partialorder %v10528_v19, 1.0  ;;  %vm13985_vm11 = vcmp.le.f32.partialorder %v10528_v19, 16.0  ;;  %v11035_v19 = vfloor.f32 %v10773_v43 }
 0x216   : > { %13960 = vst [vmem:[#allocation121_spill] sm:$0xff] %v10948_v49  ;;  %v10951_v17 = vsel %vm13961_vm2, %v2654_v18, %v2656_v38  ;;  %vm10958_vm12 = vmand %vm10909_vm8, %vm13963_vm1  ;;  %v2666_v18 = vrot.slane %v10819_v1, 2  ;;  %vm13973_vm8 = vcmask 1046528   ;;  %vm13976_vm1 = vcmp.ge.f32.partialorder %v10411_v33, 1.0 }
 0x217   : > { %13962 = vst [vmem:[#allocation122_spill] sm:$0xff] %v10951_v17  ;;  %v13965_v16 = vsel %vm10958_vm12, 4294967295, %v13964_v16  ;;  %vm13966_vm9 = vmmov %vm13961_vm2  ;;  %v10982_v61 = vsel %vm13973_vm8, %v1895_v13, %v1897_v21  ;;  %v10984_v17 = vsel %vm738_vm6, %v585_v53, %v793_v55  ;;  %v13986_v55 = vmov 0 }
 0x218   : > { %v10963_v48 = vsel %vm13966_vm9, %v2656_v38, %v2658_v12  ;;  %vm10969_vm2 = vmand %vm10932_vm14, %vm13968_vm13  ;;  %v590_v38 = vadd.f32 %v10247_v20, %v589_v6  ;;  %13974 = vst [vmem:[#allocation125_spill] sm:$0xff] %v10982_v61  ;;  %vm13975_vm14 = vcmp.le.f32.partialorder %v10411_v33, 16.0  ;;  %6819 = vmatprep.mubr.f32.mxu0 %v10982_v61  ;;  %7129 = vmatmul.mubr.msk.f32.gmra.mrb[10].mxu1 %vm10958_vm12, %v10984_v17  ;;  %v1732_v56 = vsel %vm10958_vm12, %v10984_v17, 0.0 }
 0x219   : > { %13967 = vst [vmem:[#allocation123_spill] sm:$0xff] %v10963_v48  ;;  %vm13971_vm15 = vmmov %vm13966_vm9  ;;  %v6675_v48 = vpop.f32.mrb[63].mxu0  ;;  %v1899_v53 = vrot.slane %v1732_v56, 1  ;;  %v13999_v43 = vcvt.s32.f32 %v10679_v59 }
 0x21a   : > { %v10975_v30 = vsel %vm13971_vm15, %v2658_v12, %v2660_v41  ;;  %vm10990_vm15 = vmand %vm13976_vm1, %vm13975_vm14  ;;  %v794_v13 = vmul.f32 0.2, %v590_v38  ;;  %v594_v48 = vpop.f32.mrb[64].mxu0 }
 0x21b   : > { %13972 = vst [vmem:[#allocation124_spill] sm:$0xff] %v10975_v30  ;;  %vm13979_vm8 = vmmov %vm13966_vm9  ;;  %vm739_vm9 = vcmp.ge.f32.partialorder %v590_v38, 0.0  ;;  %v1025_v35 = vadd.f32 0.5, %v13999_v43 }
 0x21c   : > { %v11006_v33 = vsel %vm13979_vm8, %v2660_v41, %v2662_v51  ;;  %vm13981_vm14 = vmmov %vm13979_vm8  ;;  %v11042_v12 = vsel %vm739_vm9, %v590_v38, %v794_v13  ;;  %vm14007_vm9 = vcmp.ge.f32.partialorder %v10624_v15, 1.0 }
 0x21d   : > { %13980 = vst [vmem:[#allocation126_spill] sm:$0xff] %v11006_v33  ;;  %v11009_v1 = vsel %vm13981_vm14, %v2662_v51, %v2664_v28  ;;  %vm13983_vm1 = vmmov %vm13979_vm8  ;;  %vm13990_vm8 = vcmp.ge.f32.partialorder %v10541_v34, 1.0  ;;  %v2670_v51 = vrot.slane %v1731_v57, 2 }
 0x21e   : > { %13982 = vst [vmem:[#allocation127_spill] sm:$0xff] %v11009_v1  ;;  %v11012_v54 = vsel %vm13983_vm1, %v2664_v28, %v2666_v18  ;;  %vm11018_vm12 = vmand %vm10969_vm2, %vm13985_vm11  ;;  %v2672_v28 = vrot.slane %v1732_v56, 2  ;;  %vm13993_vm11 = vcmask 1046528   ;;  %vm13995_vm2 = vcmp.le.f32.partialorder %v10480_v9, 16.0 }
 0x21f   : > { %13984 = vst [vmem:[#allocation128_spill] sm:$0xff] %v11012_v54  ;;  %v13987_v55 = vsel %vm11018_vm12, 4294967295, %v13986_v55  ;;  %vm13988_vm6 = vmmov %vm13983_vm1  ;;  %v11040_v54 = vsel %vm13993_vm11, %v1897_v21, %v1899_v53  ;;  %7131 = vmatprep.mubr.msk.f32.mxu1 %vm11018_vm12, %v11042_v12  ;;  %v1733_v57 = vsel %vm11018_vm12, %v11042_v12, 0.0 }
 0x220   : > { %v11023_v41 = vsel %vm13988_vm6, %v2666_v18, %v2668_v5  ;;  %vm11029_vm14 = vmand %vm10990_vm15, %vm13990_vm8  ;;  %v595_v18 = vadd.f32 %v10247_v20, %v594_v48  ;;  %13994 = vst [vmem:[#allocation130_spill] sm:$0xff] %v11040_v54  ;;  %vm13996_vm15 = vcmp.ge.f32.partialorder %v10480_v9, 1.0  ;;  %6820 = vmatmul.mubr.f32.gmra.mrb[138].mxu0 %v11040_v54  ;;  %v1901_v13 = vrot.slane %v1733_v57, 1 }
 0x221   : > { %13989 = vst [vmem:[#allocation129_spill] sm:$0xff] %v11023_v41  ;;  %v6678_v41 = vpop.f32.mrb[65].mxu0  ;;  %vm11048_vm6 = vmand %vm13996_vm15, %vm13995_vm2  ;;  %v2674_v48 = vrot.slane %v1733_v57, 2  ;;  %v11094_v9 = vfloor.f32 %v1079_v22  ;;  %v11097_v57 = vadd.s32 344, %v9085_v58  ;;  %v1080_v22 = vmul.f32 0.041666668, %v1025_v35 }
 0x222   : > { %vm14000_vm2 = vmmov %vm13983_vm1  ;;  %vm740_vm8 = vcmp.ge.f32.partialorder %v595_v18, 0.0  ;;  %v795_v56 = vmul.f32 0.2, %v595_v18  ;;  %v14005_v41 = vmov 0  ;;  %v599_v43 = vpop.f32.mrb[66].mxu0  ;;  %v11209_v35 = vadd.s32 360, %v9085_v58 }
 0x223   : > { %v11066_v21 = vsel %vm14000_vm2, %v2668_v5, %v2670_v51  ;;  %vm14002_vm15 = vmmov %vm13983_vm1  ;;  %vm14004_vm1 = vcmp.le.f32.partialorder %v10541_v34, 16.0  ;;  %v14010_v34 = vcvt.s32.f32 %v10425_v44  ;;  %v600_v1 = vadd.f32 %v10247_v20, %v599_v43 }
 0x224   : > { %14001 = vst [vmem:[#allocation131_spill] sm:$0xff] %v11066_v21  ;;  %v11069_v38 = vsel %vm14002_vm15, %v2670_v51, %v2672_v28  ;;  %vm11075_vm13 = vmand %vm11029_vm14, %vm14004_vm1  ;;  %v1187_v51 = vmul.f32 24.0, %v10727_v40  ;;  %v11103_v33 = vsel %vm740_vm8, %v595_v18, %v795_v56  ;;  %vm14013_vm1 = vcmp.le.f32.partialorder %v10574_v29, 16.0 }
 0x225   : > { %14003 = vst [vmem:[#allocation132_spill] sm:$0xff] %v11069_v38  ;;  %v14006_v41 = vsel %vm11075_vm13, 4294967295, %v14005_v41  ;;  %vm11083_vm2 = vmand %vm11048_vm6, %vm14007_vm9  ;;  %v11091_v6 = vsub.f32 %v14010_v34, %v10725_v25  ;;  %v6681_v38 = vpop.f32.mrb[67].mxu0  ;;  %vm14014_vm6 = vcmp.ge.f32.partialorder %v10574_v29, 1.0  ;;  %7132 = vmatmul.mubr.msk.f32.gmra.mrb[12].mxu1 %vm11075_vm13, %v11103_v33  ;;  %v1188_v29 = vmul.f32 24.0, %v11035_v19 }
 0x226   : > { %vm14011_vm14 = vmmov %vm13993_vm11  ;;  %v14019_v18 = vcvt.s32.f32 %v10850_v42  ;;  %v14021_v43 = vmov 0  ;;  %v11194_v30 = vfloor.f32 %v1080_v22  ;;  %v2596_v22 = vld [vmem:[#allocation7 + $0x100] sm:$0xff] }
 0x227   : > { %v11101_v21 = vsel %vm14011_vm14, %v1899_v53, %v1901_v13  ;;  %vm11109_vm9 = vmand %vm14014_vm6, %vm14013_vm1  ;;  %v1734_v53 = vsel %vm11075_vm13, %v11103_v33, 0.0  ;;  %vm14020_vm14 = vcmp.le.f32.partialorder %v10624_v15, 16.0  ;;  %vm14023_vm6 = vcmp.ge.f32.partialorder %v10694_v37, 1.0  ;;  %v14026_v15 = vld [vmem:[#allocation93_spill] sm:$0xff] }
 0x228   : > { %14012 = vst [vmem:[#allocation133_spill] sm:$0xff] %v11101_v21  ;;  %vm14017_vm11 = vmmov %vm14002_vm15  ;;  %6822 = vmatprep.mubr.f32.mxu0 %v11101_v21  ;;  %v1026_v38 = vadd.f32 0.5, %v14019_v18  ;;  %v1903_v56 = vrot.slane %v1734_v53, 1  ;;  %v2676_v34 = vrot.slane %v1734_v53, 2  ;;  %v14027_v5 = vcvt.s32.f32 %v14026_v15 }
 0x229   : > { %v11115_v25 = vsel %vm14017_vm11, %v2672_v28, %v2674_v48  ;;  %vm741_vm11 = vcmp.ge.f32.partialorder %v600_v1, 0.0  ;;  %v796_v28 = vmul.f32 0.2, %v600_v1  ;;  %vm11132_vm1 = vmand %vm11083_vm2, %vm14020_vm14  ;;  %v11152_v53 = vadd.s32 352, %v9085_v58 }
 0x22a   : > { %14018 = vst [vmem:[#allocation134_spill] sm:$0xff] %v11115_v25  ;;  %v14022_v43 = vsel %vm11132_vm1, 4294967295, %v14021_v43  ;;  %v604_v25 = vpop.f32.mrb[68].mxu0  ;;  %vm11140_vm8 = vmand %vm11109_vm9, %vm14023_vm6  ;;  %v11148_v18 = vsub.f32 %v14027_v5, %v1187_v51  ;;  %vm14028_vm2 = vcmask 1046528   ;;  %vm14030_vm9 = vcmp.le.f32.partialorder %v10576_v47, 16.0 }
 0x22b   : > { %v605_v49 = vadd.f32 %v10247_v20, %v604_v25  ;;  %v6684_v44 = vpop.f32.mrb[69].mxu0  ;;  %v11156_v3 = vsel %vm14028_vm2, %v1901_v13, %v1903_v56  ;;  %v11158_v60 = vsel %vm741_vm11, %v600_v1, %v796_v28  ;;  %vm14031_vm14 = vcmp.ge.f32.partialorder %v10576_v47, 1.0  ;;  %vm14034_vm13 = vmmov %vm14002_vm15 }
 0x22c   : > { %14029 = vst [vmem:[#allocation93_spill] sm:$0xff] %v11156_v3  ;;  %vm11164_vm6 = vmand %vm14031_vm14, %vm14030_vm9  ;;  %v11170_v15 = vsel %vm14034_vm13, %v2674_v48, %v2676_v34  ;;  %6823 = vmatmul.mubr.f32.gmra.mrb[140].mxu0 %v11156_v3  ;;  %7134 = vmatprep.mubr.msk.f32.mxu1 %vm11132_vm1, %v11158_v60  ;;  %v1735_v13 = vsel %vm11132_vm1, %v11158_v60, 0.0  ;;  %v14036_v47 = vcvt.s32.f32 %v10590_v45  ;;  %v1189_v48 = vmul.f32 24.0, %v11094_v9 }
 0x22d   : > { %14035 = vst [vmem:[#allocation135_spill] sm:$0xff] %v11170_v15  ;;  %v1081_v25 = vmul.f32 0.041666668, %v1026_v38  ;;  %vm742_vm13 = vcmp.ge.f32.partialorder %v605_v49, 0.0  ;;  %v797_v28 = vmul.f32 0.2, %v605_v49 }
 0x22e   : > { %v11183_v1 = vsub.f32 %v14036_v47, %v1188_v29  ;;  %v1905_v5 = vrot.slane %v1735_v13, 1  ;;  %vm14037_vm9 = vcmp.le.f32.partialorder %v10694_v37, 16.0  ;;  %v14038_v44 = vmov 0  ;;  %v609_v15 = vpop.f32.mrb[70].mxu0  ;;  %v2597_v47 = vld [vmem:[#allocation7 + $0x108] sm:$0xff] }
 0x22f   : > { %vm11190_vm14 = vmand %vm11140_vm8, %vm14037_vm9  ;;  %vm14041_vm11 = vcmp.ge.f32.partialorder %v10698_v62, 1.0  ;;  %v14044_v37 = vcvt.s32.f32 %v11097_v57  ;;  %v2678_v10 = vrot.slane %v1735_v13, 2  ;;  %v610_v50 = vadd.f32 %v10247_v20, %v609_v15  ;;  %v6687_v51 = vpop.f32.mrb[71].mxu0 }
 0x230   : > { %v14039_v44 = vsel %vm11190_vm14, 4294967295, %v14038_v44  ;;  %vm11200_vm2 = vmand %vm11164_vm6, %vm14041_vm11  ;;  %vm14045_vm8 = vcmask 1046528   ;;  %v11216_v46 = vsel %vm742_vm13, %v605_v49, %v797_v28  ;;  %vm14047_vm6 = vcmp.le.f32.partialorder %v10578_v14, 16.0  ;;  %v614_v51 = vpop.f32.mrb[72].mxu0 }
 0x231   : > { %14040 = vst [vmem:[#allocation136_spill] sm:$0xff] %v14039_v44  ;;  %v1027_v29 = vadd.f32 0.5, %v14044_v37  ;;  %v11213_v7 = vsel %vm14045_vm8, %v1903_v56, %v1905_v5  ;;  %vm14048_vm11 = vcmp.ge.f32.partialorder %v10578_v14, 1.0  ;;  %v11227_v13 = vpack.c.bf16 %v2597_v47, %v2596_v22  ;;  %7135 = vmatmul.mubr.msk.f32.gmra.mrb[14].mxu1 %vm11190_vm14, %v11216_v46  ;;  %v6690_v52 = vpop.f32.mrb[73].mxu0 }
 0x232   : > { %14046 = vst [vmem:[#allocation137_spill] sm:$0xff] %v11213_v7  ;;  %vm11222_vm9 = vmand %vm14048_vm11, %vm14047_vm6  ;;  %6825 = vmatprep.mubr.f32.mxu0 %v11213_v7  ;;  %v1736_v49 = vsel %vm11190_vm14, %v11216_v46, 0.0  ;;  %v11238_v14 = vfloor.f32 %v1081_v25  ;;  %vm743_vm11 = vcmp.ge.f32.partialorder %v610_v50, 0.0  ;;  %v798_v15 = vmul.f32 0.2, %v610_v50 }
 0x233   : > { %vm14051_vm6 = vmmov %vm14002_vm15  ;;  %v1907_v28 = vrot.slane %v1736_v49, 1  ;;  %vm14053_vm15 = vcmp.le.f32.partialorder %v10698_v62, 16.0  ;;  %v14054_v22 = vmov 0  ;;  %7770 = vmatprep.subr.bf16.mxu0 %v11227_v13  ;;  %v2680_v47 = vrot.slane %v1736_v49, 2 }
 0x234   : > { %v11241_v56 = vsel %vm14051_vm6, %v2676_v34, %v2678_v10  ;;  %vm11247_vm1 = vmand %vm11200_vm2, %vm14053_vm15  ;;  %vm14057_vm13 = vcmp.ge.f32.partialorder %v10702_v36, 1.0  ;;  %v14060_v62 = vcvt.s32.f32 %v10604_v2  ;;  %v1190_v45 = vmul.f32 24.0, %v11194_v30  ;;  %v11327_v2 = vld [vmem:[%s13003_s2] ss:$0 sm:$0xff] }
 0x235   : > { %14052 = vst [vmem:[#allocation138_spill] sm:$0xff] %v11241_v56  ;;  %v14055_v22 = vsel %vm11247_vm1, 4294967295, %v14054_v22  ;;  %vm11256_vm6 = vmand %vm11222_vm9, %vm14057_vm13  ;;  %v1082_v38 = vmul.f32 0.041666668, %v1027_v29  ;;  %v14061_v49 = vcvt.s32.f32 %v11152_v53  ;;  %v615_v11 = vadd.f32 %v10247_v20, %v614_v51  ;;  %v619_v51 = vpop.f32.mrb[74].mxu0 }
 0x236   : > { %14056 = vst [vmem:[#allocation139_spill] sm:$0xff] %v14055_v22  ;;  %v11263_v25 = vsub.f32 %v14060_v62, %v1189_v48  ;;  %vm14062_vm15 = vmmov %vm14045_vm8  ;;  %v11273_v44 = vsel %vm743_vm11, %v610_v50, %v798_v15  ;;  %vm14065_vm2 = vcmp.le.f32.partialorder %v10659_v32, 16.0  ;;  %vm14066_vm9 = vcmp.ge.f32.partialorder %v10659_v32, 1.0 }
 0x237   : > { %v1028_v56 = vadd.f32 0.5, %v14061_v49  ;;  %v11270_v37 = vsel %vm14062_vm15, %v1905_v5, %v1907_v28  ;;  %14064 = vst [vmem:[#allocation141_spill] sm:$0xff] %v11273_v44  ;;  %vm11279_vm13 = vmand %vm14066_vm9, %vm14065_vm2  ;;  %7137 = vmatprep.mubr.msk.f32.mxu1 %vm11247_vm1, %v11273_v44  ;;  %v1737_v52 = vsel %vm11247_vm1, %v11273_v44, 0.0  ;;  %v1191_v20 = vmul.f32 24.0, %v11238_v14 }
 0x238   : > { %14063 = vst [vmem:[#allocation140_spill] sm:$0xff] %v11270_v37  ;;  %6826 = vmatmul.mubr.f32.gmra.mrb[142].mxu0 %v11270_v37  ;;  %vm14069_vm2 = vcmask 1045504   ;;  %vm744_vm9 = vcmp.ge.f32.partialorder %v615_v11, 0.0  ;;  %v799_v50 = vmul.f32 0.2, %v615_v11  ;;  %v1909_v5 = vrot.slane %v1737_v52, 1 }
 0x239   : > { %v11296_v32 = vsel %vm14069_vm2, %v2678_v10, %v2680_v47  ;;  %vm14071_vm8 = vcmp.le.f32.partialorder %v10702_v36, 16.0  ;;  %v14072_v29 = vmov 0  ;;  %v2682_v15 = vrot.slane %v1737_v52, 2 }
 0x23a   : > { %14070 = vst [vmem:[#allocation142_spill] sm:$0xff] %v11296_v32  ;;  %vm11302_vm14 = vmand %vm11256_vm6, %vm14071_vm8  ;;  %vm14075_vm11 = vcmp.ge.f32.partialorder %v11091_v6, 1.0  ;;  %v14078_v36 = vcvt.s32.f32 %v10679_v59  ;;  %v11319_v34 = vfloor.f32 %v1082_v38  ;;  %v1083_v49 = vmul.f32 0.041666668, %v1028_v56  ;;  %v6693_v32 = vpop.f32.mrb[75].mxu0 }
 0x23b   : > { %v14073_v29 = vsel %vm11302_vm14, 4294967295, %v14072_v29  ;;  %vm11310_vm15 = vmand %vm11279_vm13, %vm14075_vm11  ;;  %v11322_v52 = vadd.s32 368, %v9085_v58  ;;  %v620_v48 = vadd.f32 %v11327_v2, %v619_v51  ;;  %vm14079_vm8 = vcmask 1046528  }
 0x23c   : > { %14074 = vst [vmem:[#allocation143_spill] sm:$0xff] %v14073_v29  ;;  %v11317_v62 = vsub.f32 %v14078_v36, %v1190_v45  ;;  %v11331_v22 = vsel %vm14079_vm8, %v1907_v28, %v1909_v5  ;;  %v11334_v59 = vsel %vm744_vm9, %v615_v11, %v799_v50  ;;  %vm14082_vm6 = vcmp.le.f32.partialorder %v10727_v40, 16.0 }
 0x23d   : > { %14080 = vst [vmem:[#allocation144_spill] sm:$0xff] %v11331_v22  ;;  %14081 = vst [vmem:[#allocation145_spill] sm:$0xff] %v11334_v59  ;;  %vm14083_vm13 = vcmp.ge.f32.partialorder %v10727_v40, 1.0  ;;  %v14086_v56 = vcvt.s32.f32 %v11209_v35  ;;  %6828 = vmatprep.mubr.f32.mxu0 %v11331_v22  ;;  %7138 = vmatmul.mubr.msk.f32.gmra.mrb[16].mxu1 %vm11302_vm14, %v11334_v59  ;;  %v1738_v11 = vsel %vm11302_vm14, %v11334_v59, 0.0  ;;  %v800_v28 = vmul.f32 0.2, %v620_v48 }
 0x23e   : > { %vm11340_vm11 = vmand %vm14083_vm13, %vm14082_vm6  ;;  %vm745_vm13 = vcmp.ge.f32.partialorder %v620_v48, 0.0  ;;  %v1911_v32 = vrot.slane %v1738_v11, 1  ;;  %v14090_v50 = vmov 0  ;;  %v14093_v51 = vcvt.s32.f32 %v10850_v42 }
 0x23f   : > { %v1029_v45 = vadd.f32 0.5, %v14086_v56  ;;  %vm14087_vm6 = vmmov %vm14069_vm2  ;;  %vm14089_vm2 = vcmp.le.f32.partialorder %v11091_v6, 16.0  ;;  %v624_v56 = vpop.f32.mrb[76].mxu0  ;;  %vm14094_vm9 = vcmp.ge.f32.partialorder %v11148_v18, 1.0  ;;  %v1192_v6 = vmul.f32 24.0, %v11319_v34 }
 0x240   : > { %v11357_v40 = vsel %vm14087_vm6, %v2680_v47, %v2682_v15  ;;  %vm11363_vm1 = vmand %vm11310_vm15, %vm14089_vm2  ;;  %v11369_v36 = vsub.f32 %v14093_v51, %v1191_v20  ;;  %v11381_v10 = vfloor.f32 %v1083_v49  ;;  %v2684_v42 = vrot.slane %v1738_v11, 2  ;;  %v6696_v51 = vpop.f32.mrb[77].mxu0 }
 0x241   : > { %14088 = vst [vmem:[#allocation146_spill] sm:$0xff] %v11357_v40  ;;  %v14091_v50 = vsel %vm11363_vm1, 4294967295, %v14090_v50  ;;  %vm11375_vm6 = vmand %vm11340_vm11, %vm14094_vm9  ;;  %v625_v20 = vadd.f32 %v11327_v2, %v624_v56  ;;  %v11388_v38 = vsel %vm745_vm13, %v620_v48, %v800_v28  ;;  %vm14100_vm2 = vcmp.le.f32.partialorder %v11035_v19, 16.0  ;;  %v629_v51 = vpop.f32.mrb[78].mxu0 }
 0x242   : > { %14092 = vst [vmem:[#allocation147_spill] sm:$0xff] %v14091_v50  ;;  %vm14097_vm15 = vmmov %vm14079_vm8  ;;  %vm14101_vm11 = vcmp.ge.f32.partialorder %v11035_v19, 1.0  ;;  %v1084_v49 = vmul.f32 0.041666668, %v1029_v45  ;;  %7140 = vmatprep.mubr.msk.f32.mxu1 %vm11363_vm1, %v11388_v38  ;;  %v1739_v48 = vsel %vm11363_vm1, %v11388_v38, 0.0  ;;  %v11408_v19 = vadd.s32 376, %v9085_v58 }
 0x243   : > { %v11386_v29 = vsel %vm14097_vm15, %v1909_v5, %v1911_v32  ;;  %14099 = vst [vmem:[#allocation149_spill] sm:$0xff] %v11388_v38  ;;  %vm11394_vm9 = vmand %vm14101_vm11, %vm14100_vm2  ;;  %vm14104_vm15 = vcmask 1045504   ;;  %vm746_vm2 = vcmp.ge.f32.partialorder %v625_v20, 0.0  ;;  %v801_v45 = vmul.f32 0.2, %v625_v20  ;;  %v6699_v59 = vpop.f32.mrb[79].mxu0 }
 0x244   : > { %14098 = vst [vmem:[#allocation148_spill] sm:$0xff] %v11386_v29  ;;  %6829 = vmatmul.mubr.f32.gmra.mrb[144].mxu0 %v11386_v29  ;;  %v11411_v5 = vsel %vm14104_vm15, %v2682_v15, %v2684_v42  ;;  %v1913_v11 = vrot.slane %v1739_v48, 1  ;;  %vm14106_vm11 = vcmp.le.f32.partialorder %v11148_v18, 16.0  ;;  %v14107_v28 = vmov 0  ;;  %v634_v59 = vpop.f32.mrb[80].mxu0 }
 0x245   : > { %14105 = vst [vmem:[#allocation150_spill] sm:$0xff] %v11411_v5  ;;  %vm11417_vm8 = vmand %vm11375_vm6, %vm14106_vm11  ;;  %v2686_v56 = vrot.slane %v1739_v48, 2  ;;  %vm14110_vm13 = vcmp.ge.f32.partialorder %v11183_v1, 1.0  ;;  %v14113_v18 = vcvt.s32.f32 %v11097_v57  ;;  %v1193_v40 = vmul.f32 24.0, %v11381_v10 }
 0x246   : > { %v14108_v28 = vsel %vm11417_vm8, 4294967295, %v14107_v28  ;;  %vm11425_vm1 = vmand %vm11394_vm9, %vm14110_vm13  ;;  %v14114_v48 = vcvt.s32.f32 %v11322_v52  ;;  %v630_v50 = vadd.f32 %v11327_v2, %v629_v51  ;;  %vm14115_vm6 = vcmask 1046528  }
 0x247   : > { %14109 = vst [vmem:[#allocation151_spill] sm:$0xff] %v14108_v28  ;;  %v11433_v47 = vsub.f32 %v14113_v18, %v1192_v6  ;;  %v11440_v38 = vsel %vm14115_vm6, %v1911_v32, %v1913_v11  ;;  %v11442_v44 = vsel %vm746_vm2, %v625_v20, %v801_v45  ;;  %vm14118_vm9 = vcmp.le.f32.partialorder %v11094_v9, 16.0  ;;  %vm14122_vm2 = vmmov %vm14104_vm15 }
 0x248   : > { %v1030_v5 = vadd.f32 0.5, %v14114_v48  ;;  %14116 = vst [vmem:[#allocation152_spill] sm:$0xff] %v11440_v38  ;;  %14117 = vst [vmem:[#allocation153_spill] sm:$0xff] %v11442_v44  ;;  %vm14119_vm13 = vcmp.ge.f32.partialorder %v11094_v9, 1.0  ;;  %v11453_v6 = vfloor.f32 %v1084_v49  ;;  %6831 = vmatprep.mubr.f32.mxu0 %v11440_v38  ;;  %7141 = vmatmul.mubr.msk.f32.gmra.mrb[18].mxu1 %vm11417_vm8, %v11442_v44  ;;  %v1740_v32 = vsel %vm11417_vm8, %v11442_v44, 0.0 }
 0x249   : > { %vm11448_vm11 = vmand %vm14119_vm13, %vm14118_vm9  ;;  %v11464_v20 = vadd.s32 384, %v9085_v58  ;;  %v11467_v45 = vsel %vm14122_vm2, %v2684_v42, %v2686_v56  ;;  %vm747_vm6 = vcmp.ge.f32.partialorder %v630_v50, 0.0  ;;  %v802_v49 = vmul.f32 0.2, %v630_v50 }
 0x24a   : > { %14123 = vst [vmem:[#allocation154_spill] sm:$0xff] %v11467_v45  ;;  %v1915_v51 = vrot.slane %v1740_v32, 1  ;;  %vm14124_vm9 = vcmp.le.f32.partialorder %v11183_v1, 16.0  ;;  %v14125_v18 = vmov 0  ;;  %v2688_v48 = vrot.slane %v1740_v32, 2  ;;  %v6702_v45 = vpop.f32.mrb[81].mxu0 }
 0x24b   : > { %vm11473_vm13 = vmand %vm11425_vm1, %vm14124_vm9  ;;  %vm14128_vm15 = vcmp.ge.f32.partialorder %v11263_v25, 1.0  ;;  %v14131_v1 = vcvt.s32.f32 %v11152_v53  ;;  %v1085_v32 = vmul.f32 0.041666668, %v1030_v5  ;;  %v635_v9 = vadd.f32 %v11327_v2, %v634_v59 }
 0x24c   : > { %v14126_v18 = vsel %vm11473_vm13, 4294967295, %v14125_v18  ;;  %vm11481_vm14 = vmand %vm11448_vm11, %vm14128_vm15  ;;  %vm14132_vm1 = vcmask 1046528   ;;  %v11496_v28 = vsel %vm747_vm6, %v630_v50, %v802_v49  ;;  %vm14135_vm15 = vcmp.le.f32.partialorder %v11194_v30, 16.0 }
 0x24d   : > { %14127 = vst [vmem:[#allocation155_spill] sm:$0xff] %v14126_v18  ;;  %v11490_v15 = vsub.f32 %v14131_v1, %v1193_v40  ;;  %v11494_v57 = vsel %vm14132_vm1, %v1913_v11, %v1915_v51  ;;  %14134 = vst [vmem:[#allocation157_spill] sm:$0xff] %v11496_v28  ;;  %vm14136_vm11 = vcmp.ge.f32.partialorder %v11194_v30, 1.0  ;;  %v1194_v53 = vmul.f32 24.0, %v11453_v6  ;;  %7143 = vmatprep.mubr.msk.f32.mxu1 %vm11473_vm13, %v11496_v28  ;;  %v639_v1 = vpop.f32.mrb[82].mxu0 }
 0x24e   : > { %14133 = vst [vmem:[#allocation156_spill] sm:$0xff] %v11494_v57  ;;  %vm11502_vm9 = vmand %vm14136_vm11, %vm14135_vm15  ;;  %6832 = vmatmul.mubr.f32.gmra.mrb[146].mxu0 %v11494_v57  ;;  %v1741_v40 = vsel %vm11473_vm13, %v11496_v28, 0.0  ;;  %v14139_v30 = vcvt.s32.f32 %v11408_v19  ;;  %vm748_vm1 = vcmp.ge.f32.partialorder %v635_v9, 0.0  ;;  %v803_v45 = vmul.f32 0.2, %v635_v9 }
 0x24f   : > { %vm14140_vm6 = vmmov %vm14122_vm2  ;;  %v1917_v49 = vrot.slane %v1741_v40, 1  ;;  %vm14142_vm15 = vcmp.le.f32.partialorder %v11263_v25, 16.0  ;;  %v14143_v59 = vmov 0  ;;  %vm14146_vm8 = vcmp.ge.f32.partialorder %v11317_v62, 1.0 }
 0x250   : > { %v1031_v50 = vadd.f32 0.5, %v14139_v30  ;;  %v11519_v11 = vsel %vm14140_vm6, %v2686_v56, %v2688_v48  ;;  %vm11525_vm11 = vmand %vm11481_vm14, %vm14142_vm15  ;;  %v11540_v25 = vfloor.f32 %v1085_v32  ;;  %v11543_v42 = vadd.s32 392, %v9085_v58 }
 0x251   : > { %14141 = vst [vmem:[#allocation158_spill] sm:$0xff] %v11519_v11  ;;  %v14144_v59 = vsel %vm11525_vm11, 4294967295, %v14143_v59  ;;  %vm11534_vm6 = vmand %vm11502_vm9, %vm14146_vm8  ;;  %v2690_v30 = vrot.slane %v1741_v40, 2  ;;  %v640_v5 = vadd.f32 %v11327_v2, %v639_v1  ;;  %v6705_v11 = vpop.f32.mrb[83].mxu0  ;;  %vm14149_vm14 = vcmask 1046528  }
 0x252   : > { %14145 = vst [vmem:[#allocation159_spill] sm:$0xff] %v14144_v59  ;;  %v11547_v18 = vsel %vm14149_vm14, %v1915_v51, %v1917_v49  ;;  %v11549_v44 = vsel %vm748_vm1, %v635_v9, %v803_v45  ;;  %vm14152_vm8 = vcmp.le.f32.partialorder %v11238_v14, 16.0  ;;  %vm14153_vm9 = vcmp.ge.f32.partialorder %v11238_v14, 1.0  ;;  %vm14158_vm14 = vmmov %vm14122_vm2  ;;  %v644_v59 = vpop.f32.mrb[84].mxu0 }
 0x253   : > { %14150 = vst [vmem:[#allocation160_spill] sm:$0xff] %v11547_v18  ;;  %14151 = vst [vmem:[#allocation161_spill] sm:$0xff] %v11549_v44  ;;  %v14156_v32 = vcvt.s32.f32 %v11209_v35  ;;  %6834 = vmatprep.mubr.f32.mxu0 %v11547_v18  ;;  %7144 = vmatmul.mubr.msk.f32.gmra.mrb[20].mxu1 %vm11525_vm11, %v11549_v44  ;;  %v1742_v14 = vsel %vm11525_vm11, %v11549_v44, 0.0  ;;  %v1086_v9 = vmul.f32 0.041666668, %v1031_v50  ;;  %v14157_v51 = vcvt.s32.f32 %v11464_v20 }
 0x254   : > { %vm11555_vm15 = vmand %vm14153_vm9, %vm14152_vm8  ;;  %v11575_v35 = vsel %vm14158_vm14, %v2688_v48, %v2690_v30  ;;  %vm749_vm8 = vcmp.ge.f32.partialorder %v640_v5, 0.0  ;;  %v1919_v45 = vrot.slane %v1742_v14, 1  ;;  %vm14160_vm9 = vcmp.le.f32.partialorder %v11317_v62, 16.0 }
 0x255   : > { %v11562_v40 = vsub.f32 %v14156_v32, %v1194_v53  ;;  %v1032_v11 = vadd.f32 0.5, %v14157_v51  ;;  %14159 = vst [vmem:[#allocation162_spill] sm:$0xff] %v11575_v35  ;;  %v804_v53 = vmul.f32 0.2, %v640_v5  ;;  %vm11581_vm12 = vmand %vm11534_vm6, %vm14160_vm9  ;;  %v14161_v1 = vmov 0  ;;  %v6708_v51 = vpop.f32.mrb[85].mxu0 }
 0x256   : > { %v14162_v1 = vsel %vm11581_vm12, 4294967295, %v14161_v1  ;;  %v2692_v32 = vrot.slane %v1742_v14, 2  ;;  %vm14164_vm1 = vcmp.ge.f32.partialorder %v11369_v36, 1.0  ;;  %v1195_v62 = vmul.f32 24.0, %v11540_v25 }
 0x257   : > { %14163 = vst [vmem:[#allocation163_spill] sm:$0xff] %v14162_v1  ;;  %vm11589_vm2 = vmand %vm11555_vm15, %vm14164_vm1  ;;  %v11598_v56 = vadd.s32 400, %v9085_v58  ;;  %v645_v14 = vadd.f32 %v11327_v2, %v644_v59  ;;  %vm14167_vm6 = vcmask 1046528   ;;  %v11604_v35 = vsel %vm749_vm8, %v640_v5, %v804_v53  ;;  %v649_v1 = vpop.f32.mrb[86].mxu0 }
 0x258   : > { %v11602_v28 = vsel %vm14167_vm6, %v1917_v49, %v1919_v45  ;;  %14169 = vst [vmem:[#allocation165_spill] sm:$0xff] %v11604_v35  ;;  %vm14170_vm15 = vcmp.le.f32.partialorder %v11319_v34, 16.0  ;;  %vm14171_vm1 = vcmp.ge.f32.partialorder %v11319_v34, 1.0  ;;  %7146 = vmatprep.mubr.msk.f32.mxu1 %vm11581_vm12, %v11604_v35  ;;  %v1743_v49 = vsel %vm11581_vm12, %v11604_v35, 0.0  ;;  %vm14172_vm8 = vmmov %vm14158_vm14 }
 0x259   : > { %14168 = vst [vmem:[#allocation164_spill] sm:$0xff] %v11602_v28  ;;  %vm1470_vm9 = vmand %vm14171_vm1, %vm14170_vm15  ;;  %6835 = vmatmul.mubr.f32.gmra.mrb[148].mxu0 %v11602_v28  ;;  %v11618_v59 = vfloor.f32 %v1086_v9  ;;  %v1087_v5 = vmul.f32 0.041666668, %v1032_v11  ;;  %v11621_v53 = vsel %vm14172_vm8, %v2690_v30, %v2692_v32  ;;  %vm750_vm6 = vcmp.ge.f32.partialorder %v645_v14, 0.0  ;;  %v6711_v28 = vpop.f32.mrb[87].mxu0 }
 0x25a   : > { %14173 = vst [vmem:[#allocation166_spill] sm:$0xff] %v11621_v53  ;;  %v805_v34 = vmul.f32 0.2, %v645_v14  ;;  %v1921_v51 = vrot.slane %v1743_v49, 1  ;;  %vm14174_vm15 = vcmp.le.f32.partialorder %v11369_v36, 16.0  ;;  %v14175_v50 = vmov 0 }
 0x25b   : > { %vm11627_vm1 = vmand %vm11589_vm2, %vm14174_vm15  ;;  %v2694_v44 = vrot.slane %v1743_v49, 2  ;;  %vm14178_vm14 = vcmp.ge.f32.partialorder %v11433_v47, 1.0  ;;  %v14181_v30 = vcvt.s32.f32 %v11322_v52  ;;  %v14182_v36 = vcvt.s32.f32 %v11543_v42  ;;  %v654_v28 = vpop.f32.mrb[88].mxu0 }
 0x25c   : > { %v14176_v50 = vsel %vm11627_vm1, 4294967295, %v14175_v50  ;;  %vm11633_vm13 = vmand %vm1470_vm9, %vm14178_vm14  ;;  %v11645_v53 = vadd.s32 408, %v9085_v58  ;;  %v13337_v49 = vcvt.s32.f32 %v11598_v56  ;;  %v650_v35 = vadd.f32 %v11327_v2, %v649_v1 }
 0x25d   : > { %14177 = vst [vmem:[#allocation167_spill] sm:$0xff] %v14176_v50  ;;  %v11640_v11 = vsub.f32 %v14181_v30, %v1195_v62  ;;  %v1033_v48 = vadd.f32 0.5, %v14182_v36  ;;  %vm14183_vm2 = vcmask 1046528   ;;  %v11652_v57 = vsel %vm750_vm6, %v645_v14, %v805_v34  ;;  %v6714_v50 = vpop.f32.mrb[89].mxu0 }
 0x25e   : > { %v11650_v18 = vsel %vm14183_vm2, %v1919_v45, %v1921_v51  ;;  %14185 = vst [vmem:[#allocation169_spill] sm:$0xff] %v11652_v57  ;;  %vm14186_vm14 = vcmp.le.f32.partialorder %v11381_v10, 16.0  ;;  %vm14187_vm9 = vcmp.ge.f32.partialorder %v11381_v10, 1.0  ;;  %v11659_v52 = vsel %vm14172_vm8, %v2692_v32, %v2694_v44  ;;  %7147 = vmatmul.mubr.msk.f32.gmra.mrb[22].mxu1 %vm11627_vm1, %v11652_v57 }
 0x25f   : > { %14184 = vst [vmem:[#allocation168_spill] sm:$0xff] %v11650_v18  ;;  %vm1471_vm15 = vmand %vm14187_vm9, %vm14186_vm14  ;;  %6837 = vmatprep.mubr.f32.mxu0 %v11650_v18  ;;  %v1744_v45 = vsel %vm11627_vm1, %v11652_v57, 0.0  ;;  %v1196_v10 = vmul.f32 24.0, %v11618_v59  ;;  %vm751_vm14 = vcmp.ge.f32.partialorder %v650_v35, 0.0  ;;  %v806_v1 = vmul.f32 0.2, %v650_v35 }
 0x260   : > { %14188 = vst [vmem:[#allocation170_spill] sm:$0xff] %v11659_v52  ;;  %v1923_v32 = vrot.slane %v1744_v45, 1  ;;  %vm14189_vm8 = vcmp.le.f32.partialorder %v11433_v47, 16.0  ;;  %v14190_v62 = vmov 0  ;;  %v11679_v14 = vfloor.f32 %v1087_v5 }
 0x261   : > { %vm11675_vm9 = vmand %vm11633_vm13, %vm14189_vm8  ;;  %vm14193_vm6 = vcmp.ge.f32.partialorder %v11490_v15, 1.0  ;;  %v1088_v30 = vmul.f32 0.041666668, %v1033_v48  ;;  %v13347_v36 = vcvt.s32.f32 %v11645_v53  ;;  %v1034_v47 = vadd.f32 0.5, %v13337_v49  ;;  %v659_v49 = vpop.f32.mrb[90].mxu0 }
 0x262   : > { %v14191_v62 = vsel %vm11675_vm9, 4294967295, %v14190_v62  ;;  %vm11683_vm1 = vmand %vm1471_vm15, %vm14193_vm6  ;;  %v2696_v9 = vrot.slane %v1744_v45, 2  ;;  %v655_v52 = vadd.f32 %v11327_v2, %v654_v28  ;;  %v11694_v57 = vsel %vm751_vm14, %v650_v35, %v806_v1 }
 0x263   : > { %14192 = vst [vmem:[#allocation171_spill] sm:$0xff] %v14191_v62  ;;  %vm14196_vm13 = vmmov %vm14183_vm2  ;;  %vm14199_vm15 = vcmp.le.f32.partialorder %v11453_v6, 16.0  ;;  %vm14200_vm6 = vcmp.ge.f32.partialorder %v11453_v6, 1.0  ;;  %7149 = vmatprep.mubr.msk.f32.mxu1 %vm11675_vm9, %v11694_v57  ;;  %v1745_v50 = vsel %vm11675_vm9, %v11694_v57, 0.0  ;;  %v14201_v35 = vcvt.s32.f32 %v11408_v19 }
 0x264   : > { %v11692_v5 = vsel %vm14196_vm13, %v1921_v51, %v1923_v32  ;;  %14198 = vst [vmem:[#allocation173_spill] sm:$0xff] %v11694_v57  ;;  %vm1472_vm8 = vmand %vm14200_vm6, %vm14199_vm15  ;;  %vm14202_vm13 = vcmask 1045504   ;;  %vm752_vm15 = vcmp.ge.f32.partialorder %v655_v52, 0.0  ;;  %v807_v48 = vmul.f32 0.2, %v655_v52 }
 0x265   : > { %14197 = vst [vmem:[#allocation172_spill] sm:$0xff] %v11692_v5  ;;  %6838 = vmatmul.mubr.f32.gmra.mrb[150].mxu0 %v11692_v5  ;;  %v11711_v51 = vsub.f32 %v14201_v35, %v1196_v10  ;;  %v11714_v6 = vsel %vm14202_vm13, %v2694_v44, %v2696_v9  ;;  %v1925_v45 = vrot.slane %v1745_v50, 1  ;;  %vm14204_vm6 = vcmp.le.f32.partialorder %v11490_v15, 16.0 }
 0x266   : > { %14203 = vst [vmem:[#allocation174_spill] sm:$0xff] %v11714_v6  ;;  %vm11720_vm2 = vmand %vm11683_vm1, %vm14204_vm6  ;;  %v14205_v1 = vmov 0  ;;  %v2698_v28 = vrot.slane %v1745_v50, 2  ;;  %vm14208_vm14 = vcmp.ge.f32.partialorder %v11562_v40, 1.0  ;;  %v1197_v44 = vmul.f32 24.0, %v11679_v14  ;;  %v6717_v6 = vpop.f32.mrb[91].mxu0 }
 0x267   : > { %v14206_v1 = vsel %vm11720_vm2, 4294967295, %v14205_v1  ;;  %vm11726_vm9 = vmand %vm1472_vm8, %vm14208_vm14  ;;  %v11731_v10 = vfloor.f32 %v1088_v30  ;;  %v1035_v15 = vadd.f32 0.5, %v13347_v36  ;;  %v1089_v34 = vmul.f32 0.041666668, %v1034_v47 }
 0x268   : > { %14207 = vst [vmem:[#allocation175_spill] sm:$0xff] %v14206_v1  ;;  %v660_v35 = vadd.f32 %v11327_v2, %v659_v49  ;;  %vm14211_vm1 = vcmask 1046528   ;;  %v11739_v62 = vsel %vm752_vm15, %v655_v52, %v807_v48  ;;  %vm14214_vm8 = vcmp.le.f32.partialorder %v11540_v25, 16.0 }
 0x269   : > { %v11737_v50 = vsel %vm14211_vm1, %v1923_v32, %v1925_v45  ;;  %14213 = vst [vmem:[#allocation177_spill] sm:$0xff] %v11739_v62  ;;  %vm14215_vm14 = vcmp.ge.f32.partialorder %v11540_v25, 1.0  ;;  %vm14216_vm6 = vcmask 1045504   ;;  %7150 = vmatmul.mubr.msk.f32.gmra.mrb[24].mxu1 %vm11720_vm2, %v11739_v62  ;;  %v1746_v49 = vsel %vm11720_vm2, %v11739_v62, 0.0 }
 0x26a   : > { %14212 = vst [vmem:[#allocation176_spill] sm:$0xff] %v11737_v50  ;;  %vm1473_vm13 = vmand %vm14215_vm14, %vm14214_vm8  ;;  %v11746_v30 = vsel %vm14216_vm6, %v2696_v9, %v2698_v28  ;;  %6840 = vmatprep.mubr.f32.mxu0 %v11737_v50  ;;  %vm1419_vm1 = vcmp.le.f32.partialorder %v11618_v59, 16.0  ;;  %vm753_vm8 = vcmp.ge.f32.partialorder %v660_v35, 0.0  ;;  %v808_v25 = vmul.f32 0.2, %v660_v35  ;;  %v664_v9 = vpop.f32.mrb[92].mxu0 }
 0x26b   : > { %14217 = vst [vmem:[#allocation178_spill] sm:$0xff] %v11746_v30  ;;  %v1927_v52 = vrot.slane %v1746_v49, 1  ;;  %vm14218_vm14 = vcmp.le.f32.partialorder %v11562_v40, 16.0  ;;  %v14219_v32 = vmov 0  ;;  %v2700_v47 = vrot.slane %v1746_v49, 2  ;;  %v6720_v62 = vpop.f32.mrb[93].mxu0 }
 0x26c   : > { %vm11762_vm6 = vmand %vm11726_vm9, %vm14218_vm14  ;;  %vm14222_vm2 = vcmp.ge.f32.partialorder %v11640_v11, 1.0  ;;  %v14225_v48 = vcvt.s32.f32 %v11464_v20  ;;  %v1198_v40 = vmul.f32 24.0, %v11731_v10  ;;  %v1090_v30 = vmul.f32 0.041666668, %v1035_v15 }
 0x26d   : > { %v14220_v32 = vsel %vm11762_vm6, 4294967295, %v14219_v32  ;;  %vm11768_vm15 = vmand %vm1473_vm13, %vm14222_vm2  ;;  %v11777_v19 = vfloor.f32 %v1089_v34  ;;  %v665_v1 = vadd.f32 %v11327_v2, %v664_v9  ;;  %vm14226_vm9 = vcmask 1046528  }
 0x26e   : > { %14221 = vst [vmem:[#allocation179_spill] sm:$0xff] %v14220_v32  ;;  %v11774_v36 = vsub.f32 %v14225_v48, %v1197_v44  ;;  %v11781_v49 = vsel %vm14226_vm9, %v1925_v45, %v1927_v52  ;;  %v11783_v57 = vsel %vm753_vm8, %v660_v35, %v808_v25  ;;  %vm14229_vm2 = vcmp.ge.f32.partialorder %v11618_v59, 1.0  ;;  %v669_v44 = vpop.f32.mrb[94].mxu0 }
 0x26f   : > { %14227 = vst [vmem:[#allocation180_spill] sm:$0xff] %v11781_v49  ;;  %14228 = vst [vmem:[#allocation181_spill] sm:$0xff] %v11783_v57  ;;  %vm14230_vm14 = vcmask 1045504   ;;  %6841 = vmatmul.mubr.f32.gmra.mrb[152].mxu0 %v11781_v49  ;;  %7152 = vmatprep.mubr.msk.f32.mxu1 %vm11762_vm6, %v11783_v57  ;;  %v1747_v62 = vsel %vm11762_vm6, %v11783_v57, 0.0  ;;  %vm1365_vm8 = vcmp.ge.f32.partialorder %v11679_v14, 1.0  ;;  %vm1420_vm9 = vcmp.le.f32.partialorder %v11679_v14, 16.0 }
 0x270   : > { %vm1474_vm13 = vmand %vm14229_vm2, %vm1419_vm1  ;;  %v11790_v20 = vsel %vm14230_vm14, %v2698_v28, %v2700_v47  ;;  %vm754_vm12 = vcmp.ge.f32.partialorder %v665_v1, 0.0  ;;  %v809_v59 = vmul.f32 0.2, %v665_v1  ;;  %v1929_v45 = vrot.slane %v1747_v62, 1  ;;  %v6723_v48 = vpop.f32.mrb[95].mxu0 }
 0x271   : > { %14231 = vst [vmem:[#allocation182_spill] sm:$0xff] %v11790_v20  ;;  %vm14232_vm1 = vcmp.le.f32.partialorder %v11640_v11, 16.0  ;;  %v14233_v28 = vmov 0  ;;  %vm1639_vm14 = vcmp.le.f32.partialorder %v11711_v51, 16.0  ;;  %vm14236_vm6 = vcmp.ge.f32.partialorder %v11711_v51, 1.0 }
 0x272   : > { %vm11805_vm2 = vmand %vm11768_vm15, %vm14232_vm1  ;;  %v14239_v34 = vcvt.s32.f32 %v11543_v42  ;;  %v11818_v25 = vfloor.f32 %v1090_v30  ;;  %v1199_v11 = vmul.f32 24.0, %v11777_v19  ;;  %v2702_v9 = vrot.slane %v1747_v62, 2  ;;  %v674_v62 = vpop.f32.mrb[96].mxu0 }
 0x273   : > { %v14234_v28 = vsel %vm11805_vm2, 4294967295, %v14233_v28  ;;  %vm11812_vm11 = vmand %vm1474_vm13, %vm14236_vm6  ;;  %v670_v6 = vadd.f32 %v11327_v2, %v669_v44  ;;  %vm14240_vm15 = vcmask 1046528   ;;  %v11825_v32 = vsel %vm754_vm12, %v665_v1, %v809_v59 }
 0x274   : > { %14235 = vst [vmem:[#allocation183_spill] sm:$0xff] %v14234_v28  ;;  %v1253_v35 = vsub.f32 %v14239_v34, %v1198_v40  ;;  %v11823_v20 = vsel %vm14240_vm15, %v1927_v52, %v1929_v45  ;;  %14242 = vst [vmem:[#allocation185_spill] sm:$0xff] %v11825_v32  ;;  %vm1530_vm13 = vcmp.ge.f32.partialorder %v11774_v36, 1.0  ;;  %7153 = vmatmul.mubr.msk.f32.gmra.mrb[26].mxu1 %vm11805_vm2, %v11825_v32  ;;  %v1748_v42 = vsel %vm11805_vm2, %v11825_v32, 0.0  ;;  %v6726_v34 = vpop.f32.mrb[97].mxu0 }
 0x275   : > { %14241 = vst [vmem:[#allocation184_spill] sm:$0xff] %v11823_v20  ;;  %vm1475_vm6 = vmand %vm1365_vm8, %vm1420_vm9  ;;  %6843 = vmatprep.mubr.f32.mxu0 %v11823_v20  ;;  %vm1421_vm1 = vcmp.le.f32.partialorder %v11731_v10, 16.0  ;;  %vm14243_vm15 = vcmask 1045504   ;;  %vm755_vm8 = vcmp.ge.f32.partialorder %v670_v6, 0.0  ;;  %v810_v14 = vmul.f32 0.2, %v670_v6 }
 0x276   : > { %v11842_v1 = vsel %vm14243_vm15, %v2700_v47, %v2702_v9  ;;  %v1931_v30 = vrot.slane %v1748_v42, 1  ;;  %vm11848_vm9 = vmand %vm11812_vm11, %vm1639_vm14  ;;  %v14245_v52 = vmov 0  ;;  %v2704_v40 = vrot.slane %v1748_v42, 2 }
 0x277   : > { %14244 = vst [vmem:[#allocation186_spill] sm:$0xff] %v11842_v1  ;;  %v14246_v52 = vsel %vm11848_vm9, 4294967295, %v14245_v52  ;;  %vm11852_vm2 = vmand %vm1475_vm6, %vm1530_vm13  ;;  %vm1640_vm15 = vcmp.le.f32.partialorder %v11774_v36, 16.0  ;;  %v1200_v47 = vmul.f32 24.0, %v11818_v25  ;;  %v14250_v44 = vcvt.s32.f32 %v11598_v56 }
 0x278   : > { %14247 = vst [vmem:[#allocation187_spill] sm:$0xff] %v14246_v52  ;;  %v675_v15 = vadd.f32 %v11327_v2, %v674_v62  ;;  %vm14251_vm11 = vcmask 1046528   ;;  %v11864_v42 = vsel %vm755_vm8, %v670_v6, %v810_v14  ;;  %vm14254_vm14 = vcmp.ge.f32.partialorder %v11731_v10, 1.0  ;;  %v679_v6 = vpop.f32.mrb[98].mxu0 }
 0x279   : > { %v1254_v51 = vsub.f32 %v14250_v44, %v1199_v11  ;;  %v11862_v48 = vsel %vm14251_vm11, %v1929_v45, %v1931_v30  ;;  %14253 = vst [vmem:[#allocation189_spill] sm:$0xff] %v11864_v42  ;;  %vm1476_vm6 = vmand %vm14254_vm14, %vm1421_vm1  ;;  %vm14255_vm13 = vcmask 1045504   ;;  %7155 = vmatprep.mubr.msk.f32.mxu1 %vm11848_vm9, %v11864_v42  ;;  %v1749_v56 = vsel %vm11848_vm9, %v11864_v42, 0.0  ;;  %v6729_v34 = vpop.f32.mrb[99].mxu0  ;;  %v14312_v42 = vld [vmem:[#allocation49_spill] sm:$0xff] }
 0x27a   : > { %14252 = vst [vmem:[#allocation188_spill] sm:$0xff] %v11862_v48  ;;  %v11871_v1 = vsel %vm14255_vm13, %v2702_v9, %v2704_v40  ;;  %6844 = vmatmul.mubr.f32.gmra.mrb[154].mxu0 %v11862_v48  ;;  %vm756_vm12 = vcmp.ge.f32.partialorder %v675_v15, 0.0  ;;  %v811_v10 = vmul.f32 0.2, %v675_v15  ;;  %v1933_v45 = vrot.slane %v1749_v56, 1  ;;  %vm11886_vm1 = vmand %vm11852_vm2, %vm1640_vm15  ;;  %v2598_v34 = vld [vmem:[#allocation7 + $0x110] sm:$0xff] }
 0x27b   : > { %14256 = vst [vmem:[#allocation190_spill] sm:$0xff] %v11871_v1  ;;  %v14257_v11 = vmov 0  ;;  %v2706_v9 = vrot.slane %v1749_v56, 2  ;;  %vm14260_vm14 = vcmp.ge.f32.partialorder %v1253_v35, 1.0  ;;  %vm1641_vm8 = vcmp.le.f32.partialorder %v1253_v35, 16.0  ;;  %vm14264_vm9 = vmmov %vm14251_vm11 }
 0x27c   : > { %v14258_v11 = vsel %vm11886_vm1, 4294967295, %v14257_v11  ;;  %vm11891_vm13 = vmand %vm1476_vm6, %vm14260_vm14  ;;  %v14263_v62 = vcvt.s32.f32 %v11645_v53  ;;  %v680_v36 = vadd.f32 %v11327_v2, %v679_v6  ;;  %v11899_v59 = vsel %vm14264_vm9, %v1931_v30, %v1933_v45 }
 0x27d   : > { %14259 = vst [vmem:[#allocation191_spill] sm:$0xff] %v14258_v11  ;;  %14265 = vst [vmem:[#allocation192_spill] sm:$0xff] %v11899_v59  ;;  %v11901_v1 = vsel %vm756_vm12, %v675_v15, %v811_v10  ;;  %vm14267_vm2 = vcmp.le.f32.partialorder %v11777_v19, 16.0  ;;  %vm14268_vm15 = vcmp.ge.f32.partialorder %v11777_v19, 1.0  ;;  %vm14269_vm14 = vcmask 1045504   ;;  %6846 = vmatprep.mubr.f32.mxu0 %v11899_v59  ;;  %v14291_v15 = vld [vmem:[#allocation24_spill] sm:$0xff] }
 0x27e   : > { %v1255_v44 = vsub.f32 %v14263_v62, %v1200_v47  ;;  %14266 = vst [vmem:[#allocation193_spill] sm:$0xff] %v11901_v1  ;;  %vm1477_vm6 = vmand %vm14268_vm15, %vm14267_vm2  ;;  %v11908_v56 = vsel %vm14269_vm14, %v2704_v40, %v2706_v9  ;;  %v11914_v53 = vsel %vm11886_vm1, %v11901_v1, 0.0  ;;  %7156 = vmatmul.mubr.msk.f32.gmra.mrb[28].mxu1 %vm11886_vm1, %v11901_v1  ;;  %vm1368_vm12 = vcmp.ge.f32.partialorder %v11818_v25, 1.0  ;;  %v684_v47 = vpop.f32.mrb[100].mxu0  ;;  %v3866_v1 = vld [vmem:[#allocation7 + $0x290] sm:$0xff] }
 0x27f   : > { %14270 = vst [vmem:[#allocation194_spill] sm:$0xff] %v11908_v56  ;;  %14271 = vst [vmem:[#allocation195_spill] sm:$0xff] %v11914_v53  ;;  %vm1423_vm9 = vcmp.le.f32.partialorder %v11818_v25, 16.0  ;;  %vm757_vm11 = vcmp.ge.f32.partialorder %v680_v36, 0.0  ;;  %v812_v19 = vmul.f32 0.2, %v680_v36  ;;  %v685_v10 = vadd.f32 %v11327_v2, %v684_v47 }
 0x280   : > { %v13371_v30 = vrot.slane %v11914_v53, 1  ;;  %vm11925_vm2 = vmand %vm11891_vm13, %vm1641_vm8  ;;  %v14272_v40 = vmov 0  ;;  %vm14275_vm15 = vcmp.ge.f32.partialorder %v1254_v51, 1.0  ;;  %vm1642_vm1 = vcmp.le.f32.partialorder %v1254_v51, 16.0  ;;  %v6732_v6 = vpop.f32.mrb[101].mxu0  ;;  %v2599_v47 = vld [vmem:[#allocation7 + $0x118] sm:$0xff] }
 0x281   : > { %v14273_v40 = vsel %vm11925_vm2, 4294967295, %v14272_v40  ;;  %vm11930_vm14 = vmand %vm1477_vm6, %vm14275_vm15  ;;  %v2708_v25 = vrot.slane %v11914_v53, 2  ;;  %v11941_v14 = vsel %vm757_vm11, %v680_v36, %v812_v19  ;;  %vm1533_vm13 = vcmp.ge.f32.partialorder %v1255_v44, 1.0  ;;  %v14283_v19 = vld [vmem:[#allocation21_spill] sm:$0xff]  ;;  %v3871_v53 = vld [vmem:[#allocation7 + $0x2b8] sm:$0xff] }
 0x282   : > { %14274 = vst [vmem:[#allocation196_spill] sm:$0xff] %v14273_v40  ;;  %v11939_v35 = vsel %vm14278_vm4, %v1933_v45, %v13371_v30  ;;  %14280 = vst [vmem:[#allocation198_spill] sm:$0xff] %v11941_v14  ;;  %v11947_v62 = vsel %vm11925_vm2, %v11941_v14, 0.0  ;;  %7158 = vmatprep.mubr.msk.f32.mxu1 %vm11925_vm2, %v11941_v14  ;;  %vm14281_vm6 = vcmask 1045504   ;;  %vm758_vm4 = vcmp.ge.f32.partialorder %v685_v10, 0.0  ;;  %v689_v14 = vpop.f32.mrb[102].mxu0 }
 0x283   : > { %14279 = vst [vmem:[#allocation197_spill] sm:$0xff] %v11939_v35  ;;  %vm1478_vm8 = vmand %vm1368_vm12, %vm1423_vm9  ;;  %6847 = vmatmul.mubr.f32.gmra.mrb[156].mxu0 %v11939_v35  ;;  %v11953_v45 = vsel %vm14281_vm6, %v2706_v9, %v2708_v25  ;;  %v813_v36 = vmul.f32 0.2, %v685_v10  ;;  %v14285_v30 = vmov 0  ;;  %v3880_v40 = vrot.slane %v11947_v62, 2  ;;  %v14298_v56 = vld [vmem:[#allocation37_spill] sm:$0xff] }
 0x284   : > { %14282 = vst [vmem:[#allocation199_spill] sm:$0xff] %v11953_v45  ;;  %6881 = vmatprep.mubr.msk.f32.mxu0 %vm9228_vm7, %v14283_v19  ;;  %vm11961_vm11 = vmand %vm11930_vm14, %vm1642_vm1  ;;  %vm1643_vm9 = vcmp.le.f32.partialorder %v1255_v44, 16.0  ;;  %v690_v9 = vadd.f32 %v11327_v2, %v689_v14  ;;  %v3867_v45 = vld [vmem:[#allocation7 + $0x298] sm:$0xff]  ;;  %v7773_v6 = vpack.c.bf16 %v2599_v47, %v2598_v34  ;;  %v6735_v19 = vpop.f32.mrb[103].mxu0  ;;  %v14303_v14 = vld [vmem:[#allocation30_spill] sm:$0xff] }
 0x285   : > { %v14286_v30 = vsel %vm11961_vm11, 4294967295, %v14285_v30  ;;  %vm1588_vm12 = vmand %vm1478_vm8, %vm1533_vm13  ;;  %v11967_v11 = vsel %vm758_vm4, %v685_v10, %v813_v36  ;;  %v14293_v10 = vmov 0  ;;  %v7869_v47 = vpack.c.bf16 %v3867_v45, %v3866_v1  ;;  %v11993_v36 = vpop.f32.mrb[104].mxu0  ;;  %v3868_v45 = vld [vmem:[#allocation7 + $0x2a0] sm:$0xff]  ;;  %v2603_v1 = vld [vmem:[#allocation7 + $0x138] sm:$0xff] }
 0x286   : > { %14287 = vst [vmem:[#allocation21_spill] sm:$0xff] %v14286_v30  ;;  %14288 = vst [vmem:[#allocation20_spill] sm:$0xff] %v11967_v11  ;;  %v11978_v52 = vsel %vm11961_vm11, %v11967_v11, 0.0  ;;  %7159 = vmatmul.mubr.msk.f32.gmra.mrb[30].mxu1 %vm11961_vm11, %v11967_v11  ;;  %vm759_vm1 = vcmp.ge.f32.partialorder %v690_v9, 0.0  ;;  %v814_v44 = vmul.f32 0.2, %v690_v9 }
 0x287   : > { %vm14289_vm7 = vmmov %vm14281_vm6  ;;  %6882 = vmatmul.mubr.msk.f32.vlgmr.msra.gmra.mrb[110].mxu0 %vm9273_vm10, %v14291_v15  ;;  %7193 = vmatprep.mubr.f32.mxu1 %v14298_v56  ;;  %v3882_v34 = vrot.slane %v11978_v52, 2  ;;  %v2600_v15 = vld [vmem:[#allocation7 + $0x120] sm:$0xff]  ;;  %v2601_v30 = vld [vmem:[#allocation7 + $0x128] sm:$0xff] }
 0x288   : > { %v11970_v51 = vsel %vm14289_vm7, %v2708_v25, %v3880_v40  ;;  %vm11983_vm15 = vmand %vm1588_vm12, %vm1643_vm9  ;;  %v14296_v25 = vld [vmem:[#allocation27_spill] sm:$0xff]  ;;  %7772 = vmatpush3.bf16.msra.mxu0 %v11227_v13  ;;  %v11995_v19 = vsel %vm759_vm1, %v690_v9, %v814_v44  ;;  %v14305_v13 = vld [vmem:[#allocation41_spill] sm:$0xff] }
 0x289   : > { %14290 = vst [vmem:[#allocation200_spill] sm:$0xff] %v11970_v51  ;;  %v14294_v10 = vsel %vm11983_vm15, 4294967295, %v14293_v10  ;;  %6884 = vmatprep.mubr.msk.f32.mxu0 %vm9332_vm3, %v14296_v25  ;;  %14299 = vst [vmem:[#allocation22_spill] sm:$0xff] %v11995_v19  ;;  %7774 = vmatprep.subr.bf16.mxu0 %v7773_v6  ;;  %v6738_v51 = vpop.f32.mrb[105].mxu0  ;;  %v12003_v25 = vsel %vm11983_vm15, %v11995_v19, 0.0  ;;  %v3869_v9 = vld [vmem:[#allocation7 + $0x2a8] sm:$0xff] }
 0x28a   : > { %14295 = vst [vmem:[#allocation24_spill] sm:$0xff] %v14294_v10  ;;  %vm14300_vm10 = vmmov %vm14281_vm6  ;;  %7194 = vmatmul.mubr.f32.vlgmr.msra.gmra.mrb[32].mxu1 %v14305_v13  ;;  %v14306_v44 = vld [vmem:[#allocation33_spill] sm:$0xff]  ;;  %v7777_v51 = vpack.c.bf16 %v2601_v30, %v2600_v15  ;;  %v13389_v10 = vrot.slane %v12003_v25, 2  ;;  %v7873_v19 = vpack.c.bf16 %v3869_v9, %v3868_v45  ;;  %v14310_v13 = vld [vmem:[#allocation35_spill] sm:$0xff] }
 0x28b   : > { %v11998_v11 = vsel %vm14300_vm10, %v3880_v40, %v3882_v34  ;;  %14302 = vst [vmem:[#allocation26_spill] sm:$0xff] %v12003_v25  ;;  %6885 = vmatmul.mubr.msk.f32.gmra.mrb[112].mxu0 %vm9378_vm0, %v14303_v14  ;;  %7868 = vmatpush3.bf16.msra.mxu1 %v10784_v39  ;;  %v14308_v40 = vld [vmem:[#allocation45_spill] sm:$0xff]  ;;  %v14309_v14 = vld [vmem:[#allocation36_spill] sm:$0xff]  ;;  %vm14311_vm3 = vnez %v14310_v13  ;;  %v3870_v39 = vld [vmem:[#allocation7 + $0x2b0] sm:$0xff] }
 0x28c   : > { %14301 = vst [vmem:[#allocation27_spill] sm:$0xff] %v11998_v11  ;;  %6887 = vmatprep.mubr.msk.f32.mxu0 %vm9428_vm5, %v14306_v44  ;;  %7196 = vmatprep.mubr.f32.mxu1 %v14308_v40  ;;  %v2602_v11 = vld [vmem:[#allocation7 + $0x130] sm:$0xff]  ;;  %vm14313_vm14 = vmmov %vm14281_vm6  ;;  %v14315_v30 = vld [vmem:[#allocation40_spill] sm:$0xff]  ;;  %v7877_v9 = vpack.c.bf16 %v3871_v53, %v3870_v39 }
 0x28d   : > { %7870 = vmatprep.subr.bf16.mxu1 %v7869_v47  ;;  %7776 = vmatpush3.bf16.msra.mxu0 %v7773_v6  ;;  %v12022_v40 = vsel %vm14313_vm14, %v3882_v34, %v13389_v10  ;;  %v14316_v15 = vld [vmem:[#allocation39_spill] sm:$0xff]  ;;  %v14318_v6 = vld [vmem:[#allocation53_spill] sm:$0xff]  ;;  %v7781_v45 = vpack.c.bf16 %v2603_v1, %v2602_v11  ;;  %v3872_v10 = vld [vmem:[#allocation7 + $0x2c0] sm:$0xff] }
 0x28e   : > { %7197 = vmatmul.mubr.f32.gmra.mrb[34].mxu1 %v14312_v42  ;;  %14314 = vst [vmem:[#allocation37_spill] sm:$0xff] %v12022_v40  ;;  %vm14317_vm8 = vnez %v14316_v15  ;;  %7778 = vmatprep.subr.bf16.mxu0 %v7777_v51  ;;  %v2604_v42 = vld [vmem:[#allocation7 + $0x140] sm:$0xff]  ;;  %v2605_v13 = vld [vmem:[#allocation7 + $0x148] sm:$0xff]  ;;  %v14320_v56 = vld [vmem:[#allocation43_spill] sm:$0xff] }
 0x28f   : > { %6888 = vmatmul.mubr.msk.f32.gmra.mrb[114].mxu0 %vm14311_vm3, %v14309_v14  ;;  %7199 = vmatprep.mubr.f32.mxu1 %v14318_v6  ;;  %v14319_v14 = vld [vmem:[#allocation44_spill] sm:$0xff]  ;;  %vm14321_vm13 = vnez %v14320_v56  ;;  %v14322_v34 = vld [vmem:[#allocation57_spill] sm:$0xff]  ;;  %v7785_v11 = vpack.c.bf16 %v2605_v13, %v2604_v42  ;;  %v2606_v1 = vld [vmem:[#allocation7 + $0x150] sm:$0xff] }
 0x290   : > { %6890 = vmatprep.mubr.msk.f32.mxu0 %vm14317_vm8, %v14315_v30  ;;  %7872 = vmatpush3.bf16.msra.mxu1 %v7869_v47  ;;  %v3873_v40 = vld [vmem:[#allocation7 + $0x2c8] sm:$0xff]  ;;  %v14323_v15 = vld [vmem:[#allocation48_spill] sm:$0xff]  ;;  %v14324_v30 = vld [vmem:[#allocation47_spill] sm:$0xff] }
 0x291   : > { %7874 = vmatprep.subr.bf16.mxu1 %v7873_v19  ;;  %7780 = vmatpush3.bf16.msra.mxu0 %v7777_v51  ;;  %vm14325_vm6 = vnez %v14324_v30  ;;  %v14326_v47 = vld [vmem:[#allocation61_spill] sm:$0xff]  ;;  %v7881_v53 = vpack.c.bf16 %v3873_v40, %v3872_v10  ;;  %v2607_v51 = vld [vmem:[#allocation7 + $0x158] sm:$0xff]  ;;  %v14327_v39 = vld [vmem:[#allocation52_spill] sm:$0xff] }
 0x292   : > { %7200 = vmatmul.mubr.f32.gmra.mrb[36].mxu1 %v14322_v34  ;;  %7782 = vmatprep.subr.bf16.mxu0 %v7781_v45  ;;  %v14328_v6 = vld [vmem:[#allocation51_spill] sm:$0xff]  ;;  %v14330_v34 = vld [vmem:[#allocation64_spill] sm:$0xff]  ;;  %v3874_v56 = vld [vmem:[#allocation7 + $0x2d0] sm:$0xff]  ;;  %v7789_v42 = vpack.c.bf16 %v2607_v51, %v2606_v1 }
 0x293   : > { %6891 = vmatmul.mubr.msk.f32.gmra.mrb[116].mxu0 %vm14321_vm13, %v14319_v14  ;;  %7202 = vmatprep.mubr.f32.mxu1 %v14326_v47  ;;  %vm14329_vm4 = vnez %v14328_v6  ;;  %v3875_v14 = vld [vmem:[#allocation7 + $0x2d8] sm:$0xff]  ;;  %v14331_v30 = vld [vmem:[#allocation56_spill] sm:$0xff]  ;;  %v2609_v40 = vld [vmem:[#allocation7 + $0x168] sm:$0xff] }
 0x294   : > { %6893 = vmatprep.mubr.msk.f32.mxu0 %vm14325_vm6, %v14323_v15  ;;  %7876 = vmatpush3.bf16.msra.mxu1 %v7873_v19  ;;  %v14332_v15 = vld [vmem:[#allocation55_spill] sm:$0xff]  ;;  %v7885_v10 = vpack.c.bf16 %v3875_v14, %v3874_v56  ;;  %v2608_v13 = vld [vmem:[#allocation7 + $0x160] sm:$0xff]  ;;  %v14343_v51 = vld [vmem:[#allocation66_spill] sm:$0xff] }
 0x295   : > { %7878 = vmatprep.subr.bf16.mxu1 %v7877_v9  ;;  %7784 = vmatpush3.bf16.msra.mxu0 %v7781_v45  ;;  %vm14333_vm12 = vnez %v14332_v15  ;;  %v14334_v19 = vld [vmem:[#allocation67_spill] sm:$0xff]  ;;  %v14335_v45 = vld [vmem:[#allocation60_spill] sm:$0xff]  ;;  %v7793_v14 = vpack.c.bf16 %v2609_v40, %v2608_v13  ;;  %v14354_v40 = vld [vmem:[#allocation82_spill] sm:$0xff] }
 0x296   : > { %7203 = vmatmul.mubr.f32.gmra.mrb[38].mxu1 %v14330_v34  ;;  %7786 = vmatprep.subr.bf16.mxu0 %v7785_v11  ;;  %v14336_v47 = vld [vmem:[#allocation59_spill] sm:$0xff]  ;;  %v14338_v34 = vld [vmem:[#allocation70_spill] sm:$0xff]  ;;  %v3876_v6 = vld [vmem:[#allocation7 + $0x2e0] sm:$0xff] }
 0x297   : > { %6894 = vmatmul.mubr.msk.f32.gmra.mrb[118].mxu0 %vm14329_vm4, %v14327_v39  ;;  %7205 = vmatprep.mubr.f32.mxu1 %v14334_v19  ;;  %vm14337_vm9 = vnez %v14336_v47  ;;  %v3877_v39 = vld [vmem:[#allocation7 + $0x2e8] sm:$0xff]  ;;  %v14339_v15 = vld [vmem:[#allocation63_spill] sm:$0xff]  ;;  %v3878_v47 = vld [vmem:[#allocation7 + $0x2f0] sm:$0xff] }
 0x298   : > { %6896 = vmatprep.mubr.msk.f32.mxu0 %vm14333_vm12, %v14331_v30  ;;  %7880 = vmatpush3.bf16.msra.mxu1 %v7877_v9  ;;  %v14340_v30 = vld [vmem:[#allocation62_spill] sm:$0xff]  ;;  %v14342_v9 = vld [vmem:[#allocation73_spill] sm:$0xff]  ;;  %v7889_v56 = vpack.c.bf16 %v3877_v39, %v3876_v6  ;;  %v2611_v1 = vld [vmem:[#allocation7 + $0x178] sm:$0xff] }
 0x299   : > { %7882 = vmatprep.subr.bf16.mxu1 %v7881_v53  ;;  %7788 = vmatpush3.bf16.msra.mxu0 %v7785_v11  ;;  %vm14341_vm7 = vnez %v14340_v30  ;;  %v2610_v11 = vld [vmem:[#allocation7 + $0x170] sm:$0xff]  ;;  %v14344_v19 = vld [vmem:[#allocation65_spill] sm:$0xff]  ;;  %v14352_v13 = vld [vmem:[#allocation71_spill] sm:$0xff] }
 0x29a   : > { %7206 = vmatmul.mubr.f32.gmra.mrb[40].mxu1 %v14338_v34  ;;  %7790 = vmatprep.subr.bf16.mxu0 %v7789_v42  ;;  %vm14345_vm1 = vnez %v14344_v19  ;;  %v14346_v34 = vld [vmem:[#allocation76_spill] sm:$0xff]  ;;  %v14347_v30 = vld [vmem:[#allocation69_spill] sm:$0xff]  ;;  %v7797_v6 = vpack.c.bf16 %v2611_v1, %v2610_v11  ;;  %vm14353_vm14 = vnez %v14352_v13  ;;  %v926_v19 = vadd.s32 416, %v9085_v58  ;;  %v14362_v1 = vld [vmem:[#allocation87_spill] sm:$0xff] }
 0x29b   : > { %6897 = vmatmul.mubr.msk.f32.gmra.mrb[120].mxu0 %vm14337_vm9, %v14335_v45  ;;  %7208 = vmatprep.mubr.f32.mxu1 %v14342_v9  ;;  %v3879_v45 = vld [vmem:[#allocation7 + $0x2f8] sm:$0xff]  ;;  %v4244_v9 = vld [vmem:[#allocation7 + $0x308] sm:$0xff]  ;;  %v14364_v13 = vld [vmem:[#allocation80_spill] sm:$0xff] }
 0x29c   : > { %6899 = vmatprep.mubr.msk.f32.mxu0 %vm14341_vm7, %v14339_v15  ;;  %7884 = vmatpush3.bf16.msra.mxu1 %v7881_v53  ;;  %v14348_v15 = vld [vmem:[#allocation68_spill] sm:$0xff]  ;;  %v14350_v53 = vld [vmem:[#allocation79_spill] sm:$0xff]  ;;  %v7893_v39 = vpack.c.bf16 %v3879_v45, %v3878_v47  ;;  %v981_v47 = vcvt.s32.f32 %v926_v19  ;;  %v14360_v11 = vld [vmem:[#allocation77_spill] sm:$0xff]  ;;  %vm14365_vm2 = vnez %v14364_v13 }
 0x29d   : > { %7886 = vmatprep.subr.bf16.mxu1 %v7885_v10  ;;  %7792 = vmatpush3.bf16.msra.mxu0 %v7789_v42  ;;  %vm14349_vm10 = vnez %v14348_v15  ;;  %v14351_v42 = vld [vmem:[#allocation72_spill] sm:$0xff]  ;;  %v14355_v15 = vld [vmem:[#allocation75_spill] sm:$0xff]  ;;  %vm14361_vm11 = vnez %v14360_v11  ;;  %v14377_v11 = vld [vmem:[#allocation89_spill] sm:$0xff] }
 0x29e   : > { %7209 = vmatmul.mubr.f32.gmra.mrb[42].mxu1 %v14346_v34  ;;  %7794 = vmatprep.subr.bf16.mxu0 %v7793_v14  ;;  %v4243_v34 = vld [vmem:[#allocation7 + $0x300] sm:$0xff] }
 0x29f   : > { %6900 = vmatmul.mubr.msk.f32.gmra.mrb[122].mxu0 %vm14345_vm1, %v14343_v51  ;;  %7211 = vmatprep.mubr.f32.mxu1 %v14350_v53  ;;  %v12069_v45 = vpack.c.bf16 %v4244_v9, %v4243_v34  ;;  %v14363_v53 = vld [vmem:[#allocation81_spill] sm:$0xff]  ;;  %v14369_v9 = vld [vmem:[#allocation83_spill] sm:$0xff]  ;;  %v14372_v13 = vld [vmem:[#allocation88_spill] sm:$0xff] }
 0x2a0   : > { %6902 = vmatprep.mubr.msk.f32.mxu0 %vm14349_vm10, %v14347_v30  ;;  %7888 = vmatpush3.bf16.msra.mxu1 %v7885_v10  ;;  %v14356_v30 = vld [vmem:[#allocation74_spill] sm:$0xff]  ;;  %v14358_v10 = vld [vmem:[#allocation84_spill] sm:$0xff]  ;;  %v14368_v34 = vld [vmem:[#allocation85_spill] sm:$0xff] }
 0x2a1   : > { %7890 = vmatprep.subr.bf16.mxu1 %v7889_v56  ;;  %7796 = vmatpush3.bf16.msra.mxu0 %v7793_v14  ;;  %vm14357_vm15 = vnez %v14356_v30  ;;  %v14359_v14 = vld [vmem:[#allocation78_spill] sm:$0xff] }
 0x2a2   : > { %7212 = vmatmul.mubr.f32.gmra.mrb[44].mxu1 %v14354_v40  ;;  %7798 = vmatprep.subr.bf16.mxu0 %v7797_v6  ;;  %v1036_v40 = vadd.f32 0.5, %v981_v47  ;;  %v14366_v30 = vld [vmem:[#allocation90_spill] sm:$0xff] }
 0x2a3   : > { %6903 = vmatmul.mubr.msk.f32.gmra.mrb[124].mxu0 %vm14353_vm14, %v14351_v42  ;;  %7214 = vmatprep.mubr.f32.mxu1 %v14358_v10 }
 0x2a4   : > { %6905 = vmatprep.mubr.msk.f32.mxu0 %vm14357_vm15, %v14355_v15  ;;  %7892 = vmatpush3.bf16.msra.mxu1 %v7889_v56  ;;  %v14367_v56 = vld [vmem:[#allocation12_spill] sm:$0xff]  ;;  %v1091_v19 = vmul.f32 0.041666668, %v1036_v40  ;;  %vm14370_vm15 = vnez %v14369_v9  ;;  %v14376_v40 = vld [vmem:[#allocation91_spill] sm:$0xff] }
 0x2a5   : > { %7894 = vmatprep.subr.bf16.mxu1 %v7893_v39  ;;  %7800 = vmatpush3.bf16.msra.mxu0 %v7797_v6  ;;  %v14371_v6 = vld [vmem:[#allocation94_spill] sm:$0xff]  ;;  %v14381_v15 = vld [vmem:[#allocation92_spill] sm:$0xff] }
 0x2a6   : > { %7215 = vmatmul.mubr.f32.gmra.mrb[46].mxu1 %v14362_v1  ;;  %7802 = vmatprep.subr.bf16.mxu0 %v14367_v56  ;;  %v695_v1 = vadd.f32 %v11327_v2, %v11993_v36  ;;  %v1146_v10 = vfloor.f32 %v1091_v19  ;;  %v14383_v2 = vld [vmem:[#allocation103_spill] sm:$0xff]  ;;  %v14384_v36 = vld [vmem:[#allocation98_spill] sm:$0xff]  ;;  %v14385_v19 = vld [vmem:[#allocation96_spill] sm:$0xff] }
 0x2a7   : > { %6906 = vmatmul.mubr.msk.f32.gmra.mrb[126].mxu0 %vm14361_vm11, %v14359_v14  ;;  %7217 = vmatprep.mubr.f32.mxu1 %v14366_v30  ;;  %vm14378_vm11 = vnez %v14377_v11  ;;  %v14379_v14 = vld [vmem:[#allocation100_spill] sm:$0xff] }
 0x2a8   : > { %6908 = vmatprep.mubr.msk.f32.mxu0 %vm14365_vm2, %v14363_v53  ;;  %7896 = vmatpush3.bf16.msra.mxu1 %v7893_v39  ;;  %v14373_v53 = vld [vmem:[#allocation86_spill] sm:$0xff]  ;;  %v14375_v39 = vld [vmem:[#allocation97_spill] sm:$0xff]  ;;  %v1201_v30 = vmul.f32 24.0, %v1146_v10  ;;  %v815_v9 = vmul.f32 0.2, %v695_v1  ;;  %vm760_vm14 = vcmp.ge.f32.partialorder %v695_v1, 0.0 }
 0x2a9   : > { %7898 = vmatprep.subr.bf16.mxu1 %v12069_v45  ;;  %vm14374_vm2 = vnez %v14373_v53  ;;  %vm1369_vm10 = vcmp.ge.f32.partialorder %v1146_v10, 1.0 }
 0x2aa   : > { %7218 = vmatmul.mubr.f32.gmra.mrb[0].mxu1 %v14371_v6  ;;  %v14380_v6 = vld [vmem:[#allocation95_spill] sm:$0xff] }
 0x2ab   : > { %6909 = vmatmul.mubr.msk.f32.gmra.mrb[128].mxu0 %vm14370_vm15, %v14368_v34  ;;  %7220 = vmatprep.mubr.f32.mxu1 %v14375_v39  ;;  %v1256_v34 = vsub.f32 %v981_v47, %v1201_v30  ;;  %vm14382_vm15 = vnez %v14381_v15  ;;  %v12103_v30 = vsel %vm760_vm14, %v695_v1, %v815_v9  ;;  %v14389_v47 = vmov 0  ;;  %v14393_v39 = vld [vmem:[#allocation99_spill] sm:$0xff]  ;;  %v14396_v1 = vld [vmem:[#allocation102_spill] sm:$0xff] }
 0x2ac   : > { %6911 = vmatprep.mubr.msk.f32.mxu0 %vm14374_vm2, %v14372_v13  ;;  %vm1424_vm2 = vcmp.le.f32.partialorder %v1146_v10, 16.0  ;;  %14388 = vst [vmem:[#allocation41_spill] sm:$0xff] %v12103_v30  ;;  %v14398_v9 = vrot.slane %v12003_v25, 2  ;;  %vm14407_vm14 = vnez %v13965_v16 }
 0x2ad   : > { %vm1479_vm1 = vmand %vm1369_vm10, %vm1424_vm2  ;;  %vm1534_vm7 = vcmp.ge.f32.partialorder %v1256_v34, 1.0  ;;  %vm1644_vm12 = vcmp.le.f32.partialorder %v1256_v34, 16.0  ;;  %vm14397_vm2 = vnez %v14396_v1  ;;  %vm14406_vm10 = vnez %v13943_v27 }
 0x2ae   : > { %7221 = vmatmul.mubr.f32.gmra.mrb[2].mxu1 %v14379_v14  ;;  %vm1589_vm9 = vmand %vm1479_vm1, %vm1534_vm7  ;;  %v14387_v14 = vld [vmem:[#allocation106_spill] sm:$0xff]  ;;  %vm14404_vm7 = vnez %v13902_v31  ;;  %vm14405_vm1 = vnez %v13922_v24 }
 0x2af   : > { %6912 = vmatmul.mubr.msk.f32.gmra.mrb[130].mxu0 %vm14378_vm11, %v14376_v40  ;;  %7223 = vmatprep.mubr.f32.mxu1 %v14383_v2  ;;  %vm14386_vm11 = vnez %v14385_v19  ;;  %vm12105_vm4 = vmand %vm1589_vm9, %vm1644_vm12  ;;  %v14392_v2 = vld [vmem:[#allocation101_spill] sm:$0xff]  ;;  %vm14399_vm12 = vcmask 1045504  }
 0x2b0   : > { %6914 = vmatprep.mubr.msk.f32.mxu0 %vm14382_vm15, %v14380_v6  ;;  %v14390_v47 = vsel %vm12105_vm4, 4294967295, %v14389_v47  ;;  %vm14394_vm15 = vnez %v14393_v39  ;;  %v12116_v10 = vsel %vm12105_vm4, %v12103_v30, 0.0  ;;  %vm14409_vm4 = vnez %v14006_v41  ;;  %v14434_v30 = vld [vmem:[#allocation165_spill] sm:$0xff] }
 0x2b1   : > { %14391 = vst [vmem:[#allocation33_spill] sm:$0xff] %v14390_v47  ;;  %v13396_v34 = vrot.slane %v12116_v10, 2  ;;  %v14431_v47 = vld [vmem:[#allocation161_spill] sm:$0xff] }
 0x2b2   : > { %7224 = vmatmul.mubr.f32.gmra.mrb[4].mxu1 %v14387_v14  ;;  %v14395_v14 = vld [vmem:[#allocation104_spill] sm:$0xff] }
 0x2b3   : > { %6915 = vmatmul.mubr.msk.f32.gmra.mrb[132].mxu0 %vm14386_vm11, %v14384_v36  ;;  %7226 = vmatprep.mubr.f32.mxu1 %v10797_v26  ;;  %v12128_v39 = vsel %vm14399_vm12, %v14398_v9, %v13396_v34  ;;  %v14401_v26 = vld [vmem:[#allocation107_spill] sm:$0xff]  ;;  %vm14408_vm12 = vnez %v13987_v55  ;;  %v14411_v9 = vld [vmem:[#allocation136_spill] sm:$0xff]  ;;  %v14413_v34 = vld [vmem:[#allocation141_spill] sm:$0xff] }
 0x2b4   : > { %6917 = vmatprep.mubr.msk.f32.mxu0 %vm14394_vm15, %v14392_v2  ;;  %14400 = vst [vmem:[#allocation45_spill] sm:$0xff] %v12128_v39  ;;  %v14402_v2 = vld [vmem:[#allocation105_spill] sm:$0xff]  ;;  %v14414_v39 = vld [vmem:[#allocation139_spill] sm:$0xff] }
 0x2b5   : > { %vm14403_vm9 = vnez %v14402_v2  ;;  %v14581_v2 = vrot.slane %v12116_v10, 2 }
 0x2b6   : > { %7227 = vmatmul.mubr.f32.gmra.mrb[6].mxu1 %v10862_v63  ;;  %v14428_v63 = vld [vmem:[#allocation157_spill] sm:$0xff] }
 0x2b7   : > { %6918 = vmatmul.mubr.msk.f32.gmra.mrb[134].mxu0 %vm14397_vm2, %v14395_v14  ;;  %7229 = vmatprep.mubr.f32.mxu1 %v10924_v0  ;;  %v14427_v0 = vld [vmem:[#allocation164_spill] sm:$0xff] }
 0x2b8   : > { %6920 = vmatprep.mubr.msk.f32.mxu0 %vm14403_vm9, %v14401_v26 }
 0x2ba   : > { %7230 = vmatmul.mubr.f32.gmra.mrb[8].mxu1 %v10982_v61  ;;  %v14424_v61 = vld [vmem:[#allocation153_spill] sm:$0xff] }
 0x2bb   : > { %6921 = vmatmul.mubr.msk.f32.gmra.mrb[136].mxu0 %vm14404_vm7, %v10800_v8  ;;  %7232 = vmatprep.mubr.f32.mxu1 %v11040_v54  ;;  %v14423_v54 = vld [vmem:[#allocation160_spill] sm:$0xff] }
 0x2bc   : > { %6923 = vmatprep.mubr.msk.f32.mxu0 %vm14405_vm1, %v10865_v23 }
 0x2be   : > { %7233 = vmatmul.mubr.f32.gmra.mrb[10].mxu1 %v11101_v21  ;;  %v14420_v21 = vld [vmem:[#allocation149_spill] sm:$0xff] }
 0x2bf   : > { %6924 = vmatmul.mubr.msk.f32.gmra.mrb[138].mxu0 %vm14406_vm10, %v10926_v4  ;;  %7235 = vmatprep.mubr.f32.mxu1 %v11156_v3  ;;  %vm14410_vm10 = vnez %v14022_v43  ;;  %v14419_v3 = vld [vmem:[#allocation156_spill] sm:$0xff] }
 0x2c0   : > { %6926 = vmatprep.mubr.msk.f32.mxu0 %vm14407_vm14, %v10984_v17  ;;  %vm14412_vm14 = vnez %v14411_v9 }
 0x2c2   : > { %7236 = vmatmul.mubr.f32.gmra.mrb[12].mxu1 %v11213_v7  ;;  %v14416_v7 = vld [vmem:[#allocation145_spill] sm:$0xff] }
 0x2c3   : > { %6927 = vmatmul.mubr.msk.f32.gmra.mrb[140].mxu0 %vm14408_vm12, %v11042_v12  ;;  %7238 = vmatprep.mubr.f32.mxu1 %v11270_v37  ;;  %vm14415_vm12 = vnez %v14414_v39  ;;  %v14417_v37 = vld [vmem:[#allocation143_spill] sm:$0xff] }
 0x2c4   : > { %6929 = vmatprep.mubr.msk.f32.mxu0 %vm14409_vm4, %v11103_v33  ;;  %vm14418_vm4 = vnez %v14417_v37 }
 0x2c6   : > { %7239 = vmatmul.mubr.f32.gmra.mrb[14].mxu1 %v11331_v22  ;;  %v14421_v22 = vld [vmem:[#allocation147_spill] sm:$0xff] }
 0x2c7   : > { %6930 = vmatmul.mubr.msk.f32.gmra.mrb[142].mxu0 %vm14410_vm10, %v11158_v60  ;;  %7241 = vmatprep.mubr.f32.mxu1 %v11386_v29  ;;  %vm14422_vm10 = vnez %v14421_v22  ;;  %v14425_v29 = vld [vmem:[#allocation151_spill] sm:$0xff] }
 0x2c8   : > { %6932 = vmatprep.mubr.msk.f32.mxu0 %vm14412_vm14, %v11216_v46  ;;  %vm14426_vm14 = vnez %v14425_v29  ;;  %v14437_v29 = vld [vmem:[#allocation169_spill] sm:$0xff] }
 0x2ca   : > { %7242 = vmatmul.mubr.f32.gmra.mrb[16].mxu1 %v11440_v38  ;;  %v14429_v38 = vld [vmem:[#allocation155_spill] sm:$0xff] }
 0x2cb   : > { %6933 = vmatmul.mubr.msk.f32.gmra.mrb[144].mxu0 %vm14415_vm12, %v14413_v34  ;;  %7244 = vmatprep.mubr.f32.mxu1 %v14419_v3  ;;  %vm14430_vm12 = vnez %v14429_v38  ;;  %v14432_v3 = vld [vmem:[#allocation159_spill] sm:$0xff]  ;;  %v14440_v38 = vld [vmem:[#allocation173_spill] sm:$0xff] }
 0x2cc   : > { %6935 = vmatprep.mubr.msk.f32.mxu0 %vm14418_vm4, %v14416_v7  ;;  %vm14433_vm4 = vnez %v14432_v3  ;;  %v14443_v3 = vld [vmem:[#allocation177_spill] sm:$0xff] }
 0x2ce   : > { %7245 = vmatmul.mubr.f32.gmra.mrb[18].mxu1 %v14423_v54  ;;  %v14435_v54 = vld [vmem:[#allocation163_spill] sm:$0xff] }
 0x2cf   : > { %6936 = vmatmul.mubr.msk.f32.gmra.mrb[146].mxu0 %vm14422_vm10, %v14420_v21  ;;  %7247 = vmatprep.mubr.f32.mxu1 %v14427_v0  ;;  %vm14436_vm10 = vnez %v14435_v54  ;;  %v14438_v0 = vld [vmem:[#allocation167_spill] sm:$0xff] }
 0x2d0   : > { %6938 = vmatprep.mubr.msk.f32.mxu0 %vm14426_vm14, %v14424_v61  ;;  %vm14439_vm14 = vnez %v14438_v0  ;;  %v14446_v54 = vld [vmem:[#allocation179_spill] sm:$0xff] }
 0x2d2   : > { %7248 = vmatmul.mubr.f32.gmra.mrb[20].mxu1 %v11650_v18  ;;  %v14441_v18 = vld [vmem:[#allocation171_spill] sm:$0xff] }
 0x2d3   : > { %6939 = vmatmul.mubr.msk.f32.gmra.mrb[148].mxu0 %vm14430_vm12, %v14428_v63  ;;  %7250 = vmatprep.mubr.f32.mxu1 %v11692_v5  ;;  %vm14442_vm12 = vnez %v14441_v18  ;;  %v14444_v5 = vld [vmem:[#allocation175_spill] sm:$0xff]  ;;  %v3503_v18 = vrot.slane %v11978_v52, 1 }
 0x2d4   : > { %6941 = vmatprep.mubr.msk.f32.mxu0 %vm14433_vm4, %v14431_v47  ;;  %vm14445_vm4 = vnez %v14444_v5  ;;  %v14451_v5 = vld [vmem:[#allocation28_spill] sm:$0xff] }
 0x2d6   : > { %7251 = vmatmul.mubr.f32.gmra.mrb[22].mxu1 %v11737_v50  ;;  %v3501_v50 = vrot.slane %v11947_v62, 1  ;;  %v2616_v62 = vrot.slane %v14451_v5, 2 }
 0x2d7   : > { %6942 = vmatmul.mubr.msk.f32.gmra.mrb[150].mxu0 %vm14436_vm10, %v14434_v30  ;;  %7253 = vmatprep.mubr.f32.mxu1 %v11781_v49  ;;  %vm14447_vm10 = vnez %v14446_v54  ;;  %v14448_v49 = vld [vmem:[#allocation25_spill] sm:$0xff] }
 0x2d8   : > { %6944 = vmatprep.mubr.msk.f32.mxu0 %vm14439_vm14, %v14437_v29  ;;  %v2614_v0 = vrot.slane %v14448_v49, 2  ;;  %v14456_v49 = vld [vmem:[#allocation189_spill] sm:$0xff] }
 0x2da   : > { %7254 = vmatmul.mubr.f32.gmra.mrb[24].mxu1 %v11823_v20  ;;  %v14450_v20 = vld [vmem:[#allocation23_spill] sm:$0xff] }
 0x2db   : > { %6945 = vmatmul.mubr.msk.f32.gmra.mrb[152].mxu0 %vm14442_vm12, %v14440_v38  ;;  %7256 = vmatprep.mubr.f32.mxu1 %v11862_v48  ;;  %vm14449_vm12 = vnez %v14234_v28  ;;  %v2613_v48 = vrot.slane %v14450_v20, 2  ;;  %v14462_v20 = vld [vmem:[#allocation31_spill] sm:$0xff]  ;;  %v14463_v28 = vld [vmem:[#allocation34_spill] sm:$0xff] }
 0x2dc   : > { %6947 = vmatprep.mubr.msk.f32.mxu0 %vm14445_vm4, %v14443_v3  ;;  %v14452_v3 = vld [vmem:[#allocation195_spill] sm:$0xff]  ;;  %vm14454_vm4 = vcmask 1046528   ;;  %v2618_v5 = vrot.slane %v14462_v20, 2 }
 0x2dd   : > { %v14453_v38 = vrot.slane %v14452_v3, 1  ;;  %vm14460_vm14 = vmmov %vm14454_vm4  ;;  %v2620_v3 = vrot.slane %v14463_v28, 2 }
 0x2de   : > { %7257 = vmatmul.mubr.f32.gmra.mrb[26].mxu1 %v11899_v59 }
 0x2df   : > { %6948 = vmatmul.mubr.msk.f32.gmra.mrb[154].mxu0 %vm14447_vm10, %v11783_v57  ;;  %7259 = vmatprep.mubr.f32.mxu1 %v11939_v35  ;;  %v12222_v54 = vsel %vm14454_vm4, %v14453_v38, %v3501_v50  ;;  %v14457_v57 = vld [vmem:[#allocation187_spill] sm:$0xff]  ;;  %v12231_v35 = vsel %vm14460_vm14, %v3501_v50, %v3503_v18  ;;  %v14464_v38 = vld [vmem:[#allocation38_spill] sm:$0xff] }
 0x2e0   : > { %6950 = vmatprep.mubr.msk.f32.mxu0 %vm14449_vm12, %v11825_v32  ;;  %14455 = vst [vmem:[#allocation66_spill] sm:$0xff] %v12222_v54  ;;  %vm14458_vm10 = vnez %v14457_v57  ;;  %vm14459_vm12 = vcmask 1045504   ;;  %14461 = vst [vmem:[#allocation72_spill] sm:$0xff] %v12231_v35  ;;  %v2622_v59 = vrot.slane %v14464_v38, 2  ;;  %v14466_v57 = vrot.slane %v12003_v25, 1  ;;  %v14473_v25 = vld [vmem:[#allocation13_spill] sm:$0xff] }
 0x2e1   : > { %v2615_v52 = vsel %vm14459_vm12, %v2613_v48, %v2614_v0  ;;  %vm14465_vm4 = vmmov %vm14459_vm12  ;;  %v4245_v48 = vld [vmem:[#allocation7 + $0x310] sm:$0xff] }
 0x2e2   : > { %7260 = vmatmul.mubr.f32.gmra.mrb[28].mxu1 %v12222_v54  ;;  %v2617_v32 = vsel %vm14465_vm4, %v2614_v0, %v2616_v62  ;;  %vm14470_vm12 = vmmov %vm14465_vm4  ;;  %v2623_v0 = vsel %vm14465_vm4, %v2620_v3, %v2622_v59 }
 0x2e3   : > { %6951 = vmatmul.mubr.msk.f32.gmra.mrb[156].mxu0 %vm14458_vm10, %v14456_v49  ;;  %7262 = vmatprep.mubr.f32.mxu1 %v12231_v35  ;;  %vm14467_vm10 = vmmov %vm14460_vm14  ;;  %v4246_v49 = vld [vmem:[#allocation7 + $0x318] sm:$0xff]  ;;  %v2621_v28 = vsel %vm14470_vm12, %v2618_v5, %v2620_v3  ;;  %v4248_v35 = vld [vmem:[#allocation7 + $0x328] sm:$0xff] }
 0x2e4   : > { %6985 = vmatprep.mubr.f32.mxu0 %v2615_v52  ;;  %v12241_v54 = vsel %vm14467_vm10, %v3503_v18, %v14466_v57  ;;  %vm14469_vm14 = vmmov %vm14465_vm4  ;;  %v14471_v52 = vld [vmem:[#allocation42_spill] sm:$0xff]  ;;  %v7901_v38 = vpack.c.bf16 %v4246_v49, %v4245_v48 }
 0x2e5   : > { %14468 = vst [vmem:[#allocation12_spill] sm:$0xff] %v12241_v54  ;;  %v2619_v50 = vsel %vm14469_vm14, %v2616_v62, %v2618_v5  ;;  %v2624_v20 = vrot.slane %v14471_v52, 2  ;;  %v14472_v18 = vld [vmem:[#allocation46_spill] sm:$0xff]  ;;  %v4247_v62 = vld [vmem:[#allocation7 + $0x320] sm:$0xff]  ;;  %vm14475_vm10 = vmmov %vm14465_vm4 }
 0x2e6   : > { %7263 = vmatmul.mubr.f32.gmra.mrb[30].mxu1 %v12241_v54  ;;  %v2626_v57 = vrot.slane %v14472_v18, 2  ;;  %vm14476_vm14 = vmmov %vm14465_vm4  ;;  %v14477_v49 = vld [vmem:[#allocation54_spill] sm:$0xff]  ;;  %v7905_v48 = vpack.c.bf16 %v4248_v35, %v4247_v62  ;;  %v4251_v18 = vld [vmem:[#allocation7 + $0x340] sm:$0xff] }
 0x2e7   : > { %6986 = vmatmul.mubr.f32.vlgmr.msra.gmra.mrb[110].mxu0 %v2617_v32  ;;  %7297 = vmatprep.mubr.f32.mxu1 %v2621_v28  ;;  %v14474_v32 = vld [vmem:[#allocation50_spill] sm:$0xff]  ;;  %v2625_v5 = vsel %vm14475_vm10, %v2622_v59, %v2624_v20  ;;  %v2630_v3 = vrot.slane %v14477_v49, 2  ;;  %vm14478_vm12 = vmmov %vm14465_vm4  ;;  %v14486_v49 = vld [vmem:[#allocation109_spill] sm:$0xff] }
 0x2e8   : > { %6988 = vmatprep.mubr.f32.mxu0 %v2619_v50  ;;  %7804 = vmatpush3.bf16.msra.mxu0 %v14367_v56  ;;  %v2628_v54 = vrot.slane %v14474_v32, 2  ;;  %v12255_v56 = vsel %vm14476_vm14, %v2624_v20, %v2626_v57  ;;  %v14479_v59 = vld [vmem:[#allocation14_spill] sm:$0xff]  ;;  %vm14482_vm10 = vmmov %vm14465_vm4  ;;  %v14485_v32 = vld [vmem:[#allocation108_spill] sm:$0xff] }
 0x2e9   : > { %7806 = vmatprep.subr.bf16.mxu0 %v14473_v25  ;;  %v4253_v62 = vld [vmem:[#allocation7 + $0x350] sm:$0xff] }
 0x2ea   : > { %7298 = vmatmul.mubr.f32.vlgmr.msra.gmra.mrb[32].mxu1 %v2623_v0  ;;  %v12261_v50 = vsel %vm14478_vm12, %v2626_v57, %v2628_v54  ;;  %v12267_v52 = vsel %vm14465_vm4, %v2628_v54, %v2630_v3  ;;  %v14484_v54 = vld [vmem:[#allocation15_spill] sm:$0xff] }
 0x2eb   : > { %6989 = vmatmul.mubr.f32.gmra.mrb[112].mxu0 %v2621_v28  ;;  %7900 = vmatpush3.bf16.msra.mxu1 %v12069_v45  ;;  %v4249_v45 = vld [vmem:[#allocation7 + $0x330] sm:$0xff]  ;;  %v4250_v28 = vld [vmem:[#allocation7 + $0x338] sm:$0xff] }
 0x2ec   : > { %6991 = vmatprep.mubr.f32.mxu0 %v2623_v0  ;;  %7300 = vmatprep.mubr.f32.mxu1 %v2625_v5  ;;  %v7909_v35 = vpack.c.bf16 %v4250_v28, %v4249_v45  ;;  %v14488_v45 = vld [vmem:[#allocation111_spill] sm:$0xff]  ;;  %v4255_v28 = vld [vmem:[#allocation7 + $0x360] sm:$0xff] }
 0x2ed   : > { %7902 = vmatprep.subr.bf16.mxu1 %v7901_v38  ;;  %7808 = vmatpush3.bf16.msra.mxu0 %v14473_v25  ;;  %v14480_v25 = vld [vmem:[#allocation58_spill] sm:$0xff] }
 0x2ee   : > { %7301 = vmatmul.mubr.f32.gmra.mrb[34].mxu1 %v12255_v56  ;;  %7810 = vmatprep.subr.bf16.mxu0 %v14479_v59  ;;  %v14481_v20 = vrot.slane %v14480_v25, 2  ;;  %v14489_v25 = vld [vmem:[#allocation112_spill] sm:$0xff] }
 0x2ef   : > { %6992 = vmatmul.mubr.f32.gmra.mrb[114].mxu0 %v2625_v5  ;;  %7303 = vmatprep.mubr.f32.mxu1 %v12261_v50  ;;  %v4254_v5 = vld [vmem:[#allocation7 + $0x358] sm:$0xff] }
 0x2f0   : > { %6994 = vmatprep.mubr.f32.mxu0 %v12255_v56  ;;  %7904 = vmatpush3.bf16.msra.mxu1 %v7901_v38  ;;  %v12275_v0 = vsel %vm14482_vm10, %v2630_v3, %v14481_v20  ;;  %v4252_v38 = vld [vmem:[#allocation7 + $0x348] sm:$0xff]  ;;  %v14487_v3 = vld [vmem:[#allocation16_spill] sm:$0xff] }
 0x2f1   : > { %7906 = vmatprep.subr.bf16.mxu1 %v7905_v48  ;;  %7812 = vmatpush3.bf16.msra.mxu0 %v14479_v59  ;;  %14483 = vst [vmem:[#allocation88_spill] sm:$0xff] %v12275_v0  ;;  %v7913_v57 = vpack.c.bf16 %v4252_v38, %v4251_v18  ;;  %v4256_v59 = vld [vmem:[#allocation7 + $0x368] sm:$0xff]  ;;  %v4257_v38 = vld [vmem:[#allocation7 + $0x370] sm:$0xff] }
 0x2f2   : > { %7304 = vmatmul.mubr.f32.gmra.mrb[36].mxu1 %v12267_v52  ;;  %7814 = vmatprep.subr.bf16.mxu0 %v14484_v54  ;;  %v14490_v20 = vld [vmem:[#allocation17_spill] sm:$0xff] }
 0x2f3   : > { %6995 = vmatmul.mubr.f32.gmra.mrb[116].mxu0 %v12261_v50  ;;  %7306 = vmatprep.mubr.f32.mxu1 %v12275_v0  ;;  %v14491_v18 = vld [vmem:[#allocation113_spill] sm:$0xff] }
 0x2f4   : > { %6997 = vmatprep.mubr.f32.mxu0 %v12267_v52  ;;  %7908 = vmatpush3.bf16.msra.mxu1 %v7905_v48  ;;  %v7917_v48 = vpack.c.bf16 %v4254_v5, %v4253_v62  ;;  %v14492_v62 = vld [vmem:[#allocation114_spill] sm:$0xff] }
 0x2f5   : > { %7910 = vmatprep.subr.bf16.mxu1 %v7909_v35  ;;  %7816 = vmatpush3.bf16.msra.mxu0 %v14484_v54  ;;  %v4258_v54 = vld [vmem:[#allocation7 + $0x378] sm:$0xff]  ;;  %v14493_v5 = vld [vmem:[#allocation18_spill] sm:$0xff] }
 0x2f6   : > { %7307 = vmatmul.mubr.f32.gmra.mrb[38].mxu1 %v14485_v32  ;;  %7818 = vmatprep.subr.bf16.mxu0 %v14487_v3 }
 0x2f7   : > { %6998 = vmatmul.mubr.f32.gmra.mrb[118].mxu0 %v12275_v0  ;;  %7309 = vmatprep.mubr.f32.mxu1 %v14486_v49  ;;  %v4995_v0 = vld [vmem:[#allocation7 + $0x400] sm:$0xff] }
 0x2f8   : > { %7000 = vmatprep.mubr.f32.mxu0 %v14485_v32  ;;  %7912 = vmatpush3.bf16.msra.mxu1 %v7909_v35  ;;  %v7921_v35 = vpack.c.bf16 %v4256_v59, %v4255_v28  ;;  %v4613_v28 = vld [vmem:[#allocation7 + $0x380] sm:$0xff]  ;;  %v4614_v59 = vld [vmem:[#allocation7 + $0x388] sm:$0xff] }
 0x2f9   : > { %7914 = vmatprep.subr.bf16.mxu1 %v7913_v57  ;;  %7820 = vmatpush3.bf16.msra.mxu0 %v14487_v3  ;;  %v14494_v3 = vld [vmem:[#allocation116_spill] sm:$0xff] }
 0x2fa   : > { %7310 = vmatmul.mubr.f32.gmra.mrb[40].mxu1 %v14488_v45  ;;  %7822 = vmatprep.subr.bf16.mxu0 %v14490_v20  ;;  %v14556_v32 = vld [vmem:[#allocation68_spill] sm:$0xff] }
 0x2fb   : > { %7001 = vmatmul.mubr.f32.gmra.mrb[120].mxu0 %v14486_v49  ;;  %7312 = vmatprep.mubr.f32.mxu1 %v14489_v25 }
 0x2fc   : > { %7003 = vmatprep.mubr.f32.mxu0 %v14488_v45  ;;  %7916 = vmatpush3.bf16.msra.mxu1 %v7913_v57  ;;  %v7925_v57 = vpack.c.bf16 %v4258_v54, %v4257_v38  ;;  %v14497_v38 = vld [vmem:[#allocation118_spill] sm:$0xff]  ;;  %v14498_v54 = vld [vmem:[#allocation119_spill] sm:$0xff]  ;;  %v14539_v45 = vld [vmem:[#allocation48_spill] sm:$0xff] }
 0x2fd   : > { %7918 = vmatprep.subr.bf16.mxu1 %v7917_v48  ;;  %7824 = vmatpush3.bf16.msra.mxu0 %v14490_v20  ;;  %v14495_v20 = vld [vmem:[#allocation117_spill] sm:$0xff] }
 0x2fe   : > { %7313 = vmatmul.mubr.f32.gmra.mrb[42].mxu1 %v14491_v18  ;;  %7826 = vmatprep.subr.bf16.mxu0 %v14493_v5 }
 0x2ff   : > { %7004 = vmatmul.mubr.f32.gmra.mrb[122].mxu0 %v14489_v25  ;;  %7315 = vmatprep.mubr.f32.mxu1 %v14492_v62  ;;  %v14532_v25 = vld [vmem:[#allocation37_spill] sm:$0xff] }
 0x300   : > { %7006 = vmatprep.mubr.f32.mxu0 %v14491_v18  ;;  %7920 = vmatpush3.bf16.msra.mxu1 %v7917_v48  ;;  %v14496_v18 = vld [vmem:[#allocation19_spill] sm:$0xff]  ;;  %v12305_v48 = vpack.c.bf16 %v4614_v59, %v4613_v28  ;;  %v14502_v28 = vld [vmem:[#allocation124_spill] sm:$0xff] }
 0x301   : > { %7922 = vmatprep.subr.bf16.mxu1 %v7921_v35  ;;  %7828 = vmatpush3.bf16.msra.mxu0 %v14493_v5  ;;  %v14501_v5 = vld [vmem:[#allocation123_spill] sm:$0xff] }
 0x302   : > { %7316 = vmatmul.mubr.f32.gmra.mrb[44].mxu1 %v14494_v3  ;;  %7830 = vmatprep.subr.bf16.mxu0 %v14496_v18  ;;  %v14504_v59 = vld [vmem:[#allocation127_spill] sm:$0xff] }
 0x303   : > { %7007 = vmatmul.mubr.f32.gmra.mrb[124].mxu0 %v14492_v62  ;;  %7318 = vmatprep.mubr.f32.mxu1 %v14495_v20  ;;  %v4616_v62 = vld [vmem:[#allocation7 + $0x398] sm:$0xff] }
 0x304   : > { %7009 = vmatprep.mubr.f32.mxu0 %v14494_v3  ;;  %7924 = vmatpush3.bf16.msra.mxu1 %v7921_v35  ;;  %v14499_v35 = vld [vmem:[#allocation121_spill] sm:$0xff]  ;;  %v14530_v3 = vld [vmem:[#allocation27_spill] sm:$0xff] }
 0x305   : > { %7926 = vmatprep.subr.bf16.mxu1 %v7925_v57  ;;  %7832 = vmatpush3.bf16.msra.mxu0 %v14496_v18  ;;  %v14500_v18 = vld [vmem:[#allocation122_spill] sm:$0xff] }
 0x306   : > { %7319 = vmatmul.mubr.f32.gmra.mrb[46].mxu1 %v14497_v38 }
 0x307   : > { %7010 = vmatmul.mubr.f32.gmra.mrb[126].mxu0 %v14495_v20  ;;  %7321 = vmatprep.mubr.f32.mxu1 %v14498_v54  ;;  %v14509_v20 = vld [vmem:[#allocation134_spill] sm:$0xff] }
 0x308   : > { %7012 = vmatprep.mubr.f32.mxu0 %v14497_v38  ;;  %7928 = vmatpush3.bf16.msra.mxu1 %v7925_v57  ;;  %v14503_v57 = vld [vmem:[#allocation126_spill] sm:$0xff] }
 0x309   : > { %7930 = vmatprep.subr.bf16.mxu1 %v12305_v48 }
 0x30a   : > { %7322 = vmatmul.mubr.f32.gmra.mrb[0].mxu1 %v14499_v35 }
 0x30b   : > { %7013 = vmatmul.mubr.f32.gmra.mrb[128].mxu0 %v14498_v54  ;;  %7324 = vmatprep.mubr.f32.mxu1 %v14500_v18  ;;  %v12328_v54 = vpop.f32.mrb[106].mxu0 }
 0x30c   : > { %7015 = vmatprep.mubr.f32.mxu0 %v14499_v35  ;;  %v14505_v35 = vld [vmem:[#allocation128_spill] sm:$0xff] }
 0x30e   : > { %7325 = vmatmul.mubr.f32.gmra.mrb[2].mxu1 %v14501_v5 }
 0x30f   : > { %7016 = vmatmul.mubr.f32.gmra.mrb[130].mxu0 %v14500_v18  ;;  %7327 = vmatprep.mubr.f32.mxu1 %v14502_v28  ;;  %v14506_v18 = vld [vmem:[#allocation129_spill] sm:$0xff] }
 0x310   : > { %7018 = vmatprep.mubr.f32.mxu0 %v14501_v5  ;;  %v6741_v5 = vpop.f32.mrb[107].mxu0 }
 0x311   : > { %v12334_v38 = vpop.f32.mrb[108].mxu0  ;;  %v14511_v5 = vld [vmem:[#allocation138_spill] sm:$0xff] }
 0x312   : > { %7328 = vmatmul.mubr.f32.gmra.mrb[4].mxu1 %v14503_v57 }
 0x313   : > { %7019 = vmatmul.mubr.f32.gmra.mrb[132].mxu0 %v14502_v28  ;;  %7330 = vmatprep.mubr.f32.mxu1 %v14504_v59  ;;  %v14507_v28 = vld [vmem:[#allocation131_spill] sm:$0xff] }
 0x314   : > { %7021 = vmatprep.mubr.f32.mxu0 %v14503_v57  ;;  %v14508_v57 = vld [vmem:[#allocation132_spill] sm:$0xff] }
 0x316   : > { %7331 = vmatmul.mubr.f32.gmra.mrb[6].mxu1 %v14505_v35 }
 0x317   : > { %7022 = vmatmul.mubr.f32.gmra.mrb[134].mxu0 %v14504_v59  ;;  %7333 = vmatprep.mubr.f32.mxu1 %v14506_v18  ;;  %v6744_v59 = vpop.f32.mrb[109].mxu0 }
 0x318   : > { %7024 = vmatprep.mubr.f32.mxu0 %v14505_v35  ;;  %v14510_v35 = vld [vmem:[#allocation135_spill] sm:$0xff]  ;;  %v14514_v59 = vld [vmem:[#allocation150_spill] sm:$0xff] }
 0x31a   : > { %7334 = vmatmul.mubr.f32.gmra.mrb[8].mxu1 %v14507_v28 }
 0x31b   : > { %7025 = vmatmul.mubr.f32.gmra.mrb[136].mxu0 %v14506_v18  ;;  %7336 = vmatprep.mubr.f32.mxu1 %v14508_v57  ;;  %v14513_v18 = vld [vmem:[#allocation146_spill] sm:$0xff] }
 0x31c   : > { %7027 = vmatprep.mubr.f32.mxu0 %v14507_v28  ;;  %v14512_v28 = vld [vmem:[#allocation142_spill] sm:$0xff] }
 0x31e   : > { %7337 = vmatmul.mubr.f32.gmra.mrb[10].mxu1 %v14509_v20 }
 0x31f   : > { %7028 = vmatmul.mubr.f32.gmra.mrb[138].mxu0 %v14508_v57  ;;  %7339 = vmatprep.mubr.f32.mxu1 %v14510_v35  ;;  %v14528_v57 = vld [vmem:[#allocation30_spill] sm:$0xff] }
 0x320   : > { %7030 = vmatprep.mubr.f32.mxu0 %v14509_v20  ;;  %v14515_v20 = vld [vmem:[#allocation154_spill] sm:$0xff] }
 0x322   : > { %7340 = vmatmul.mubr.f32.gmra.mrb[12].mxu1 %v14511_v5 }
 0x323   : > { %7031 = vmatmul.mubr.f32.gmra.mrb[140].mxu0 %v14510_v35  ;;  %7342 = vmatprep.mubr.f32.mxu1 %v14512_v28  ;;  %v14516_v35 = vld [vmem:[#allocation158_spill] sm:$0xff] }
 0x324   : > { %7033 = vmatprep.mubr.f32.mxu0 %v14511_v5  ;;  %v14517_v5 = vld [vmem:[#allocation162_spill] sm:$0xff] }
 0x326   : > { %7343 = vmatmul.mubr.f32.gmra.mrb[14].mxu1 %v14513_v18 }
 0x327   : > { %7034 = vmatmul.mubr.f32.gmra.mrb[142].mxu0 %v14512_v28  ;;  %7345 = vmatprep.mubr.f32.mxu1 %v14514_v59  ;;  %v14518_v28 = vld [vmem:[#allocation166_spill] sm:$0xff] }
 0x328   : > { %7036 = vmatprep.mubr.f32.mxu0 %v14513_v18  ;;  %v14519_v18 = vld [vmem:[#allocation170_spill] sm:$0xff] }
 0x32a   : > { %7346 = vmatmul.mubr.f32.gmra.mrb[16].mxu1 %v14515_v20 }
 0x32b   : > { %7037 = vmatmul.mubr.f32.gmra.mrb[144].mxu0 %v14514_v59  ;;  %7348 = vmatprep.mubr.f32.mxu1 %v14516_v35  ;;  %v14520_v59 = vld [vmem:[#allocation174_spill] sm:$0xff] }
 0x32c   : > { %7039 = vmatprep.mubr.f32.mxu0 %v14515_v20  ;;  %v14521_v20 = vld [vmem:[#allocation178_spill] sm:$0xff] }
 0x32e   : > { %7349 = vmatmul.mubr.f32.gmra.mrb[18].mxu1 %v14517_v5 }
 0x32f   : > { %7040 = vmatmul.mubr.f32.gmra.mrb[146].mxu0 %v14516_v35  ;;  %7351 = vmatprep.mubr.f32.mxu1 %v14518_v28  ;;  %v14522_v35 = vld [vmem:[#allocation182_spill] sm:$0xff] }
 0x330   : > { %7042 = vmatprep.mubr.f32.mxu0 %v14517_v5  ;;  %v14523_v5 = vld [vmem:[#allocation186_spill] sm:$0xff] }
 0x332   : > { %7352 = vmatmul.mubr.f32.gmra.mrb[20].mxu1 %v14519_v18 }
 0x333   : > { %7043 = vmatmul.mubr.f32.gmra.mrb[148].mxu0 %v14518_v28  ;;  %7354 = vmatprep.mubr.f32.mxu1 %v14520_v59  ;;  %v14524_v28 = vld [vmem:[#allocation190_spill] sm:$0xff] }
 0x334   : > { %7045 = vmatprep.mubr.f32.mxu0 %v14519_v18  ;;  %v14525_v18 = vld [vmem:[#allocation194_spill] sm:$0xff] }
 0x336   : > { %7355 = vmatmul.mubr.f32.gmra.mrb[22].mxu1 %v14521_v20 }
 0x337   : > { %7046 = vmatmul.mubr.f32.gmra.mrb[150].mxu0 %v14520_v59  ;;  %7357 = vmatprep.mubr.f32.mxu1 %v14522_v35  ;;  %v14526_v59 = vld [vmem:[#allocation199_spill] sm:$0xff] }
 0x338   : > { %7048 = vmatprep.mubr.f32.mxu0 %v14521_v20  ;;  %v14527_v20 = vld [vmem:[#allocation200_spill] sm:$0xff] }
 0x33a   : > { %7358 = vmatmul.mubr.f32.gmra.mrb[24].mxu1 %v14523_v5 }
 0x33b   : > { %7049 = vmatmul.mubr.f32.gmra.mrb[152].mxu0 %v14522_v35  ;;  %7360 = vmatprep.mubr.f32.mxu1 %v14524_v28 }
 0x33c   : > { %7051 = vmatprep.mubr.f32.mxu0 %v14523_v5  ;;  %v4615_v5 = vld [vmem:[#allocation7 + $0x390] sm:$0xff] }
 0x33d   : > { %v7933_v35 = vpack.c.bf16 %v4616_v62, %v4615_v5  ;;  %v14542_v5 = vld [vmem:[#allocation51_spill] sm:$0xff]  ;;  %v4621_v62 = vld [vmem:[#allocation7 + $0x3c0] sm:$0xff] }
 0x33e   : > { %7361 = vmatmul.mubr.f32.gmra.mrb[26].mxu1 %v14525_v18 }
 0x33f   : > { %7052 = vmatmul.mubr.f32.gmra.mrb[154].mxu0 %v14524_v28  ;;  %7363 = vmatprep.mubr.f32.mxu1 %v14526_v59  ;;  %v4618_v28 = vld [vmem:[#allocation7 + $0x3a8] sm:$0xff] }
 0x340   : > { %7054 = vmatprep.mubr.f32.mxu0 %v14525_v18  ;;  %v14533_v18 = vld [vmem:[#allocation36_spill] sm:$0xff] }
 0x342   : > { %7364 = vmatmul.mubr.f32.gmra.mrb[28].mxu1 %v14527_v20 }
 0x343   : > { %7055 = vmatmul.mubr.f32.gmra.mrb[156].mxu0 %v14526_v59  ;;  %7366 = vmatprep.mubr.f32.mxu1 %v14530_v3  ;;  %v14535_v59 = vld [vmem:[#allocation40_spill] sm:$0xff] }
 0x344   : > { %7089 = vmatprep.mubr.msk.f32.mxu0 %vm9378_vm0, %v14528_v57  ;;  %v14537_v57 = vld [vmem:[#allocation44_spill] sm:$0xff]  ;;  %vm14543_vm0 = vnez %v14542_v5 }
 0x345   : > { %v14544_v3 = vld [vmem:[#allocation56_spill] sm:$0xff] }
 0x346   : > { %7367 = vmatmul.mubr.f32.gmra.mrb[30].mxu1 %v14532_v25  ;;  %v12395_v25 = vadd.s32 424, %v9085_v58 }
 0x347   : > { %7090 = vmatmul.mubr.msk.f32.vlgmr.msra.gmra.mrb[110].mxu0 %vm9428_vm5, %v14306_v44  ;;  %7401 = vmatprep.mubr.msk.f32.mxu1 %vm14317_vm8, %v14535_v59  ;;  %v4617_v44 = vld [vmem:[#allocation7 + $0x3a0] sm:$0xff] }
 0x348   : > { %7092 = vmatprep.mubr.msk.f32.mxu0 %vm14311_vm3, %v14533_v18  ;;  %v7937_v20 = vpack.c.bf16 %v4618_v28, %v4617_v44  ;;  %v14541_v18 = vld [vmem:[#allocation52_spill] sm:$0xff]  ;;  %v982_v49 = vcvt.s32.f32 %v12395_v25  ;;  %v12418_v44 = vadd.s32 432, %v9085_v58  ;;  %v14548_v25 = vld [vmem:[#allocation59_spill] sm:$0xff]  ;;  %v14551_v58 = vld [vmem:[#allocation62_spill] sm:$0xff] }
 0x349   : > { %vm14549_vm3 = vnez %v14548_v25  ;;  %v4624_v25 = vld [vmem:[#allocation7 + $0x3d8] sm:$0xff] }
 0x34a   : > { %7402 = vmatmul.mubr.msk.f32.vlgmr.msra.gmra.mrb[32].mxu1 %vm14321_vm13, %v14537_v57  ;;  %v1037_v5 = vadd.f32 0.5, %v982_v49 }
 0x34b   : > { %7093 = vmatmul.mubr.msk.f32.gmra.mrb[112].mxu0 %vm14317_vm8, %v14535_v59  ;;  %7932 = vmatpush3.bf16.msra.mxu1 %v12305_v48  ;;  %v4619_v59 = vld [vmem:[#allocation7 + $0x3b0] sm:$0xff]  ;;  %v4620_v48 = vld [vmem:[#allocation7 + $0x3b8] sm:$0xff]  ;;  %vm14552_vm8 = vnez %v14551_v58 }
 0x34c   : > { %7095 = vmatprep.mubr.msk.f32.mxu0 %vm14321_vm13, %v14537_v57  ;;  %7404 = vmatprep.mubr.msk.f32.mxu1 %vm14325_vm6, %v14539_v45  ;;  %v14545_v57 = vld [vmem:[#allocation55_spill] sm:$0xff]  ;;  %v7941_v28 = vpack.c.bf16 %v4620_v48, %v4619_v59  ;;  %v983_v59 = vcvt.s32.f32 %v12418_v44 }
 0x34d   : > { %7934 = vmatprep.subr.bf16.mxu1 %v7933_v35  ;;  %vm14546_vm5 = vnez %v14545_v57  ;;  %v4623_v57 = vld [vmem:[#allocation7 + $0x3d0] sm:$0xff] }
 0x34e   : > { %7405 = vmatmul.mubr.msk.f32.gmra.mrb[34].mxu1 %vm14543_vm0, %v14541_v18  ;;  %v1038_v44 = vadd.f32 0.5, %v983_v59 }
 0x34f   : > { %7096 = vmatmul.mubr.msk.f32.gmra.mrb[114].mxu0 %vm14325_vm6, %v14539_v45  ;;  %7407 = vmatprep.mubr.msk.f32.mxu1 %vm14546_vm5, %v14544_v3  ;;  %v14547_v45 = vld [vmem:[#allocation60_spill] sm:$0xff]  ;;  %vm14557_vm6 = vnez %v14556_v32 }
 0x350   : > { %7098 = vmatprep.mubr.msk.f32.mxu0 %vm14543_vm0, %v14541_v18  ;;  %7936 = vmatpush3.bf16.msra.mxu1 %v7933_v35  ;;  %v4622_v18 = vld [vmem:[#allocation7 + $0x3c8] sm:$0xff]  ;;  %v14550_v35 = vld [vmem:[#allocation63_spill] sm:$0xff] }
 0x351   : > { %7938 = vmatprep.subr.bf16.mxu1 %v7937_v20  ;;  %v7945_v48 = vpack.c.bf16 %v4622_v18, %v4621_v62  ;;  %v7949_v62 = vpack.c.bf16 %v4624_v25, %v4623_v57  ;;  %v14558_v18 = vld [vmem:[#allocation71_spill] sm:$0xff]  ;;  %v14563_v57 = vld [vmem:[#allocation78_spill] sm:$0xff]  ;;  %v14564_v25 = vld [vmem:[#allocation77_spill] sm:$0xff] }
 0x352   : > { %7408 = vmatmul.mubr.msk.f32.gmra.mrb[36].mxu1 %vm14549_vm3, %v14547_v45  ;;  %vm14559_vm14 = vnez %v14558_v18  ;;  %vm14565_vm4 = vnez %v14564_v25  ;;  %v4996_v25 = vld [vmem:[#allocation7 + $0x408] sm:$0xff] }
 0x353   : > { %7099 = vmatmul.mubr.msk.f32.gmra.mrb[116].mxu0 %vm14546_vm5, %v14544_v3  ;;  %7410 = vmatprep.mubr.msk.f32.mxu1 %vm14552_vm8, %v14550_v35  ;;  %v14553_v3 = vld [vmem:[#allocation65_spill] sm:$0xff]  ;;  %vm14572_vm5 = vnez %v14373_v53 }
 0x354   : > { %7101 = vmatprep.mubr.msk.f32.mxu0 %vm14549_vm3, %v14547_v45  ;;  %7940 = vmatpush3.bf16.msra.mxu1 %v7937_v20  ;;  %vm14554_vm13 = vnez %v14553_v3  ;;  %v1092_v45 = vmul.f32 0.041666668, %v1037_v5  ;;  %v14555_v20 = vld [vmem:[#allocation69_spill] sm:$0xff]  ;;  %v4625_v5 = vld [vmem:[#allocation7 + $0x3e0] sm:$0xff]  ;;  %v1093_v3 = vmul.f32 0.041666668, %v1038_v44 }
 0x355   : > { %7942 = vmatprep.subr.bf16.mxu1 %v7941_v28 }
 0x356   : > { %7411 = vmatmul.mubr.msk.f32.gmra.mrb[38].mxu1 %vm14554_vm13, %v14343_v51  ;;  %v1147_v58 = vfloor.f32 %v1092_v45  ;;  %v4627_v45 = vld [vmem:[#allocation7 + $0x3f0] sm:$0xff]  ;;  %v1148_v44 = vfloor.f32 %v1093_v3 }
 0x357   : > { %7102 = vmatmul.mubr.msk.f32.gmra.mrb[118].mxu0 %vm14552_vm8, %v14550_v35  ;;  %7413 = vmatprep.mubr.msk.f32.mxu1 %vm14557_vm6, %v14555_v20  ;;  %v4626_v35 = vld [vmem:[#allocation7 + $0x3e8] sm:$0xff] }
 0x358   : > { %7104 = vmatprep.mubr.msk.f32.mxu0 %vm14554_vm13, %v14343_v51  ;;  %7944 = vmatpush3.bf16.msra.mxu1 %v7941_v28  ;;  %v14560_v51 = vld [vmem:[#allocation75_spill] sm:$0xff]  ;;  %v14561_v28 = vld [vmem:[#allocation74_spill] sm:$0xff]  ;;  %v7953_v32 = vpack.c.bf16 %v4626_v35, %v4625_v5  ;;  %v1202_v18 = vmul.f32 24.0, %v1147_v58  ;;  %v14569_v35 = vld [vmem:[#allocation85_spill] sm:$0xff]  ;;  %vm1370_vm3 = vcmp.ge.f32.partialorder %v1147_v58, 1.0  ;;  %vm1425_vm8 = vcmp.le.f32.partialorder %v1147_v58, 16.0 }
 0x359   : > { %7946 = vmatprep.subr.bf16.mxu1 %v7945_v48  ;;  %vm14562_vm12 = vnez %v14561_v28  ;;  %vm14573_vm13 = vnez %v14377_v11 }
 0x35a   : > { %7414 = vmatmul.mubr.msk.f32.gmra.mrb[40].mxu1 %vm14559_vm14, %v14351_v42  ;;  %v1257_v28 = vsub.f32 %v982_v49, %v1202_v18  ;;  %v14633_v18 = vld [vmem:[#allocation53_spill] sm:$0xff] }
 0x35b   : > { %7105 = vmatmul.mubr.msk.f32.gmra.mrb[120].mxu0 %vm14557_vm6, %v14555_v20  ;;  %7416 = vmatprep.mubr.msk.f32.mxu1 %vm14562_vm12, %v14560_v51  ;;  %v4628_v20 = vld [vmem:[#allocation7 + $0x3f8] sm:$0xff]  ;;  %vm1480_vm6 = vmand %vm1370_vm3, %vm1425_vm8 }
 0x35c   : > { %7107 = vmatprep.mubr.msk.f32.mxu0 %vm14559_vm14, %v14351_v42  ;;  %7948 = vmatpush3.bf16.msra.mxu1 %v7945_v48  ;;  %v14566_v42 = vld [vmem:[#allocation81_spill] sm:$0xff]  ;;  %v14567_v48 = vld [vmem:[#allocation80_spill] sm:$0xff]  ;;  %v7957_v5 = vpack.c.bf16 %v4628_v20, %v4627_v45  ;;  %v12482_v45 = vpack.c.bf16 %v4996_v25, %v4995_v0  ;;  %vm1535_vm14 = vcmp.ge.f32.partialorder %v1257_v28, 1.0  ;;  %vm1645_vm1 = vcmp.le.f32.partialorder %v1257_v28, 16.0 }
 0x35d   : > { %7950 = vmatprep.subr.bf16.mxu1 %v7949_v62  ;;  %vm14568_vm10 = vnez %v14567_v48  ;;  %v5000_v20 = vld [vmem:[#allocation7 + $0x428] sm:$0xff]  ;;  %v5003_v25 = vld [vmem:[#allocation7 + $0x440] sm:$0xff] }
 0x35e   : > { %7417 = vmatmul.mubr.msk.f32.gmra.mrb[42].mxu1 %vm14565_vm4, %v14563_v57 }
 0x35f   : > { %7108 = vmatmul.mubr.msk.f32.gmra.mrb[122].mxu0 %vm14562_vm12, %v14560_v51  ;;  %7419 = vmatprep.mubr.msk.f32.mxu1 %vm14568_vm10, %v14566_v42  ;;  %v14570_v51 = vld [vmem:[#allocation83_spill] sm:$0xff]  ;;  %vm14574_vm12 = vnez %v14381_v15 }
 0x360   : > { %7110 = vmatprep.mubr.msk.f32.mxu0 %vm14565_vm4, %v14563_v57  ;;  %7952 = vmatpush3.bf16.msra.mxu1 %v7949_v62  ;;  %vm14571_vm0 = vnez %v14570_v51  ;;  %v8490_v62 = vld [vmem:[%s13003_s2] ss:$0 sm:$0xff]  ;;  %v1203_v57 = vmul.f32 24.0, %v1148_v44  ;;  %vm1371_vm4 = vcmp.ge.f32.partialorder %v1148_v44, 1.0  ;;  %v14636_v51 = vld [vmem:[#allocation64_spill] sm:$0xff] }
 0x361   : > { %7954 = vmatprep.subr.bf16.mxu1 %v7953_v32  ;;  %v700_v3 = vadd.f32 %v8490_v62, %v12328_v54  ;;  %v705_v11 = vadd.f32 %v8490_v62, %v12334_v38  ;;  %v4997_v38 = vld [vmem:[#allocation7 + $0x410] sm:$0xff]  ;;  %v4998_v54 = vld [vmem:[#allocation7 + $0x418] sm:$0xff]  ;;  %v5004_v62 = vld [vmem:[#allocation7 + $0x448] sm:$0xff] }
 0x362   : > { %7420 = vmatmul.mubr.msk.f32.gmra.mrb[44].mxu1 %vm14571_vm0, %v14569_v35  ;;  %v7965_v58 = vpack.c.bf16 %v4998_v54, %v4997_v38  ;;  %v14635_v35 = vld [vmem:[#allocation61_spill] sm:$0xff]  ;;  %v14661_v38 = vld [vmem:[#allocation148_spill] sm:$0xff] }
 0x363   : > { %7111 = vmatmul.mubr.msk.f32.gmra.mrb[124].mxu0 %vm14568_vm10, %v14566_v42  ;;  %7422 = vmatprep.mubr.msk.f32.mxu1 %vm14572_vm5, %v14372_v13  ;;  %v816_v53 = vmul.f32 0.2, %v700_v3  ;;  %v1258_v13 = vsub.f32 %v983_v59, %v1203_v57  ;;  %vm1426_vm10 = vcmp.le.f32.partialorder %v1148_v44, 16.0  ;;  %vm761_vm0 = vcmp.ge.f32.partialorder %v700_v3, 0.0  ;;  %vm1590_vm5 = vmand %vm1480_vm6, %vm1535_vm14  ;;  %v14632_v59 = vld [vmem:[#allocation49_spill] sm:$0xff]  ;;  %v5001_v44 = vld [vmem:[#allocation7 + $0x430] sm:$0xff] }
 0x364   : > { %7956 = vmatpush3.bf16.msra.mxu1 %v7953_v32  ;;  %vm1481_vm3 = vmand %vm1371_vm4, %vm1426_vm10  ;;  %v817_v49 = vmul.f32 0.2, %v705_v11  ;;  %vm14586_vm10 = vnez %v14006_v41  ;;  %v14617_v41 = vld [vmem:[#allocation193_spill] sm:$0xff]  ;;  %v4999_v32 = vld [vmem:[#allocation7 + $0x420] sm:$0xff] }
 0x365   : > { %7958 = vmatprep.subr.bf16.mxu1 %v7957_v5  ;;  %vm1536_vm8 = vcmp.ge.f32.partialorder %v1258_v13, 1.0  ;;  %v871_v15 = vsel %vm761_vm0, %v700_v3, %v816_v53  ;;  %vm1646_vm14 = vcmp.le.f32.partialorder %v1258_v13, 16.0  ;;  %vm14587_vm0 = vnez %v14022_v43  ;;  %v14618_v43 = vld [vmem:[#allocation191_spill] sm:$0xff]  ;;  %v14634_v42 = vld [vmem:[#allocation57_spill] sm:$0xff]  ;;  %v14638_v57 = vld [vmem:[#allocation70_spill] sm:$0xff] }
 0x366   : > { %7423 = vmatmul.mubr.msk.f32.gmra.mrb[46].mxu1 %vm14573_vm13, %v14376_v40  ;;  %v14575_v40 = vld [vmem:[#allocation101_spill] sm:$0xff]  ;;  %vm12498_vm13 = vmand %vm1590_vm5, %vm1645_vm1  ;;  %vm14582_vm1 = vcmask 1045504   ;;  %vm14588_vm5 = vnez %v14411_v9  ;;  %v7969_v48 = vpack.c.bf16 %v5000_v20, %v4999_v32  ;;  %v14637_v3 = vld [vmem:[#allocation67_spill] sm:$0xff] }
 0x367   : > { %7425 = vmatprep.mubr.msk.f32.mxu1 %vm14574_vm12, %v14380_v6  ;;  %vm1591_vm6 = vmand %vm1481_vm3, %vm1536_vm8  ;;  %vm14584_vm12 = vnez %v13987_v55  ;;  %vm14589_vm3 = vnez %v14414_v39  ;;  %vm14590_vm8 = vnez %v14417_v37  ;;  %v14612_v55 = vld [vmem:[#allocation183_spill] sm:$0xff]  ;;  %v14621_v37 = vld [vmem:[#allocation196_spill] sm:$0xff] }
 0x368   : > { %7960 = vmatpush3.bf16.msra.mxu1 %v7957_v5  ;;  %vm14585_vm4 = vmmov %vm14582_vm1  ;;  %v14624_v39 = vld [vmem:[#allocation21_spill] sm:$0xff]  ;;  %v5002_v5 = vld [vmem:[#allocation7 + $0x438] sm:$0xff] }
 0x369   : > { %7962 = vmatprep.subr.bf16.mxu1 %v12482_v45  ;;  %v14630_v9 = vld [vmem:[#allocation33_spill] sm:$0xff]  ;;  %v7973_v28 = vpack.c.bf16 %v5002_v5, %v5001_v44  ;;  %v5005_v53 = vld [vmem:[#allocation7 + $0x450] sm:$0xff]  ;;  %v5006_v13 = vld [vmem:[#allocation7 + $0x458] sm:$0xff] }
 0x36a   : > { %7426 = vmatmul.mubr.msk.f32.gmra.mrb[0].mxu1 %vm14386_vm11, %v14384_v36  ;;  %vm762_vm11 = vcmp.ge.f32.partialorder %v705_v11, 0.0  ;;  %v12510_v36 = vsel %vm12498_vm13, %v871_v15, 0.0  ;;  %v7981_v0 = vpack.c.bf16 %v5006_v13, %v5005_v53  ;;  %v5008_v6 = vld [vmem:[#allocation7 + $0x468] sm:$0xff]  ;;  %v14662_v54 = vld [vmem:[#allocation152_spill] sm:$0xff] }
 0x36b   : > { %7428 = vmatprep.mubr.msk.f32.mxu1 %vm14394_vm15, %v14575_v40  ;;  %v872_v19 = vsel %vm762_vm11, %v705_v11, %v817_v49  ;;  %vm1701_vm15 = vmand %vm1591_vm6, %vm1646_vm14  ;;  %vm14591_vm11 = vnez %v14421_v22  ;;  %v14620_v22 = vld [vmem:[#allocation198_spill] sm:$0xff]  ;;  %v14639_v11 = vld [vmem:[#allocation73_spill] sm:$0xff] }
 0x36c   : > { %v14640_v40 = vld [vmem:[#allocation76_spill] sm:$0xff]  ;;  %v14641_v49 = vld [vmem:[#allocation79_spill] sm:$0xff] }
 0x36d   : > { %v14663_v32 = vld [vmem:[#allocation156_spill] sm:$0xff] }
 0x36e   : > { %7429 = vmatmul.mubr.msk.f32.gmra.mrb[2].mxu1 %vm14397_vm2, %v14395_v14  ;;  %v5013_v14 = vrot.slane %v12510_v36, 2  ;;  %vm14579_vm2 = vnez %v13922_v24  ;;  %v14592_v24 = vld [vmem:[#allocation151_spill] sm:$0xff]  ;;  %v14664_v20 = vld [vmem:[#allocation160_spill] sm:$0xff] }
 0x36f   : > { %7431 = vmatprep.mubr.msk.f32.mxu1 %vm14403_vm9, %v14401_v26  ;;  %v12519_v26 = vsel %vm1701_vm15, %v872_v19, 0.0  ;;  %vm14580_vm9 = vnez %v13943_v27  ;;  %vm14593_vm6 = vnez %v14592_v24  ;;  %v14602_v27 = vld [vmem:[#allocation173_spill] sm:$0xff]  ;;  %v14642_v19 = vld [vmem:[#allocation82_spill] sm:$0xff]  ;;  %v14643_v24 = vld [vmem:[#allocation84_spill] sm:$0xff] }
 0x370   : > { %v12527_v1 = vsel %vm14582_vm1, %v14581_v2, %v5013_v14  ;;  %v5009_v2 = vld [vmem:[#allocation7 + $0x470] sm:$0xff]  ;;  %v14666_v44 = vld [vmem:[#allocation168_spill] sm:$0xff] }
 0x371   : > { %v14671_v13 = vld [vmem:[#allocation188_spill] sm:$0xff] }
 0x372   : > { %7432 = vmatmul.mubr.msk.f32.gmra.mrb[4].mxu1 %vm14404_vm7, %v10800_v8  ;;  %vm14583_vm7 = vnez %v13965_v16  ;;  %v5015_v8 = vrot.slane %v12519_v26, 2  ;;  %v14606_v16 = vld [vmem:[#allocation175_spill] sm:$0xff] }
 0x373   : > { %7434 = vmatprep.mubr.msk.f32.mxu1 %vm14579_vm2, %v10865_v23  ;;  %v14598_v23 = vld [vmem:[#allocation163_spill] sm:$0xff] }
 0x374   : > { %v12537_v31 = vsel %vm14585_vm4, %v5013_v14, %v5015_v8  ;;  %vm14599_vm2 = vnez %v14598_v23  ;;  %vm14613_vm4 = vnez %v14612_v55  ;;  %v5010_v8 = vld [vmem:[#allocation7 + $0x478] sm:$0xff]  ;;  %v14645_v23 = vld [vmem:[#allocation90_spill] sm:$0xff]  ;;  %v14654_v55 = vld [vmem:[#allocation125_spill] sm:$0xff] }
 0x376   : > { %7435 = vmatmul.mubr.msk.f32.gmra.mrb[6].mxu1 %vm14580_vm9, %v10926_v4  ;;  %v14594_v4 = vld [vmem:[#allocation155_spill] sm:$0xff] }
 0x377   : > { %7437 = vmatprep.mubr.msk.f32.mxu1 %vm14583_vm7, %v10984_v17  ;;  %vm14595_vm14 = vnez %v14594_v4  ;;  %v14605_v17 = vld [vmem:[#allocation177_spill] sm:$0xff]  ;;  %vm14607_vm7 = vnez %v14606_v16  ;;  %v14644_v4 = vld [vmem:[#allocation87_spill] sm:$0xff]  ;;  %v14650_v16 = vld [vmem:[#allocation106_spill] sm:$0xff] }
 0x37a   : > { %7438 = vmatmul.mubr.msk.f32.gmra.mrb[8].mxu1 %vm14584_vm12, %v11042_v12  ;;  %v14614_v12 = vld [vmem:[#allocation189_spill] sm:$0xff] }
 0x37b   : > { %7440 = vmatprep.mubr.msk.f32.mxu1 %vm14586_vm10, %v11103_v33  ;;  %v14611_v33 = vld [vmem:[#allocation185_spill] sm:$0xff] }
 0x37e   : > { %7441 = vmatmul.mubr.msk.f32.gmra.mrb[10].mxu1 %vm14587_vm0, %v11158_v60  ;;  %v14603_v60 = vld [vmem:[#allocation171_spill] sm:$0xff]  ;;  %vm14619_vm0 = vnez %v14618_v43 }
 0x37f   : > { %7443 = vmatprep.mubr.msk.f32.mxu1 %vm14588_vm5, %v11216_v46  ;;  %v14596_v46 = vld [vmem:[#allocation159_spill] sm:$0xff]  ;;  %vm14604_vm1 = vnez %v14603_v60  ;;  %vm14622_vm5 = vnez %v14621_v37  ;;  %v14648_v60 = vld [vmem:[#allocation100_spill] sm:$0xff]  ;;  %v14658_v37 = vld [vmem:[#allocation137_spill] sm:$0xff] }
 0x380   : > { %vm14597_vm15 = vnez %v14596_v46  ;;  %v7989_v46 = vpack.c.bf16 %v5010_v8, %v5009_v2  ;;  %v14675_v8 = vld [vmem:[#allocation72_spill] sm:$0xff] }
 0x382   : > { %7444 = vmatmul.mubr.msk.f32.gmra.mrb[12].mxu1 %vm14589_vm3, %v14413_v34  ;;  %vm14625_vm3 = vnez %v14624_v39  ;;  %v14629_v34 = vld [vmem:[#allocation41_spill] sm:$0xff] }
 0x383   : > { %7446 = vmatprep.mubr.msk.f32.mxu1 %vm14590_vm8, %v14416_v7  ;;  %v14600_v7 = vld [vmem:[#allocation167_spill] sm:$0xff] }
 0x384   : > { %vm14601_vm9 = vnez %v14600_v7  ;;  %v14646_v7 = vld [vmem:[#allocation94_spill] sm:$0xff] }
 0x386   : > { %7447 = vmatmul.mubr.msk.f32.gmra.mrb[14].mxu1 %vm14591_vm11, %v14420_v21  ;;  %v14615_v21 = vld [vmem:[#allocation187_spill] sm:$0xff]  ;;  %vm14631_vm11 = vnez %v14630_v9 }
 0x387   : > { %7449 = vmatprep.mubr.msk.f32.mxu1 %vm14593_vm6, %v14424_v61  ;;  %v14609_v61 = vld [vmem:[#allocation179_spill] sm:$0xff]  ;;  %vm14616_vm10 = vnez %v14615_v21  ;;  %v14656_v21 = vld [vmem:[#allocation133_spill] sm:$0xff] }
 0x388   : > { %vm14610_vm12 = vnez %v14609_v61  ;;  %v14652_v61 = vld [vmem:[#allocation115_spill] sm:$0xff] }
 0x38a   : > { %7450 = vmatmul.mubr.msk.f32.gmra.mrb[16].mxu1 %vm14595_vm14, %v14428_v63  ;;  %v14608_v63 = vld [vmem:[#allocation181_spill] sm:$0xff] }
 0x38b   : > { %7452 = vmatprep.mubr.msk.f32.mxu1 %vm14597_vm15, %v14431_v47  ;;  %v14627_v47 = vld [vmem:[#allocation24_spill] sm:$0xff] }
 0x38c   : > { %vm14628_vm8 = vnez %v14627_v47  ;;  %v14660_v47 = vld [vmem:[#allocation144_spill] sm:$0xff] }
 0x38e   : > { %7453 = vmatmul.mubr.msk.f32.gmra.mrb[18].mxu1 %vm14599_vm2, %v14434_v30  ;;  %v14626_v30 = vld [vmem:[#allocation22_spill] sm:$0xff] }
 0x38f   : > { %7455 = vmatprep.mubr.msk.f32.mxu1 %vm14601_vm9, %v14437_v29  ;;  %v14623_v29 = vld [vmem:[#allocation20_spill] sm:$0xff] }
 0x392   : > { %7456 = vmatmul.mubr.msk.f32.gmra.mrb[20].mxu1 %vm14604_vm1, %v14602_v27  ;;  %v14647_v27 = vld [vmem:[#allocation97_spill] sm:$0xff] }
 0x393   : > { %7458 = vmatprep.mubr.msk.f32.mxu1 %vm14607_vm7, %v14605_v17  ;;  %v14649_v17 = vld [vmem:[#allocation103_spill] sm:$0xff] }
 0x396   : > { %7459 = vmatmul.mubr.msk.f32.gmra.mrb[22].mxu1 %vm14610_vm12, %v14608_v63  ;;  %v14651_v63 = vld [vmem:[#allocation110_spill] sm:$0xff] }
 0x397   : > { %7461 = vmatprep.mubr.msk.f32.mxu1 %vm14613_vm4, %v14611_v33  ;;  %v14653_v33 = vld [vmem:[#allocation120_spill] sm:$0xff] }
 0x39a   : > { %7462 = vmatmul.mubr.msk.f32.gmra.mrb[24].mxu1 %vm14616_vm10, %v14614_v12  ;;  %v14655_v12 = vld [vmem:[#allocation130_spill] sm:$0xff] }
 0x39b   : > { %7464 = vmatprep.mubr.msk.f32.mxu1 %vm14619_vm0, %v14617_v41 }
 0x39e   : > { %7465 = vmatmul.mubr.msk.f32.gmra.mrb[26].mxu1 %vm14622_vm5, %v14620_v22  ;;  %v14657_v22 = vld [vmem:[#allocation93_spill] sm:$0xff] }
 0x39f   : > { %7467 = vmatprep.mubr.msk.f32.mxu1 %vm14625_vm3, %v14623_v29 }
 0x3a2   : > { %7468 = vmatmul.mubr.msk.f32.gmra.mrb[28].mxu1 %vm14628_vm8, %v14626_v30  ;;  %v14659_v30 = vld [vmem:[#allocation140_spill] sm:$0xff] }
 0x3a3   : > { %7470 = vmatprep.mubr.msk.f32.mxu1 %vm14631_vm11, %v14629_v34 }
 0x3a6   : > { %7471 = vmatmul.mubr.msk.f32.gmra.mrb[30].mxu1 %vm12498_vm13, %v871_v15  ;;  %v5007_v15 = vld [vmem:[#allocation7 + $0x460] sm:$0xff]  ;;  %vm14679_vm13 = vcmask 1046528  }
 0x3a7   : > { %7505 = vmatprep.mubr.f32.mxu1 %v14632_v59  ;;  %v7985_v14 = vpack.c.bf16 %v5008_v6, %v5007_v15  ;;  %v14673_v15 = vld [vmem:[#allocation197_spill] sm:$0xff]  ;;  %v14674_v6 = vld [vmem:[#allocation66_spill] sm:$0xff]  ;;  %vm14680_vm6 = vmmov %vm14679_vm13 }
 0x3a8   : > { %vm14681_vm14 = vmmov %vm14680_vm6 }
 0x3aa   : > { %7506 = vmatmul.mubr.f32.vlgmr.msra.gmra.mrb[32].mxu1 %v14633_v18 }
 0x3ab   : > { %7964 = vmatpush3.bf16.msra.mxu1 %v12482_v45  ;;  %7508 = vmatprep.mubr.f32.mxu1 %v14634_v42  ;;  %v7977_v45 = vpack.c.bf16 %v5004_v62, %v5003_v25 }
 0x3ac   : > { %7966 = vmatprep.subr.bf16.mxu1 %v7965_v58 }
 0x3ae   : > { %7509 = vmatmul.mubr.f32.gmra.mrb[34].mxu1 %v14635_v35 }
 0x3af   : > { %7511 = vmatprep.mubr.f32.mxu1 %v14636_v51  ;;  %7968 = vmatpush3.bf16.msra.mxu1 %v7965_v58  ;;  %v14667_v51 = vld [vmem:[#allocation172_spill] sm:$0xff] }
 0x3b0   : > { %7970 = vmatprep.subr.bf16.mxu1 %v7969_v48 }
 0x3b2   : > { %7512 = vmatmul.mubr.f32.gmra.mrb[36].mxu1 %v14637_v3  ;;  %v14669_v3 = vld [vmem:[#allocation180_spill] sm:$0xff] }
 0x3b3   : > { %7514 = vmatprep.mubr.f32.mxu1 %v14638_v57  ;;  %7972 = vmatpush3.bf16.msra.mxu1 %v7969_v48  ;;  %v14665_v48 = vld [vmem:[#allocation164_spill] sm:$0xff] }
 0x3b4   : > { %7974 = vmatprep.subr.bf16.mxu1 %v7973_v28  ;;  %v14670_v57 = vld [vmem:[#allocation184_spill] sm:$0xff] }
 0x3b6   : > { %7515 = vmatmul.mubr.f32.gmra.mrb[38].mxu1 %v14639_v11  ;;  %v14672_v11 = vld [vmem:[#allocation192_spill] sm:$0xff] }
 0x3b7   : > { %7517 = vmatprep.mubr.f32.mxu1 %v14640_v40  ;;  %7976 = vmatpush3.bf16.msra.mxu1 %v7973_v28  ;;  %v14668_v28 = vld [vmem:[#allocation176_spill] sm:$0xff] }
 0x3b8   : > { %7978 = vmatprep.subr.bf16.mxu1 %v7977_v45 }
 0x3ba   : > { %7518 = vmatmul.mubr.f32.gmra.mrb[40].mxu1 %v14641_v49  ;;  %v4632_v49 = vrot.slane %v12116_v10, 1 }
 0x3bb   : > { %7520 = vmatprep.mubr.f32.mxu1 %v14642_v19  ;;  %7980 = vmatpush3.bf16.msra.mxu1 %v7977_v45 }
 0x3bc   : > { %7982 = vmatprep.subr.bf16.mxu1 %v7981_v0 }
 0x3be   : > { %7521 = vmatmul.mubr.f32.gmra.mrb[42].mxu1 %v14643_v24  ;;  %v14676_v24 = vld [vmem:[#allocation12_spill] sm:$0xff] }
 0x3bf   : > { %7523 = vmatprep.mubr.f32.mxu1 %v14644_v4  ;;  %7984 = vmatpush3.bf16.msra.mxu1 %v7981_v0 }
 0x3c0   : > { %7986 = vmatprep.subr.bf16.mxu1 %v7985_v14 }
 0x3c2   : > { %7524 = vmatmul.mubr.f32.gmra.mrb[44].mxu1 %v14645_v23 }
 0x3c3   : > { %7526 = vmatprep.mubr.f32.mxu1 %v14646_v7  ;;  %7988 = vmatpush3.bf16.msra.mxu1 %v7985_v14  ;;  %v4634_v14 = vrot.slane %v12510_v36, 1 }
 0x3c4   : > { %7990 = vmatprep.subr.bf16.mxu1 %v7989_v46 }
 0x3c5   : > { %v4635_v10 = vsel %vm14680_vm6, %v4632_v49, %v4634_v14 }
 0x3c6   : > { %7527 = vmatmul.mubr.f32.gmra.mrb[46].mxu1 %v14647_v27  ;;  %v4636_v27 = vrot.slane %v12519_v26, 1 }
 0x3c7   : > { %7529 = vmatprep.mubr.f32.mxu1 %v14648_v60  ;;  %7992 = vmatpush3.bf16.msra.mxu1 %v7989_v46  ;;  %v14677_v46 = vld [vmem:[#allocation26_spill] sm:$0xff] }
 0x3c8   : > { %v14678_v23 = vrot.slane %v14677_v46, 1  ;;  %v14696_v46 = vld [vmem:[#allocation124_spill] sm:$0xff] }
 0x3ca   : > { %7530 = vmatmul.mubr.f32.gmra.mrb[0].mxu1 %v14649_v17  ;;  %v4633_v7 = vsel %vm14679_vm13, %v14678_v23, %v4632_v49  ;;  %v4637_v17 = vsel %vm14681_vm14, %v4634_v14, %v4636_v27  ;;  %v14694_v49 = vld [vmem:[#allocation122_spill] sm:$0xff]  ;;  %v14695_v14 = vld [vmem:[#allocation123_spill] sm:$0xff] }
 0x3cb   : > { %7532 = vmatprep.mubr.f32.mxu1 %v14650_v16  ;;  %v14697_v23 = vld [vmem:[#allocation126_spill] sm:$0xff] }
 0x3ce   : > { %7533 = vmatmul.mubr.f32.gmra.mrb[2].mxu1 %v14651_v63 }
 0x3cf   : > { %7535 = vmatprep.mubr.f32.mxu1 %v14652_v61 }
 0x3d2   : > { %7536 = vmatmul.mubr.f32.gmra.mrb[4].mxu1 %v14653_v33 }
 0x3d3   : > { %7538 = vmatprep.mubr.f32.mxu1 %v14654_v55  ;;  %v14682_v55 = vld [vmem:[#allocation88_spill] sm:$0xff] }
 0x3d6   : > { %7539 = vmatmul.mubr.f32.gmra.mrb[6].mxu1 %v14655_v12  ;;  %v14683_v12 = vld [vmem:[#allocation108_spill] sm:$0xff] }
 0x3d7   : > { %7541 = vmatprep.mubr.f32.mxu1 %v14656_v21 }
 0x3da   : > { %v12630_v41 = vpop.f32.mrb[126].mxu0  ;;  %7542 = vmatmul.mubr.f32.gmra.mrb[8].mxu1 %v14657_v22 }
 0x3db   : > { %v12632_v43 = vpop.f32.mrb[127].mxu0  ;;  %7544 = vmatprep.mubr.f32.mxu1 %v14658_v37  ;;  %v14685_v37 = vld [vmem:[#allocation111_spill] sm:$0xff] }
 0x3de   : > { %v12636_v29 = vpop.f32.mrb[128].mxu0  ;;  %7545 = vmatmul.mubr.f32.gmra.mrb[10].mxu1 %v14659_v30 }
 0x3df   : > { %v12638_v39 = vpop.f32.mrb[129].mxu0  ;;  %7547 = vmatprep.mubr.f32.mxu1 %v14660_v47  ;;  %v14687_v47 = vld [vmem:[#allocation113_spill] sm:$0xff] }
 0x3e2   : > { %v12642_v34 = vpop.f32.mrb[130].mxu0  ;;  %7548 = vmatmul.mubr.f32.gmra.mrb[12].mxu1 %v14661_v38 }
 0x3e3   : > { %v12644_v9 = vpop.f32.mrb[131].mxu0  ;;  %7550 = vmatprep.mubr.f32.mxu1 %v14662_v54 }
 0x3e6   : > { %v12648_v59 = vpop.f32.mrb[132].mxu0  ;;  %7551 = vmatmul.mubr.f32.gmra.mrb[14].mxu1 %v14663_v32  ;;  %v14688_v32 = vld [vmem:[#allocation114_spill] sm:$0xff] }
 0x3e7   : > { %v12650_v58 = vpop.f32.mrb[133].mxu0  ;;  %7553 = vmatprep.mubr.f32.mxu1 %v14664_v20  ;;  %v14689_v20 = vld [vmem:[#allocation116_spill] sm:$0xff] }
 0x3ea   : > { %v12654_v18 = vpop.f32.mrb[134].mxu0  ;;  %7554 = vmatmul.mubr.f32.gmra.mrb[16].mxu1 %v14665_v48 }
 0x3eb   : > { %v12656_v42 = vpop.f32.mrb[135].mxu0  ;;  %7556 = vmatprep.mubr.f32.mxu1 %v14666_v44 }
 0x3ee   : > { %v12660_v5 = vpop.f32.mrb[136].mxu0  ;;  %7557 = vmatmul.mubr.f32.gmra.mrb[18].mxu1 %v14667_v51  ;;  %v14690_v51 = vld [vmem:[#allocation117_spill] sm:$0xff] }
 0x3ef   : > { %v12662_v35 = vpop.f32.mrb[137].mxu0  ;;  %7559 = vmatprep.mubr.f32.mxu1 %v14668_v28  ;;  %v14691_v28 = vld [vmem:[#allocation118_spill] sm:$0xff] }
 0x3f2   : > { %v12666_v25 = vpop.f32.mrb[138].mxu0  ;;  %7560 = vmatmul.mubr.f32.gmra.mrb[20].mxu1 %v14669_v3 }
 0x3f3   : > { %v12668_v62 = vpop.f32.mrb[139].mxu0  ;;  %7562 = vmatprep.mubr.f32.mxu1 %v14670_v57 }
 0x3f6   : > { %v12672_v45 = vpop.f32.mrb[140].mxu0  ;;  %7563 = vmatmul.mubr.f32.gmra.mrb[22].mxu1 %v14671_v13  ;;  %v14692_v13 = vld [vmem:[#allocation119_spill] sm:$0xff] }
 0x3f7   : > { %v12674_v53 = vpop.f32.mrb[141].mxu0  ;;  %7565 = vmatprep.mubr.f32.mxu1 %v14672_v11  ;;  %v14693_v11 = vld [vmem:[#allocation121_spill] sm:$0xff] }
 0x3fa   : > { %v12678_v40 = vpop.f32.mrb[142].mxu0  ;;  %7566 = vmatmul.mubr.f32.gmra.mrb[24].mxu1 %v14673_v15 }
 0x3fb   : > { %v12680_v0 = vpop.f32.mrb[143].mxu0  ;;  %7568 = vmatprep.mubr.f32.mxu1 %v14674_v6 }
 0x3fe   : > { %v12685_v19 = vpop.f32.mrb[144].mxu0  ;;  %7569 = vmatmul.mubr.f32.gmra.mrb[26].mxu1 %v14675_v8 }
 0x3ff   : > { %v12688_v2 = vpop.f32.mrb[145].mxu0  ;;  %7571 = vmatprep.mubr.f32.mxu1 %v14676_v24 }
 0x402   : > { %v12692_v4 = vpop.f32.mrb[146].mxu0  ;;  %7572 = vmatmul.mubr.f32.gmra.mrb[28].mxu1 %v4633_v7 }
 0x403   : > { %v12698_v60 = vpop.f32.mrb[147].mxu0  ;;  %7574 = vmatprep.mubr.f32.mxu1 %v4635_v10  ;;  %v14698_v10 = vld [vmem:[#allocation127_spill] sm:$0xff] }
 0x406   : > { %v12701_v36 = vpop.f32.mrb[148].mxu0  ;;  %7575 = vmatmul.mubr.f32.gmra.mrb[30].mxu1 %v4637_v17  ;;  %v14699_v17 = vld [vmem:[#allocation128_spill] sm:$0xff] }
 0x407   : > { %v12704_v16 = vpop.f32.mrb[149].mxu0  ;;  %7609 = vmatprep.mubr.f32.mxu1 %v12255_v56  ;;  %v14684_v56 = vld [vmem:[#allocation109_spill] sm:$0xff] }
 0x40a   : > { %v12707_v63 = vpop.f32.mrb[150].mxu0  ;;  %7610 = vmatmul.mubr.f32.vlgmr.msra.gmra.mrb[32].mxu1 %v12261_v50 }
 0x40b   : > { %v12709_v61 = vpop.f32.mrb[151].mxu0  ;;  %7612 = vmatprep.mubr.f32.mxu1 %v12267_v52  ;;  %v14686_v52 = vld [vmem:[#allocation112_spill] sm:$0xff] }
 0x40e   : > { %v12713_v26 = vpop.f32.mrb[152].mxu0  ;;  %7613 = vmatmul.mubr.f32.gmra.mrb[34].mxu1 %v14682_v55 }
 0x40f   : > { %v12715_v33 = vpop.f32.mrb[153].mxu0  ;;  %7615 = vmatprep.mubr.f32.mxu1 %v14683_v12 }
 0x412   : > { %v12719_v21 = vpop.f32.mrb[154].mxu0  ;;  %7616 = vmatmul.mubr.f32.gmra.mrb[36].mxu1 %v14684_v56  ;;  %v14700_v56 = vld [vmem:[#allocation129_spill] sm:$0xff] }
 0x413   : > { %v12721_v22 = vpop.f32.mrb[155].mxu0  ;;  %7618 = vmatprep.mubr.f32.mxu1 %v14685_v37  ;;  %v14701_v37 = vld [vmem:[#allocation131_spill] sm:$0xff] }
 0x416   : > { %v12725_v30 = vpop.f32.mrb[156].mxu0  ;;  %7619 = vmatmul.mubr.f32.gmra.mrb[38].mxu1 %v14686_v52 }
 0x417   : > { %v12727_v50 = vpop.f32.mrb[157].mxu0  ;;  %7621 = vmatprep.mubr.f32.mxu1 %v14687_v47 }
 0x41a   : > { %v7091_v38 = vpop.f32.mrb[110].mxu0  ;;  %7622 = vmatmul.mubr.f32.gmra.mrb[40].mxu1 %v14688_v32  ;;  %v14702_v32 = vld [vmem:[#allocation132_spill] sm:$0xff] }
 0x41b   : > { %v3194_v54 = vpop.f32.mrb[111].mxu0  ;;  %7624 = vmatprep.mubr.f32.mxu1 %v14689_v20  ;;  %v14703_v20 = vld [vmem:[#allocation134_spill] sm:$0xff] }
 0x41e   : > { %v7094_v48 = vpop.f32.mrb[112].mxu0  ;;  %7625 = vmatmul.mubr.f32.gmra.mrb[42].mxu1 %v14690_v51  ;;  %v14704_v51 = vld [vmem:[#allocation135_spill] sm:$0xff] }
 0x41f   : > { %v12733_v44 = vpop.f32.mrb[113].mxu0  ;;  %7627 = vmatprep.mubr.f32.mxu1 %v14691_v28  ;;  %v14705_v28 = vld [vmem:[#allocation138_spill] sm:$0xff] }
 0x422   : > { %v12737_v3 = vpop.f32.mrb[114].mxu0  ;;  %7628 = vmatmul.mubr.f32.gmra.mrb[44].mxu1 %v14692_v13  ;;  %v14706_v13 = vld [vmem:[#allocation142_spill] sm:$0xff] }
 0x423   : > { %v12739_v57 = vpop.f32.mrb[115].mxu0  ;;  %7630 = vmatprep.mubr.f32.mxu1 %v14693_v11  ;;  %v14707_v11 = vld [vmem:[#allocation146_spill] sm:$0xff] }
 0x426   : > { %v12743_v15 = vpop.f32.mrb[116].mxu0  ;;  %7631 = vmatmul.mubr.f32.gmra.mrb[46].mxu1 %v14694_v49  ;;  %v14708_v49 = vld [vmem:[#allocation150_spill] sm:$0xff] }
 0x427   : > { %v12745_v6 = vpop.f32.mrb[117].mxu0  ;;  %7633 = vmatprep.mubr.f32.mxu1 %v14695_v14  ;;  %v14709_v14 = vld [vmem:[#allocation154_spill] sm:$0xff] }
 0x42a   : > { %v12749_v8 = vpop.f32.mrb[118].mxu0  ;;  %7634 = vmatmul.mubr.f32.gmra.mrb[0].mxu1 %v14696_v46  ;;  %v14710_v46 = vld [vmem:[#allocation158_spill] sm:$0xff] }
 0x42b   : > { %v12751_v24 = vpop.f32.mrb[119].mxu0  ;;  %7636 = vmatprep.mubr.f32.mxu1 %v14697_v23  ;;  %v14711_v23 = vld [vmem:[#allocation162_spill] sm:$0xff] }
 0x42e   : > { %v12755_v7 = vpop.f32.mrb[120].mxu0  ;;  %7637 = vmatmul.mubr.f32.gmra.mrb[2].mxu1 %v14698_v10  ;;  %v14712_v10 = vld [vmem:[#allocation166_spill] sm:$0xff] }
 0x42f   : > { %v12757_v27 = vpop.f32.mrb[121].mxu0  ;;  %7639 = vmatprep.mubr.f32.mxu1 %v14699_v17  ;;  %v14713_v17 = vld [vmem:[#allocation170_spill] sm:$0xff] }
 0x432   : > { %v12761_v55 = vpop.f32.mrb[122].mxu0  ;;  %7640 = vmatmul.mubr.f32.gmra.mrb[4].mxu1 %v14700_v56  ;;  %v14714_v56 = vld [vmem:[#allocation174_spill] sm:$0xff] }
 0x433   : > { %v12763_v12 = vpop.f32.mrb[123].mxu0  ;;  %7642 = vmatprep.mubr.f32.mxu1 %v14701_v37  ;;  %v14715_v37 = vld [vmem:[#allocation178_spill] sm:$0xff] }
 0x436   : > { %v12767_v52 = vpop.f32.mrb[124].mxu0  ;;  %7643 = vmatmul.mubr.f32.gmra.mrb[6].mxu1 %v14702_v32  ;;  %v14716_v32 = vld [vmem:[#allocation182_spill] sm:$0xff] }
 0x437   : > { %v12769_v47 = vpop.f32.mrb[125].mxu0  ;;  %7645 = vmatprep.mubr.f32.mxu1 %v14703_v20  ;;  %v14717_v20 = vld [vmem:[#allocation186_spill] sm:$0xff] }
 0x43a   : > { %7646 = vmatmul.mubr.f32.gmra.mrb[8].mxu1 %v14704_v51  ;;  %v14718_v51 = vld [vmem:[#allocation190_spill] sm:$0xff] }
 0x43b   : > { %7648 = vmatprep.mubr.f32.mxu1 %v14705_v28  ;;  %v14719_v28 = vld [vmem:[#allocation194_spill] sm:$0xff] }
 0x43e   : > { %7649 = vmatmul.mubr.f32.gmra.mrb[10].mxu1 %v14706_v13  ;;  %v14720_v13 = vld [vmem:[#allocation199_spill] sm:$0xff] }
 0x43f   : > { %7651 = vmatprep.mubr.f32.mxu1 %v14707_v11  ;;  %v14721_v11 = vld [vmem:[#allocation200_spill] sm:$0xff] }
 0x442   : > { %7652 = vmatmul.mubr.f32.gmra.mrb[12].mxu1 %v14708_v49  ;;  %v14722_v49 = vld [vmem:[#allocation27_spill] sm:$0xff] }
 0x443   : > { %7654 = vmatprep.mubr.f32.mxu1 %v14709_v14  ;;  %v14723_v14 = vld [vmem:[#allocation37_spill] sm:$0xff] }
 0x446   : > { %7655 = vmatmul.mubr.f32.gmra.mrb[14].mxu1 %v14710_v46  ;;  %v14724_v46 = vld [vmem:[#allocation45_spill] sm:$0xff] }
 0x447   : > { %7657 = vmatprep.mubr.f32.mxu1 %v14711_v23 }
 0x44a   : > { %7658 = vmatmul.mubr.f32.gmra.mrb[16].mxu1 %v14712_v10  ;;  %v12799_v10 = vld [vmem:[%s13005_s4] ss:$0 sm:$0xff] }
 0x44b   : > { %7660 = vmatprep.mubr.f32.mxu1 %v14713_v17 }
 0x44e   : > { %7661 = vmatmul.mubr.f32.gmra.mrb[18].mxu1 %v14714_v56 }
 0x44f   : > { %7663 = vmatprep.mubr.f32.mxu1 %v14715_v37 }
 0x452   : > { %7664 = vmatmul.mubr.f32.gmra.mrb[20].mxu1 %v14716_v32 }
 0x453   : > { %7666 = vmatprep.mubr.f32.mxu1 %v14717_v20 }
 0x456   : > { %7667 = vmatmul.mubr.f32.gmra.mrb[22].mxu1 %v14718_v51 }
 0x457   : > { %7669 = vmatprep.mubr.f32.mxu1 %v14719_v28 }
 0x45a   : > { %7670 = vmatmul.mubr.f32.gmra.mrb[24].mxu1 %v14720_v13 }
 0x45b   : > { %7672 = vmatprep.mubr.f32.mxu1 %v14721_v11 }
 0x45e   : > { %7673 = vmatmul.mubr.f32.gmra.mrb[26].mxu1 %v14722_v49 }
 0x45f   : > { %7675 = vmatprep.mubr.f32.mxu1 %v14723_v14 }
 0x462   : > { %7676 = vmatmul.mubr.f32.gmra.mrb[28].mxu1 %v14724_v46 }
 0x463   : > { %7678 = vmatprep.mubr.f32.mxu1 %v12527_v1 }
 0x466   : > { %7679 = vmatmul.mubr.f32.gmra.mrb[30].mxu1 %v12537_v31 }
 0x4dd   : > { %v7611_v23 = vpop.f32.mrb[32].mxu1 }
 0x4de   : > { %v8009_v17 = vadd.f32 %v7611_v23, %v7091_v38  ;;  %v5086_v56 = vpop.f32.mrb[33].mxu1 }
 0x4df   : > { %v8010_v37 = vadd.f32 %v5086_v56, %v3194_v54 }
 0x4e0   : > { %v5381_v32 = vadd.f32 %v8009_v17, %v12799_v10 }
 0x4e1   : > { %v5380_v20 = vadd.f32 %v8010_v37, %v12799_v10  ;;  %v7614_v51 = vpop.f32.mrb[34].mxu1 }
 0x4e2   : > { %vm5429_vm15 = vcmp.ge.f32.partialorder %v5381_v32, 0.0  ;;  %v5477_v28 = vmul.f32 0.2, %v5381_v32  ;;  %v8011_v1 = vadd.f32 %v7614_v51, %v7094_v48  ;;  %v5096_v13 = vpop.f32.mrb[35].mxu1 }
 0x4e3   : > { %vm5428_vm2 = vcmp.ge.f32.partialorder %v5380_v20, 0.0  ;;  %v5476_v31 = vmul.f32 0.2, %v5380_v20  ;;  %v8012_v11 = vadd.f32 %v5096_v13, %v12733_v44 }
 0x4e4   : > { %v5525_v49 = vsel %vm5429_vm15, %v5381_v32, %v5477_v28  ;;  %v5383_v14 = vadd.f32 %v8011_v1, %v12799_v10 }
 0x4e5   : > { %5573 = vst [vmem:[%s12806_s27 + $0x8] sm:$0xff] %v5525_v49  ;;  %v5524_v38 = vsel %vm5428_vm2, %v5380_v20, %v5476_v31  ;;  %v5382_v54 = vadd.f32 %v8012_v11, %v12799_v10  ;;  %v7617_v46 = vpop.f32.mrb[36].mxu1 }
 0x4e6   : > { %5572 = vst [vmem:[%s12806_s27] sm:$0xff] %v5524_v38  ;;  %vm5431_vm9 = vcmp.ge.f32.partialorder %v5383_v14, 0.0  ;;  %v5479_v48 = vmul.f32 0.2, %v5383_v14  ;;  %v8013_v23 = vadd.f32 %v7617_v46, %v12737_v3  ;;  %v5106_v44 = vpop.f32.mrb[37].mxu1 }
 0x4e7   : > { %vm5430_vm1 = vcmp.ge.f32.partialorder %v5382_v54, 0.0  ;;  %v5478_v17 = vmul.f32 0.2, %v5382_v54  ;;  %v8014_v56 = vadd.f32 %v5106_v44, %v12739_v57 }
 0x4e8   : > { %v5527_v37 = vsel %vm5431_vm9, %v5383_v14, %v5479_v48  ;;  %v5385_v32 = vadd.f32 %v8013_v23, %v12799_v10 }
 0x4e9   : > { %5575 = vst [vmem:[%s12806_s27 + $0x18] sm:$0xff] %v5527_v37  ;;  %v5526_v20 = vsel %vm5430_vm1, %v5382_v54, %v5478_v17  ;;  %v5384_v51 = vadd.f32 %v8014_v56, %v12799_v10  ;;  %v7620_v28 = vpop.f32.mrb[38].mxu1 }
 0x4ea   : > { %5574 = vst [vmem:[%s12806_s27 + $0x10] sm:$0xff] %v5526_v20  ;;  %vm5433_vm7 = vcmp.ge.f32.partialorder %v5385_v32, 0.0  ;;  %v5481_v1 = vmul.f32 0.2, %v5385_v32  ;;  %v8015_v3 = vadd.f32 %v7620_v28, %v12743_v15  ;;  %v5116_v13 = vpop.f32.mrb[39].mxu1 }
 0x4eb   : > { %vm5432_vm12 = vcmp.ge.f32.partialorder %v5384_v51, 0.0  ;;  %v5480_v31 = vmul.f32 0.2, %v5384_v51  ;;  %v8016_v57 = vadd.f32 %v5116_v13, %v12745_v6 }
 0x4ec   : > { %v5529_v11 = vsel %vm5433_vm7, %v5385_v32, %v5481_v1  ;;  %v5387_v49 = vadd.f32 %v8015_v3, %v12799_v10 }
 0x4ed   : > { %5577 = vst [vmem:[%s12806_s27 + $0x28] sm:$0xff] %v5529_v11  ;;  %v5528_v14 = vsel %vm5432_vm12, %v5384_v51, %v5480_v31  ;;  %v5386_v38 = vadd.f32 %v8016_v57, %v12799_v10  ;;  %v7623_v54 = vpop.f32.mrb[40].mxu1 }
 0x4ee   : > { %5576 = vst [vmem:[%s12806_s27 + $0x20] sm:$0xff] %v5528_v14  ;;  %vm5435_vm4 = vcmp.ge.f32.partialorder %v5387_v49, 0.0  ;;  %v5483_v46 = vmul.f32 0.2, %v5387_v49  ;;  %v8017_v15 = vadd.f32 %v7623_v54, %v12749_v8  ;;  %v5126_v48 = vpop.f32.mrb[41].mxu1 }
 0x4ef   : > { %vm5434_vm10 = vcmp.ge.f32.partialorder %v5386_v38, 0.0  ;;  %v5482_v23 = vmul.f32 0.2, %v5386_v38  ;;  %v8018_v6 = vadd.f32 %v5126_v48, %v12751_v24 }
 0x4f0   : > { %v5531_v44 = vsel %vm5435_vm4, %v5387_v49, %v5483_v46  ;;  %v5389_v17 = vadd.f32 %v8017_v15, %v12799_v10 }
 0x4f1   : > { %5579 = vst [vmem:[%s12806_s27 + $0x38] sm:$0xff] %v5531_v44  ;;  %v5530_v56 = vsel %vm5434_vm10, %v5386_v38, %v5482_v23  ;;  %v5388_v37 = vadd.f32 %v8018_v6, %v12799_v10  ;;  %v7626_v32 = vpop.f32.mrb[42].mxu1 }
 0x4f2   : > { %5578 = vst [vmem:[%s12806_s27 + $0x30] sm:$0xff] %v5530_v56  ;;  %vm5437_vm0 = vcmp.ge.f32.partialorder %v5389_v17, 0.0  ;;  %v5485_v20 = vmul.f32 0.2, %v5389_v17  ;;  %v8019_v8 = vadd.f32 %v7626_v32, %v12755_v7  ;;  %v5136_v51 = vpop.f32.mrb[43].mxu1 }
 0x4f3   : > { %vm5436_vm5 = vcmp.ge.f32.partialorder %v5388_v37, 0.0  ;;  %v5484_v28 = vmul.f32 0.2, %v5388_v37  ;;  %v8020_v24 = vadd.f32 %v5136_v51, %v12757_v27 }
 0x4f4   : > { %v5533_v1 = vsel %vm5437_vm0, %v5389_v17, %v5485_v20  ;;  %v5391_v3 = vadd.f32 %v8019_v8, %v12799_v10 }
 0x4f5   : > { %5581 = vst [vmem:[%s12806_s27 + $0x48] sm:$0xff] %v5533_v1  ;;  %v5532_v13 = vsel %vm5436_vm5, %v5388_v37, %v5484_v28  ;;  %v5390_v31 = vadd.f32 %v8020_v24, %v12799_v10  ;;  %v7629_v57 = vpop.f32.mrb[44].mxu1 }
 0x4f6   : > { %5580 = vst [vmem:[%s12806_s27 + $0x40] sm:$0xff] %v5532_v13  ;;  %vm5439_vm3 = vcmp.ge.f32.partialorder %v5391_v3, 0.0  ;;  %v5487_v11 = vmul.f32 0.2, %v5391_v3  ;;  %v8021_v7 = vadd.f32 %v7629_v57, %v12761_v55  ;;  %v5146_v49 = vpop.f32.mrb[45].mxu1 }
 0x4f7   : > { %vm5438_vm8 = vcmp.ge.f32.partialorder %v5390_v31, 0.0  ;;  %v5486_v14 = vmul.f32 0.2, %v5390_v31  ;;  %v8022_v27 = vadd.f32 %v5146_v49, %v12763_v12 }
 0x4f8   : > { %v5535_v38 = vsel %vm5439_vm3, %v5391_v3, %v5487_v11  ;;  %v5393_v54 = vadd.f32 %v8021_v7, %v12799_v10 }
 0x4f9   : > { %5583 = vst [vmem:[%s12806_s27 + $0x58] sm:$0xff] %v5535_v38  ;;  %v5534_v46 = vsel %vm5438_vm8, %v5390_v31, %v5486_v14  ;;  %v5392_v15 = vadd.f32 %v8022_v27, %v12799_v10  ;;  %v7632_v48 = vpop.f32.mrb[46].mxu1 }
 0x4fa   : > { %5582 = vst [vmem:[%s12806_s27 + $0x50] sm:$0xff] %v5534_v46  ;;  %vm5441_vm11 = vcmp.ge.f32.partialorder %v5393_v54, 0.0  ;;  %v5489_v23 = vmul.f32 0.2, %v5393_v54  ;;  %v8023_v55 = vadd.f32 %v7632_v48, %v12767_v52  ;;  %v5156_v6 = vpop.f32.mrb[47].mxu1 }
 0x4fb   : > { %vm5440_vm13 = vcmp.ge.f32.partialorder %v5392_v15, 0.0  ;;  %v5488_v44 = vmul.f32 0.2, %v5392_v15  ;;  %v8024_v12 = vadd.f32 %v5156_v6, %v12769_v47 }
 0x4fc   : > { %v5537_v17 = vsel %vm5441_vm11, %v5393_v54, %v5489_v23  ;;  %v5395_v56 = vadd.f32 %v8023_v55, %v12799_v10 }
 0x4fd   : > { %5585 = vst [vmem:[%s12806_s27 + $0x68] sm:$0xff] %v5537_v17  ;;  %v5536_v37 = vsel %vm5440_vm13, %v5392_v15, %v5488_v44  ;;  %v5394_v32 = vadd.f32 %v8024_v12, %v12799_v10  ;;  %v7635_v20 = vpop.f32.mrb[0].mxu1 }
 0x4fe   : > { %5584 = vst [vmem:[%s12806_s27 + $0x60] sm:$0xff] %v5536_v37  ;;  %vm5443_vm6 = vcmp.ge.f32.partialorder %v5395_v56, 0.0  ;;  %v5491_v8 = vmul.f32 0.2, %v5395_v56  ;;  %v8025_v52 = vadd.f32 %v7635_v20, %v12630_v41  ;;  %v5166_v51 = vpop.f32.mrb[1].mxu1 }
 0x4ff   : > { %vm5442_vm14 = vcmp.ge.f32.partialorder %v5394_v32, 0.0  ;;  %v5490_v28 = vmul.f32 0.2, %v5394_v32  ;;  %v8026_v47 = vadd.f32 %v5166_v51, %v12632_v43 }
 0x500   : > { %v5539_v24 = vsel %vm5443_vm6, %v5395_v56, %v5491_v8  ;;  %v5397_v1 = vadd.f32 %v8025_v52, %v12799_v10 }
 0x501   : > { %5587 = vst [vmem:[%s12806_s27 + $0x78] sm:$0xff] %v5539_v24  ;;  %v5538_v3 = vsel %vm5442_vm14, %v5394_v32, %v5490_v28  ;;  %v5396_v13 = vadd.f32 %v8026_v47, %v12799_v10  ;;  %v7638_v31 = vpop.f32.mrb[2].mxu1 }
 0x502   : > { %5586 = vst [vmem:[%s12806_s27 + $0x70] sm:$0xff] %v5538_v3  ;;  %vm5445_vm15 = vcmp.ge.f32.partialorder %v5397_v1, 0.0  ;;  %v5493_v57 = vmul.f32 0.2, %v5397_v1  ;;  %v8027_v41 = vadd.f32 %v7638_v31, %v12636_v29  ;;  %v5176_v11 = vpop.f32.mrb[3].mxu1 }
 0x503   : > { %vm5444_vm2 = vcmp.ge.f32.partialorder %v5396_v13, 0.0  ;;  %v5492_v7 = vmul.f32 0.2, %v5396_v13  ;;  %v8028_v43 = vadd.f32 %v5176_v11, %v12638_v39 }
 0x504   : > { %v5541_v49 = vsel %vm5445_vm15, %v5397_v1, %v5493_v57  ;;  %v5399_v14 = vadd.f32 %v8027_v41, %v12799_v10 }
 0x505   : > { %5589 = vst [vmem:[%s12806_s27 + $0x88] sm:$0xff] %v5541_v49  ;;  %v5540_v27 = vsel %vm5444_vm2, %v5396_v13, %v5492_v7  ;;  %v5398_v38 = vadd.f32 %v8028_v43, %v12799_v10  ;;  %v7641_v54 = vpop.f32.mrb[4].mxu1 }
 0x506   : > { %5588 = vst [vmem:[%s12806_s27 + $0x80] sm:$0xff] %v5540_v27  ;;  %vm5447_vm9 = vcmp.ge.f32.partialorder %v5399_v14, 0.0  ;;  %v5495_v46 = vmul.f32 0.2, %v5399_v14  ;;  %v8029_v29 = vadd.f32 %v7641_v54, %v12642_v34  ;;  %v5186_v15 = vpop.f32.mrb[5].mxu1 }
 0x507   : > { %vm5446_vm1 = vcmp.ge.f32.partialorder %v5398_v38, 0.0  ;;  %v5494_v48 = vmul.f32 0.2, %v5398_v38  ;;  %v8030_v39 = vadd.f32 %v5186_v15, %v12644_v9 }
 0x508   : > { %v5543_v23 = vsel %vm5447_vm9, %v5399_v14, %v5495_v46  ;;  %v5401_v55 = vadd.f32 %v8029_v29, %v12799_v10 }
 0x509   : > { %5591 = vst [vmem:[%s12806_s27 + $0x98] sm:$0xff] %v5543_v23  ;;  %v5542_v6 = vsel %vm5446_vm1, %v5398_v38, %v5494_v48  ;;  %v5400_v44 = vadd.f32 %v8030_v39, %v12799_v10  ;;  %v7644_v12 = vpop.f32.mrb[6].mxu1 }
 0x50a   : > { %5590 = vst [vmem:[%s12806_s27 + $0x90] sm:$0xff] %v5542_v6  ;;  %vm5449_vm7 = vcmp.ge.f32.partialorder %v5401_v55, 0.0  ;;  %v5497_v17 = vmul.f32 0.2, %v5401_v55  ;;  %v8031_v34 = vadd.f32 %v7644_v12, %v12648_v59  ;;  %v5196_v56 = vpop.f32.mrb[7].mxu1 }
 0x50b   : > { %vm5448_vm12 = vcmp.ge.f32.partialorder %v5400_v44, 0.0  ;;  %v5496_v37 = vmul.f32 0.2, %v5400_v44  ;;  %v8032_v9 = vadd.f32 %v5196_v56, %v12650_v58 }
 0x50c   : > { %v5545_v32 = vsel %vm5449_vm7, %v5401_v55, %v5497_v17  ;;  %v5403_v20 = vadd.f32 %v8031_v34, %v12799_v10 }
 0x50d   : > { %5593 = vst [vmem:[%s12806_s27 + $0xa8] sm:$0xff] %v5545_v32  ;;  %v5544_v8 = vsel %vm5448_vm12, %v5400_v44, %v5496_v37  ;;  %v5402_v52 = vadd.f32 %v8032_v9, %v12799_v10  ;;  %v7647_v51 = vpop.f32.mrb[8].mxu1 }
 0x50e   : > { %5592 = vst [vmem:[%s12806_s27 + $0xa0] sm:$0xff] %v5544_v8  ;;  %vm5451_vm4 = vcmp.ge.f32.partialorder %v5403_v20, 0.0  ;;  %v5499_v28 = vmul.f32 0.2, %v5403_v20  ;;  %v8033_v59 = vadd.f32 %v7647_v51, %v12654_v18  ;;  %v5206_v47 = vpop.f32.mrb[9].mxu1 }
 0x50f   : > { %vm5450_vm10 = vcmp.ge.f32.partialorder %v5402_v52, 0.0  ;;  %v5498_v24 = vmul.f32 0.2, %v5402_v52  ;;  %v8034_v58 = vadd.f32 %v5206_v47, %v12656_v42 }
 0x510   : > { %v5547_v1 = vsel %vm5451_vm4, %v5403_v20, %v5499_v28  ;;  %v5405_v3 = vadd.f32 %v8033_v59, %v12799_v10 }
 0x511   : > { %5595 = vst [vmem:[%s12806_s27 + $0xb8] sm:$0xff] %v5547_v1  ;;  %v5546_v13 = vsel %vm5450_vm10, %v5402_v52, %v5498_v24  ;;  %v5404_v31 = vadd.f32 %v8034_v58, %v12799_v10  ;;  %v7650_v57 = vpop.f32.mrb[10].mxu1 }
 0x512   : > { %5594 = vst [vmem:[%s12806_s27 + $0xb0] sm:$0xff] %v5546_v13  ;;  %vm5453_vm0 = vcmp.ge.f32.partialorder %v5405_v3, 0.0  ;;  %v5501_v41 = vmul.f32 0.2, %v5405_v3  ;;  %v8035_v18 = vadd.f32 %v7650_v57, %v12660_v5  ;;  %v5216_v11 = vpop.f32.mrb[11].mxu1 }
 0x513   : > { %vm5452_vm5 = vcmp.ge.f32.partialorder %v5404_v31, 0.0  ;;  %v5500_v7 = vmul.f32 0.2, %v5404_v31  ;;  %v8036_v42 = vadd.f32 %v5216_v11, %v12662_v35 }
 0x514   : > { %v5549_v43 = vsel %vm5453_vm0, %v5405_v3, %v5501_v41  ;;  %v5407_v49 = vadd.f32 %v8035_v18, %v12799_v10 }
 0x515   : > { %5597 = vst [vmem:[%s12806_s27 + $0xc8] sm:$0xff] %v5549_v43  ;;  %v5548_v14 = vsel %vm5452_vm5, %v5404_v31, %v5500_v7  ;;  %v5406_v27 = vadd.f32 %v8036_v42, %v12799_v10  ;;  %v7653_v38 = vpop.f32.mrb[12].mxu1 }
 0x516   : > { %5596 = vst [vmem:[%s12806_s27 + $0xc0] sm:$0xff] %v5548_v14  ;;  %vm5455_vm3 = vcmp.ge.f32.partialorder %v5407_v49, 0.0  ;;  %v5503_v54 = vmul.f32 0.2, %v5407_v49  ;;  %v8037_v5 = vadd.f32 %v7653_v38, %v12666_v25  ;;  %v5226_v46 = vpop.f32.mrb[13].mxu1 }
 0x517   : > { %vm5454_vm8 = vcmp.ge.f32.partialorder %v5406_v27, 0.0  ;;  %v5502_v29 = vmul.f32 0.2, %v5406_v27  ;;  %v8038_v35 = vadd.f32 %v5226_v46, %v12668_v62 }
 0x518   : > { %v5551_v15 = vsel %vm5455_vm3, %v5407_v49, %v5503_v54  ;;  %v5409_v48 = vadd.f32 %v8037_v5, %v12799_v10 }
 0x519   : > { %5599 = vst [vmem:[%s12806_s27 + $0xd8] sm:$0xff] %v5551_v15  ;;  %v5550_v39 = vsel %vm5454_vm8, %v5406_v27, %v5502_v29  ;;  %v5408_v23 = vadd.f32 %v8038_v35, %v12799_v10  ;;  %v7656_v55 = vpop.f32.mrb[14].mxu1 }
 0x51a   : > { %5598 = vst [vmem:[%s12806_s27 + $0xd0] sm:$0xff] %v5550_v39  ;;  %vm5457_vm11 = vcmp.ge.f32.partialorder %v5409_v48, 0.0  ;;  %v5505_v6 = vmul.f32 0.2, %v5409_v48  ;;  %v8039_v25 = vadd.f32 %v7656_v55, %v12672_v45  ;;  %v5236_v44 = vpop.f32.mrb[15].mxu1 }
 0x51b   : > { %vm5456_vm13 = vcmp.ge.f32.partialorder %v5408_v23, 0.0  ;;  %v5504_v12 = vmul.f32 0.2, %v5408_v23  ;;  %v8040_v62 = vadd.f32 %v5236_v44, %v12674_v53 }
 0x51c   : > { %v5553_v17 = vsel %vm5457_vm11, %v5409_v48, %v5505_v6  ;;  %v5411_v34 = vadd.f32 %v8039_v25, %v12799_v10 }
 0x51d   : > { %5601 = vst [vmem:[%s12806_s27 + $0xe8] sm:$0xff] %v5553_v17  ;;  %v5552_v56 = vsel %vm5456_vm13, %v5408_v23, %v5504_v12  ;;  %v5410_v37 = vadd.f32 %v8040_v62, %v12799_v10  ;;  %v7659_v9 = vpop.f32.mrb[16].mxu1 }
 0x51e   : > { %5600 = vst [vmem:[%s12806_s27 + $0xe0] sm:$0xff] %v5552_v56  ;;  %vm5459_vm6 = vcmp.ge.f32.partialorder %v5411_v34, 0.0  ;;  %v5507_v32 = vmul.f32 0.2, %v5411_v34  ;;  %v8041_v45 = vadd.f32 %v7659_v9, %v12678_v40  ;;  %v5246_v20 = vpop.f32.mrb[17].mxu1 }
 0x51f   : > { %vm5458_vm14 = vcmp.ge.f32.partialorder %v5410_v37, 0.0  ;;  %v5506_v8 = vmul.f32 0.2, %v5410_v37  ;;  %v8042_v53 = vadd.f32 %v5246_v20, %v12680_v0 }
 0x520   : > { %v5555_v52 = vsel %vm5459_vm6, %v5411_v34, %v5507_v32  ;;  %v5413_v51 = vadd.f32 %v8041_v45, %v12799_v10 }
 0x521   : > { %5603 = vst [vmem:[%s12806_s27 + $0xf8] sm:$0xff] %v5555_v52  ;;  %v5554_v28 = vsel %vm5458_vm14, %v5410_v37, %v5506_v8  ;;  %v5412_v59 = vadd.f32 %v8042_v53, %v12799_v10  ;;  %v7662_v47 = vpop.f32.mrb[18].mxu1 }
 0x522   : > { %5602 = vst [vmem:[%s12806_s27 + $0xf0] sm:$0xff] %v5554_v28  ;;  %vm5461_vm15 = vcmp.ge.f32.partialorder %v5413_v51, 0.0  ;;  %v5509_v24 = vmul.f32 0.2, %v5413_v51  ;;  %v8043_v40 = vadd.f32 %v7662_v47, %v12685_v19  ;;  %v5256_v58 = vpop.f32.mrb[19].mxu1 }
 0x523   : > { %vm5460_vm2 = vcmp.ge.f32.partialorder %v5412_v59, 0.0  ;;  %v5508_v1 = vmul.f32 0.2, %v5412_v59  ;;  %v8044_v0 = vadd.f32 %v5256_v58, %v12688_v2 }
 0x524   : > { %v5557_v3 = vsel %vm5461_vm15, %v5413_v51, %v5509_v24  ;;  %v5415_v13 = vadd.f32 %v8043_v40, %v12799_v10 }
 0x525   : > { %5605 = vst [vmem:[%s12806_s27 + $0x108] sm:$0xff] %v5557_v3  ;;  %v5556_v31 = vsel %vm5460_vm2, %v5412_v59, %v5508_v1  ;;  %v5414_v57 = vadd.f32 %v8044_v0, %v12799_v10  ;;  %v7665_v41 = vpop.f32.mrb[20].mxu1 }
 0x526   : > { %5604 = vst [vmem:[%s12806_s27 + $0x100] sm:$0xff] %v5556_v31  ;;  %vm5463_vm9 = vcmp.ge.f32.partialorder %v5415_v13, 0.0  ;;  %v5511_v18 = vmul.f32 0.2, %v5415_v13  ;;  %v8045_v19 = vadd.f32 %v7665_v41, %v12692_v4  ;;  %v5266_v11 = vpop.f32.mrb[21].mxu1 }
 0x527   : > { %vm5462_vm1 = vcmp.ge.f32.partialorder %v5414_v57, 0.0  ;;  %v5510_v7 = vmul.f32 0.2, %v5414_v57  ;;  %v8046_v2 = vadd.f32 %v5266_v11, %v12698_v60 }
 0x528   : > { %v5559_v42 = vsel %vm5463_vm9, %v5415_v13, %v5511_v18  ;;  %v5417_v43 = vadd.f32 %v8045_v19, %v12799_v10 }
 0x529   : > { %5607 = vst [vmem:[%s12806_s27 + $0x118] sm:$0xff] %v5559_v42  ;;  %v5558_v49 = vsel %vm5462_vm1, %v5414_v57, %v5510_v7  ;;  %v5416_v14 = vadd.f32 %v8046_v2, %v12799_v10  ;;  %v7668_v27 = vpop.f32.mrb[22].mxu1 }
 0x52a   : > { %5606 = vst [vmem:[%s12806_s27 + $0x110] sm:$0xff] %v5558_v49  ;;  %vm5465_vm7 = vcmp.ge.f32.partialorder %v5417_v43, 0.0  ;;  %v5513_v38 = vmul.f32 0.2, %v5417_v43  ;;  %v8047_v4 = vadd.f32 %v7668_v27, %v12701_v36  ;;  %v5276_v54 = vpop.f32.mrb[23].mxu1 }
 0x52b   : > { %vm5464_vm12 = vcmp.ge.f32.partialorder %v5416_v14, 0.0  ;;  %v5512_v5 = vmul.f32 0.2, %v5416_v14  ;;  %v8048_v60 = vadd.f32 %v5276_v54, %v12704_v16 }
 0x52c   : > { %v5561_v46 = vsel %vm5465_vm7, %v5417_v43, %v5513_v38  ;;  %v5419_v29 = vadd.f32 %v8047_v4, %v12799_v10 }
 0x52d   : > { %5609 = vst [vmem:[%s12806_s27 + $0x128] sm:$0xff] %v5561_v46  ;;  %v5560_v35 = vsel %vm5464_vm12, %v5416_v14, %v5512_v5  ;;  %v5418_v15 = vadd.f32 %v8048_v60, %v12799_v10  ;;  %v7671_v48 = vpop.f32.mrb[24].mxu1 }
 0x52e   : > { %5608 = vst [vmem:[%s12806_s27 + $0x120] sm:$0xff] %v5560_v35  ;;  %vm5467_vm4 = vcmp.ge.f32.partialorder %v5419_v29, 0.0  ;;  %v5515_v39 = vmul.f32 0.2, %v5419_v29  ;;  %v8049_v36 = vadd.f32 %v7671_v48, %v12707_v63  ;;  %v5286_v23 = vpop.f32.mrb[25].mxu1 }
 0x52f   : > { %vm5466_vm10 = vcmp.ge.f32.partialorder %v5418_v15, 0.0  ;;  %v5514_v55 = vmul.f32 0.2, %v5418_v15  ;;  %v8050_v16 = vadd.f32 %v5286_v23, %v12709_v61 }
 0x530   : > { %v5563_v6 = vsel %vm5467_vm4, %v5419_v29, %v5515_v39  ;;  %v5421_v25 = vadd.f32 %v8049_v36, %v12799_v10 }
 0x531   : > { %5611 = vst [vmem:[%s12806_s27 + $0x138] sm:$0xff] %v5563_v6  ;;  %v5562_v44 = vsel %vm5466_vm10, %v5418_v15, %v5514_v55  ;;  %v5420_v12 = vadd.f32 %v8050_v16, %v12799_v10  ;;  %v7674_v62 = vpop.f32.mrb[26].mxu1 }
 0x532   : > { %5610 = vst [vmem:[%s12806_s27 + $0x130] sm:$0xff] %v5562_v44  ;;  %vm5469_vm0 = vcmp.ge.f32.partialorder %v5421_v25, 0.0  ;;  %v5517_v17 = vmul.f32 0.2, %v5421_v25  ;;  %v8051_v63 = vadd.f32 %v7674_v62, %v12713_v26  ;;  %v5296_v34 = vpop.f32.mrb[27].mxu1 }
 0x533   : > { %vm5468_vm5 = vcmp.ge.f32.partialorder %v5420_v12, 0.0  ;;  %v5516_v56 = vmul.f32 0.2, %v5420_v12  ;;  %v8052_v61 = vadd.f32 %v5296_v34, %v12715_v33 }
 0x534   : > { %v5565_v37 = vsel %vm5469_vm0, %v5421_v25, %v5517_v17  ;;  %v5423_v9 = vadd.f32 %v8051_v63, %v12799_v10 }
 0x535   : > { %5613 = vst [vmem:[%s12806_s27 + $0x148] sm:$0xff] %v5565_v37  ;;  %v5564_v32 = vsel %vm5468_vm5, %v5420_v12, %v5516_v56  ;;  %v5422_v45 = vadd.f32 %v8052_v61, %v12799_v10  ;;  %v7677_v20 = vpop.f32.mrb[28].mxu1 }
 0x536   : > { %5612 = vst [vmem:[%s12806_s27 + $0x140] sm:$0xff] %v5564_v32  ;;  %vm5471_vm3 = vcmp.ge.f32.partialorder %v5423_v9, 0.0  ;;  %v5519_v8 = vmul.f32 0.2, %v5423_v9  ;;  %v8053_v26 = vadd.f32 %v7677_v20, %v12719_v21  ;;  %v5306_v53 = vpop.f32.mrb[29].mxu1 }
 0x537   : > { %vm5470_vm8 = vcmp.ge.f32.partialorder %v5422_v45, 0.0  ;;  %v5518_v52 = vmul.f32 0.2, %v5422_v45  ;;  %v8054_v33 = vadd.f32 %v5306_v53, %v12721_v22 }
 0x538   : > { %v5567_v51 = vsel %vm5471_vm3, %v5423_v9, %v5519_v8  ;;  %v5425_v28 = vadd.f32 %v8053_v26, %v12799_v10 }
 0x539   : > { %5615 = vst [vmem:[%s12806_s27 + $0x158] sm:$0xff] %v5567_v51  ;;  %v5566_v59 = vsel %vm5470_vm8, %v5422_v45, %v5518_v52  ;;  %v5424_v47 = vadd.f32 %v8054_v33, %v12799_v10  ;;  %v7680_v24 = vpop.f32.mrb[30].mxu1 }
 0x53a   : > { %5614 = vst [vmem:[%s12806_s27 + $0x150] sm:$0xff] %v5566_v59  ;;  %vm5473_vm11 = vcmp.ge.f32.partialorder %v5425_v28, 0.0  ;;  %v5521_v21 = vmul.f32 0.2, %v5425_v28  ;;  %v8055_v40 = vadd.f32 %v7680_v24, %v12725_v30  ;;  %v5316_v58 = vpop.f32.mrb[31].mxu1 }
 0x53b   : > { %vm5472_vm13 = vcmp.ge.f32.partialorder %v5424_v47, 0.0  ;;  %v5520_v1 = vmul.f32 0.2, %v5424_v47  ;;  %v8056_v22 = vadd.f32 %v5316_v58, %v12727_v50 }
 0x53c   : > { %v5569_v0 = vsel %vm5473_vm11, %v5425_v28, %v5521_v21  ;;  %v5427_v3 = vadd.f32 %v8055_v40, %v12799_v10 }
 0x53d   : > { %5617 = vst [vmem:[%s12806_s27 + $0x168] sm:$0xff] %v5569_v0  ;;  %v5568_v13 = vsel %vm5472_vm13, %v5424_v47, %v5520_v1  ;;  %v5426_v31 = vadd.f32 %v8056_v22, %v12799_v10 }
 0x53e   : > { %5616 = vst [vmem:[%s12806_s27 + $0x160] sm:$0xff] %v5568_v13  ;;  %vm5475_vm6 = vcmp.ge.f32.partialorder %v5427_v3, 0.0  ;;  %v5523_v30 = vmul.f32 0.2, %v5427_v3 }
 0x53f   : > { %vm5474_vm14 = vcmp.ge.f32.partialorder %v5426_v31, 0.0  ;;  %v5522_v57 = vmul.f32 0.2, %v5426_v31 }
 0x540   : > { %v5571_v50 = vsel %vm5475_vm6, %v5427_v3, %v5523_v30 }
 0x541   : > { %5619 = vst [vmem:[%s12806_s27 + $0x178] sm:$0xff] %v5571_v50  ;;  %v5570_v10 = vsel %vm5474_vm14, %v5426_v31, %v5522_v57 }
 0x542   : > { %5618 = vst [vmem:[%s12806_s27 + $0x170] sm:$0xff] %v5570_v10 }
 0x543   : > { %8590 = shalt.err (!%p8587_p2)
}
 0x544   : > { %s8591_s12 = scalar_lea.hbm %s12948_s21, 6144  ;;  %s8595_s24 = scalar_lea.hbm %s13006_s5, 12288 }
 0x545   : > { %p8592_p0 = scmp.ne.s32.totalorder %s12948_s21, %s8591_s12  ;;  %p8596_p6 = scmp.lt.u32.totalorder %s12948_s21, %s13006_s5 }
 0x546   : > { %p8597_p7 = scmp.lt.u32.totalorder %s8595_s24, %s8591_s12  ;;  %p8599_p8 = scmp.lt.u32.totalorder %s8591_s12, %s12948_s21 }
 0x547   : > { %p8593_p4 = pnand %p8592_p0, %p14725_p12 }
 0x548   : > { %p8598_p11 = por %p8597_p7, %p8596_p6 }
 0x549   : > { %p8594_p13 = pneg %p8593_p4 }
 0x54a   : > { %p8600_p1 = por %p8599_p8, %p8598_p11 }
 0x54c   : > { %p8601_p10 = pnand %p8600_p1, %p8594_p13 }
 0x54e   : > { %8604 = shalt.err (!%p8601_p10)
}
 0x54f   : > { %s8674_s26 = smov 128   ;;  %s8675_s28 = smov 8  }
 0x550   : > { %8408 = dma.vmem_to_hbm [thread:$0]  (%p14725_p12), %s12950_s11, 6144, %s12948_s21, %s5621_s30, %s8674_s26, %s8674_s26, %s8675_s28  }
 0x551 PF: > { %s5651_s25 = sand.u32 1, %s8643_s18   ;;  %p14726_p3 = scmp.ne.s32.totalorder %s13467_s29, 0 }
 0x552   : > { %p14727_p5 = scmp.ge.s32.totalorder %s8663_s23, 2  ;;  %s5652_s16 = scalar_lea.sflag [#allocation4], %s5651_s25 }
 0x554   : > { %p8422_p9 = pnand %p14727_p5, %p14726_p3 }
 0x556   : > { %8638 = dma.done.wait (!%p8422_p9), %s5652_s16, 6144  }
 0x557   : > { %8640 = vsyncadd (!%p8422_p9), %s5652_s16, 4294961152  ;;  %s22_s23 = sadd.s32 1, %s8663_s23   ;;  %s14728_s18 = smov %s8647_s19 }
 0x558   : > { %p19_p2 = scmp.ge.s32.totalorder %s22_s23, 4   ;;  %s14729_s19 = smov %s8651_s20 }
 0x559   : > { %s14730_s20 = smov %s8857_s17  ;;  %s14731_s21 = smov %s8659_s22 }
 0x55a   : > { %s14732_s22 = smov %s14734_s8  ;;  %21 = sbr.rel (!%p19_p2) target bundleno = 7 (0x7), region = 101 }
 0x561   :  { %5657 = vsyncpa [#allocation3], 1 }
 0x562   :  { %5659 = vsyncpa [#allocation3 + $0x1], 1 }
 0x563   :  { %5660 = vsyncpa [#allocation6], 1 }
 0x564   :  { %5661 = vsyncpa [#allocation4], 1 }
 0x565   :  { %5663 = vsyncpa [#allocation4 + $0x1], 1 }

</bundles_post_ra>
